<compile_context>
chip_gen: v6e
topology: v6e:2x2x1
jax: 0.10.0
libtpu: 0.0.40
codegen_flags: <defaults>
</compile_context>

<pallas_src>
import functools

import jax
import jax.numpy as jnp
from jax import lax
from jax.experimental import pallas as pl
from jax.experimental.pallas import tpu as pltpu

EPS = 1e-5


# ----------------------------- small helpers ---------------------------------

def _hardswish(x):
    return x * jnp.clip(x + 3.0, 0.0, 6.0) * (1.0 / 6.0)


def _zero_frame(ref):
    """Zero the 1-pixel spatial frame (dims 2 and 3) of a rank-5 padded scratch.

    Cheap (4 thin strips) and done every step so the kernel never depends on scratch
    state from a previous grid step (safe under megacore 'parallel' partitioning).
    Must be called BEFORE the interior write (interior may overlap the frame).
    """
    d0, d1, hp, wp, c = ref.shape
    zr = jnp.zeros((d0, d1, 1, wp, c), ref.dtype)
    zc = jnp.zeros((d0, d1, hp, 1, c), ref.dtype)
    ref[:, :, 0:1, :, :] = zr
    ref[:, :, hp - 1:hp, :, :] = zr
    ref[:, :, :, 0:1, :] = zc
    ref[:, :, :, wp - 1:wp, :] = zc


def _dw3x3(scr, pbase, w_ref, sh_ref, stride, ho, wo):
    """3x3 depthwise conv (+folded BN shift) read from a zero-framed, phase-decomposed
    VMEM scratch.  Every tap (strided or not) is a static unit-stride slice."""
    w = w_ref[...]                                   # (9, C) f32, folded with BN scale
    acc = None
    for dy in range(3):
        for dx in range(3):
            p = (dy % stride) * stride + (dx % stride)
            qy, qx = dy // stride, dx // stride
            win = scr[pbase + p, :, qy:qy + ho, qx:qx + wo, :]     # (B, Ho, Wo, C) f32
            k = 3 * dy + dx
            term = win * w[k:k + 1, :]
            acc = term if acc is None else acc + term
    return acc + sh_ref[...]                         # shift: (1, C)


# ------------------------------ fused kernel ----------------------------------

def _inverted_res_ds_kernel(
        planes_ref,
        dw1_w_ref, dw1_sh_ref,
        lin1_w_ref, lin1_sh_ref,
        pw2_w_ref, pw2_sh_ref,
        dw2_w_ref, dw2_sh_ref,
        se_w1_ref, se_b1_ref, se_w2_ref, se_b2_ref,
        lin2_w_ref, lin2_sh_ref,
        dwm_w1_ref, dwm_sh1_ref, dwm_w2_ref, dwm_sh2_ref,
        pwm_sc1_ref, pwm_sh1_ref, pwm_sc2_ref, pwm_sh2_ref,
        o_ref,
        xpad_scr, x2pad_scr, ypad_scr,
        *, stride):
    b, nph, hq0, wq0, cin = planes_ref.shape
    cm = pw2_w_ref.shape[1]
    ch = lin1_w_ref.shape[1]                         # out_ch // 2
    ho, wo = ypad_scr.shape[2] - 2, ypad_scr.shape[3] - 2

    # Un-padded phase stored in input slot p lands at this (row, col) offset inside the
    # (Hq, Wq) padded phase plane p of the zero-padded image.
    if stride == 1:
        offs = ((1, 1),)
    else:
        offs = tuple((1 - p // 2, 1 - p % 2) for p in range(nph))

    planes = planes_ref[...]                         # (B, nph, Hq0, Wq0, Cin) bf16

    # ---- padded-input scratch (branch-1 depthwise source) -----------------------------
    _zero_frame(xpad_scr)
    for p in range(nph):
        oy, ox = offs[p]
        xpad_scr[p, :, oy:oy + hq0, ox:ox + wq0, :] = planes[:, p].astype(jnp.float32)

    # ---- branch 2 pointwise conv: ONE flat bf16 MXU matmul over all real pixels -------
    x2_pre = jnp.dot(planes.reshape(b * nph * hq0 * wq0, cin), pw2_w_ref[...],
                     preferred_element_type=jnp.float32)
    x2_pre = jnp.maximum(x2_pre + pw2_sh_ref[...], 0.0)          # (M2, Cm) f32
    x2_pre = x2_pre.reshape(b, nph, hq0, wq0, cm)
    _zero_frame(x2pad_scr)
    for p in range(nph):
        oy, ox = offs[p]
        x2pad_scr[p, :, oy:oy + hq0, ox:ox + wq0, :] = x2_pre[:, p]

    # ---- branch 1: conv_dw1 (+BN) -> conv_linear1 (+BN) -> ReLU -----------------------
    x1 = _dw3x3(xpad_scr, 0, dw1_w_ref, dw1_sh_ref, stride, ho, wo)   # (B,Ho,Wo,Cin) f32
    x1 = jnp.dot(x1.reshape(b * ho * wo, cin).astype(jnp.bfloat16), lin1_w_ref[...],
                 preferred_element_type=jnp.float32)
    x1 = jnp.maximum(x1 + lin1_sh_ref[...], 0.0)                      # (B*Ho*Wo, ch)

    # ---- branch 2: conv_dw2 (+BN) -> SE -> conv_linear2 (+BN) -> ReLU ------------------
    x2 = _dw3x3(x2pad_scr, 0, dw2_w_ref, dw2_sh_ref, stride, ho, wo)  # (B,Ho,Wo,Cm) f32
    x2 = x2.reshape(b, ho * wo, cm)
    # Squeeze-Excite on the VPU/XLU: tiny FCs as multiply + reduce (no MXU push/pop).
    m = jnp.mean(x2, axis=1)                                          # (B, Cm) per image
    hid = jnp.sum(se_w1_ref[...][None] * m[:, None, :], axis=-1, keepdims=True)
    hid = jnp.maximum(hid + se_b1_ref[...], 0.0)                      # (B, Cr, 1)
    gate = jax.nn.sigmoid(jnp.sum(se_w2_ref[...][None] * hid, axis=1, keepdims=True)
                          + se_b2_ref[...])                           # (B, 1, Cm)
    x2 = x2 * gate
    x2 = jnp.dot(x2.reshape(b * ho * wo, cm).astype(jnp.bfloat16), lin2_w_ref[...],
                 preferred_element_type=jnp.float32)
    x2 = jnp.maximum(x2 + lin2_sh_ref[...], 0.0)                      # (B*Ho*Wo, ch)

    # ---- final stage per branch (conv_dw_mv1 / conv_pw_mv1 are depthwise, so the
    #      PyTorch concat is just two independent channel groups) -----------------------
    _zero_frame(ypad_scr)
    ypad_scr[0, :, 1:ho + 1, 1:wo + 1, :] = x1.reshape(b, ho, wo, ch)
    ypad_scr[1, :, 1:ho + 1, 1:wo + 1, :] = x2.reshape(b, ho, wo, ch)

    y1 = _hardswish(_dw3x3(ypad_scr, 0, dwm_w1_ref, dwm_sh1_ref, 1, ho, wo))
    y1 = _hardswish(y1 * pwm_sc1_ref[...] + pwm_sh1_ref[...])
    y2 = _hardswish(_dw3x3(ypad_scr, 1, dwm_w2_ref, dwm_sh2_ref, 1, ho, wo))
    y2 = _hardswish(y2 * pwm_sc2_ref[...] + pwm_sh2_ref[...])

    o_ref[:, 0:1, :, :, :] = y1[:, None]
    o_ref[:, 1:2, :, :, :] = y2[:, None]


# ------------------------------ public wrapper --------------------------------

def inverted_res_ds(x_nchw, params, *, stride):
    assert stride in (1, 2)
    x = jnp.transpose(x_nchw, (0, 2, 3, 1)).astype(jnp.float32)       # NHWC
    n, h, w, cin = x.shape
    if stride == 2:
        assert h % 2 == 0 and w % 2 == 0, "stride-2 phase decomposition needs even H, W"
    ho = (h + 2 - 3) // stride + 1
    wo = (w + 2 - 3) // stride + 1

    dw1_w, dw1_sh = params["dw1"]
    lin1_w, lin1_sh = params["linear1"]
    pw2_w, pw2_sh = params["pw2"]
    dw2_w, dw2_sh = params["dw2"]
    se_w1, se_b1, se_w2, se_b2 = params["se"]
    lin2_w, lin2_sh = params["linear2"]
    dwm_w, dwm_sh = params["dw_mv1"]
    pwm_sc, pwm_sh = params["pw_mv1"]

    cm = pw2_w.shape[1]
    cout = dwm_w.shape[1]
    ch = cout // 2
    cr = se_w1.shape[1]

    # Phase-decompose the *un-padded* input: slot p holds the data that lands in padded
    # phase plane p inside the kernel.  bf16 halves the streamed HBM bytes and feeds the
    # MXU at native rate; accumulation / elementwise math stays f32 in the kernel.
    if stride == 1:
        planes = x[:, None]                                            # (N,1,H,W,Cin)
    else:
        planes = jnp.stack([x[:, 1::2, 1::2], x[:, 1::2, 0::2],
                            x[:, 0::2, 1::2], x[:, 0::2, 0::2]], axis=1)
    planes = planes.astype(jnp.bfloat16)
    nph, hq0, wq0 = planes.shape[1], planes.shape[2], planes.shape[3]
    hq = ho + (1 if stride == 2 else 2)
    wq = wo + (1 if stride == 2 else 2)

    def row(a):        # per-channel vector -> (1, C) for in-kernel broadcasting
        return a.reshape(1, -1).astype(jnp.float32)

    bf = jnp.bfloat16
    f32 = jnp.float32
    args = [
        planes,
        dw1_w.astype(f32), row(dw1_sh),
        lin1_w.astype(bf), row(lin1_sh),
        pw2_w.astype(bf), row(pw2_sh),
        dw2_w.astype(f32), row(dw2_sh),
        se_w1.T.astype(f32), se_b1.reshape(cr, 1).astype(f32),
        se_w2.astype(f32), row(se_b2),
        lin2_w.astype(bf), row(lin2_sh),
        dwm_w[:, :ch].astype(f32), row(dwm_sh[:ch]),
        dwm_w[:, ch:].astype(f32), row(dwm_sh[ch:]),
        row(pwm_sc[:ch]), row(pwm_sh[:ch]),
        row(pwm_sc[ch:]), row(pwm_sh[ch:]),
    ]

    # Images per grid step: fold the per-step batch into the matmul M dim to amortize
    # per-step overhead, but keep >= 2 steps for v7x megacore and stay well inside a
    # conservative VMEM budget (v7x has only 64 MiB per TensorCore).
    per_img = (2 * (nph * hq0 * wq0 * cin * 2 + 2 * ho * wo * ch * 4)            # dbl-buffered I/O
               + (nph * hq * wq * (cin + cm) + 2 * (ho + 2) * (wo + 2) * ch) * 4)  # scratches
    b = 1
    for cand in range(1, n + 1):
        if n % cand == 0 and n // cand >= 2 and cand * per_img <= (8 << 20):
            b = cand

    in_specs = [pl.BlockSpec((b, nph, hq0, wq0, cin), lambda i: (i, 0, 0, 0, 0))]
    for a in args[1:]:   # weights: whole array VMEM-resident, fetched once per step
        nd = a.ndim
        in_specs.append(pl.BlockSpec(a.shape, lambda i, _nd=nd: (0,) * _nd))

    out = pl.pallas_call(
        functools.partial(_inverted_res_ds_kernel, stride=stride),
        out_shape=jax.ShapeDtypeStruct((n, 2, ho, wo, ch), jnp.float32),
        grid=(n // b,),
        in_specs=in_specs,
        out_specs=pl.BlockSpec((b, 2, ho, wo, ch), lambda i: (i, 0, 0, 0, 0)),
        scratch_shapes=[
            pltpu.VMEM((nph, b, hq, wq, cin), jnp.float32),        # padded input phases
            pltpu.VMEM((nph, b, hq, wq, cm), jnp.float32),         # padded pw2 phases
            pltpu.VMEM((2, b, ho + 2, wo + 2, ch), jnp.float32),   # padded branch outputs
        ],
        compiler_params=pltpu.CompilerParams(
            dimension_semantics=("parallel",),
            vmem_limit_bytes=32 * 1024 * 1024),
    )(*args)

    # (N, 2, Ho, Wo, ch) -> NCHW with channels [branch1 | branch2] (= torch.concat order)
    out = jnp.transpose(out, (0, 1, 4, 2, 3)).reshape(n, cout, ho, wo)
    return out


# ------------------------------ parameters ------------------------------------

def make_divisible(v, divisor, min_value=None):
    if min_value is None:
        min_value = divisor
    new_v = max(min_value, int(v + divisor / 2) // divisor * divisor)
    if new_v < 0.9 * v:
        new_v += divisor
    return new_v


def init_params(key, in_ch, mid_ch, out_ch):
    keys = iter(jax.random.split(key, 64))

    def bn(c):
        gamma = jax.random.uniform(next(keys), (c,), jnp.float32, 0.6, 1.4)
        beta = jax.random.normal(next(keys), (c,), jnp.float32) * 0.05
        mean = jax.random.normal(next(keys), (c,), jnp.float32) * 0.05
        var = jax.random.uniform(next(keys), (c,), jnp.float32, 0.6, 1.4)
        g = gamma / jnp.sqrt(var + EPS)
        return g, beta - mean * g

    def conv_bn(cin, cout):         # 1x1 conv + BN folded: x @ W + shift
        w = jax.random.normal(next(keys), (cout, cin), jnp.float32) * (0.4 / jnp.sqrt(cin))
        b = jax.random.normal(next(keys), (cout,), jnp.float32) * 0.05
        g, t = bn(cout)
        return w.T * g[None, :], b * g + t

    def dw_bn(c):                   # 3x3 depthwise conv + BN folded into the 9 taps
        w = jax.random.normal(next(keys), (3, 3, c), jnp.float32) * 0.2
        b = jax.random.normal(next(keys), (c,), jnp.float32) * 0.05
        g, t = bn(c)
        return w.reshape(9, c) * g[None, :], b * g + t

    def dwpw_bn(c):                 # depthwise 1x1 (per-channel affine) + BN folded
        w = jax.random.normal(next(keys), (c,), jnp.float32) * 0.5
        b = jax.random.normal(next(keys), (c,), jnp.float32) * 0.05
        g, t = bn(c)
        return w * g, b * g + t

    se_in = mid_ch // 2
    se_red = make_divisible(se_in * 0.25, 4)
    se_w1 = jax.random.normal(next(keys), (se_in, se_red), jnp.float32) * (0.4 / jnp.sqrt(se_in))
    se_b1 = jax.random.normal(next(keys), (se_red,), jnp.float32) * 0.05
    se_w2 = jax.random.normal(next(keys), (se_red, se_in), jnp.float32) * (0.4 / jnp.sqrt(se_red))
    se_b2 = jax.random.normal(next(keys), (se_in,), jnp.float32) * 0.05

    # NOTE: conv_pw1 exists in the PyTorch __init__ but is never used in forward(); skipped.
    return {
        "dw1": dw_bn(in_ch),
        "linear1": conv_bn(in_ch, out_ch // 2),
        "pw2": conv_bn(in_ch, mid_ch // 2),
        "dw2": dw_bn(mid_ch // 2),
        "se": (se_w1, se_b1, se_w2, se_b2),
        "linear2": conv_bn(mid_ch // 2, out_ch // 2),
        "dw_mv1": dw_bn(out_ch),
        "pw_mv1": dwpw_bn(out_ch),
    }


# --------------------------- pure-JAX reference --------------------------------

_HI = lax.Precision.HIGHEST


def _ref_dw(x, w9c, shift, stride):
    c = x.shape[-1]
    wconv = w9c.reshape(3, 3, 1, c)
    y = lax.conv_general_dilated(
        x, wconv, (stride, stride), ((1, 1), (1, 1)),
        dimension_numbers=("NHWC", "HWIO", "NHWC"), feature_group_count=c,
        precision=_HI)
    return y + shift


def _ref_pw(x, wf, shift):
    return jnp.einsum("nhwc,cd->nhwd", x, wf, precision=_HI) + shift


def ref_forward(x_nchw, params, *, stride):
    x = jnp.transpose(x_nchw, (0, 2, 3, 1))
    w9, sh = params["dw1"]
    x1 = _ref_dw(x, w9, sh, stride)
    wf, shf = params["linear1"]
    x1 = jnp.maximum(_ref_pw(x1, wf, shf), 0.0)
    wf, shf = params["pw2"]
    x2 = jnp.maximum(_ref_pw(x, wf, shf), 0.0)
    w9, sh = params["dw2"]
    x2 = _ref_dw(x2, w9, sh, stride)
    sw1, sb1, sw2, sb2 = params["se"]
    m = jnp.mean(x2, axis=(1, 2), keepdims=True)
    hgate = jnp.maximum(jnp.einsum("nhwc,cd->nhwd", m, sw1, precision=_HI) + sb1, 0.0)
    gate = jax.nn.sigmoid(jnp.einsum("nhwc,cd->nhwd", hgate, sw2, precision=_HI) + sb2)
    x2 = x2 * gate
    wf, shf = params["linear2"]
    x2 = jnp.maximum(_ref_pw(x2, wf, shf), 0.0)
    out = jnp.concatenate([x1, x2], axis=-1)
    w9, sh = params["dw_mv1"]
    out = _hardswish(_ref_dw(out, w9, sh, 1))
    sc, sh = params["pw_mv1"]
    out = _hardswish(out * sc + sh)
    return jnp.transpose(out, (0, 3, 1, 2))


# ----------------------------------- main --------------------------------------

if __name__ == "__main__":
    N, in_ch, H, W = 2, 16, 16, 16
    mid_ch, out_ch, stride = 32, 32, 2

    key = jax.random.PRNGKey(0)
    kx, kp = jax.random.split(key)
    x = jax.random.normal(kx, (N, in_ch, H, W), jnp.float32)     # NCHW like PyTorch
    params = init_params(kp, in_ch, mid_ch, out_ch)

    fwd = jax.jit(inverted_res_ds, static_argnames=("stride",))
    out = jax.block_until_ready(fwd(x, params, stride=stride))
    ref = jax.block_until_ready(ref_forward(x, params, stride=stride))

    assert out.shape == (N, out_ch, H // stride, W // stride), out.shape
    # Kernel streams bf16 activations / runs bf16 MXU matmuls (f32 accumulation); the
    # reference is full f32 at HIGHEST precision.  Real bugs (wrong tap/offset/channel
    # mapping) produce errors comparable to the output magnitude (>= 10x these bounds).
    abs_err = jnp.abs(out - ref)
    tol = 1e-2 + 2e-2 * jnp.abs(ref)
    max_err = float(jnp.max(abs_err))
    mean_err = float(jnp.mean(abs_err))
    assert bool(jnp.all(abs_err <= tol)), f"mismatch vs reference, max abs err = {max_err}"
    assert mean_err < 3e-3, f"mismatch vs reference, mean abs err = {mean_err}"

    print("KERNEL_OK")
</pallas_src>

<mosaic_0001>
module attributes {stable_mosaic.version = 11 : i64} {
  func.func @_inverted_res_ds_kernel(%arg0: i32, %arg1: memref<1x4x8x8x16xbf16, #tpu.memory_space<vmem>>, %arg2: memref<9x16xf32, #tpu.memory_space<vmem>>, %arg3: memref<1x16xf32, #tpu.memory_space<vmem>>, %arg4: memref<16x16xbf16, #tpu.memory_space<vmem>>, %arg5: memref<1x16xf32, #tpu.memory_space<vmem>>, %arg6: memref<16x16xbf16, #tpu.memory_space<vmem>>, %arg7: memref<1x16xf32, #tpu.memory_space<vmem>>, %arg8: memref<9x16xf32, #tpu.memory_space<vmem>>, %arg9: memref<1x16xf32, #tpu.memory_space<vmem>>, %arg10: memref<4x16xf32, #tpu.memory_space<vmem>>, %arg11: memref<4x1xf32, #tpu.memory_space<vmem>>, %arg12: memref<4x16xf32, #tpu.memory_space<vmem>>, %arg13: memref<1x16xf32, #tpu.memory_space<vmem>>, %arg14: memref<16x16xbf16, #tpu.memory_space<vmem>>, %arg15: memref<1x16xf32, #tpu.memory_space<vmem>>, %arg16: memref<9x16xf32, #tpu.memory_space<vmem>>, %arg17: memref<1x16xf32, #tpu.memory_space<vmem>>, %arg18: memref<9x16xf32, #tpu.memory_space<vmem>>, %arg19: memref<1x16xf32, #tpu.memory_space<vmem>>, %arg20: memref<1x16xf32, #tpu.memory_space<vmem>>, %arg21: memref<1x16xf32, #tpu.memory_space<vmem>>, %arg22: memref<1x16xf32, #tpu.memory_space<vmem>>, %arg23: memref<1x16xf32, #tpu.memory_space<vmem>>, %arg24: memref<1x2x8x8x16xf32, #tpu.memory_space<vmem>>, %arg25: memref<4x1x9x9x16xf32, #tpu.memory_space<vmem>>, %arg26: memref<4x1x9x9x16xf32, #tpu.memory_space<vmem>>, %arg27: memref<2x1x10x10x16xf32, #tpu.memory_space<vmem>>) attributes {dimension_semantics = [#tpu.dimension_semantics<parallel>], iteration_bounds = array<i64: 2>, scalar_prefetch = 0 : i64, scratch_operands = 3 : i64, tpu.core_type = #tpu.core_type<tc>, window_params = [{transform_indices = @transform_0, window_bounds = array<i64: 1, 4, 8, 8, 16>}, {pipeline_mode = #tpu.pipeline_mode<synchronous>, transform_indices = @transform_1, window_bounds = array<i64: 9, 16>}, {pipeline_mode = #tpu.pipeline_mode<synchronous>, transform_indices = @transform_2, window_bounds = array<i64: 1, 16>}, {pipeline_mode = #tpu.pipeline_mode<synchronous>, transform_indices = @transform_3, window_bounds = array<i64: 16, 16>}, {pipeline_mode = #tpu.pipeline_mode<synchronous>, transform_indices = @transform_4, window_bounds = array<i64: 1, 16>}, {pipeline_mode = #tpu.pipeline_mode<synchronous>, transform_indices = @transform_5, window_bounds = array<i64: 16, 16>}, {pipeline_mode = #tpu.pipeline_mode<synchronous>, transform_indices = @transform_6, window_bounds = array<i64: 1, 16>}, {pipeline_mode = #tpu.pipeline_mode<synchronous>, transform_indices = @transform_7, window_bounds = array<i64: 9, 16>}, {pipeline_mode = #tpu.pipeline_mode<synchronous>, transform_indices = @transform_8, window_bounds = array<i64: 1, 16>}, {pipeline_mode = #tpu.pipeline_mode<synchronous>, transform_indices = @transform_9, window_bounds = array<i64: 4, 16>}, {pipeline_mode = #tpu.pipeline_mode<synchronous>, transform_indices = @transform_10, window_bounds = array<i64: 4, 1>}, {pipeline_mode = #tpu.pipeline_mode<synchronous>, transform_indices = @transform_11, window_bounds = array<i64: 4, 16>}, {pipeline_mode = #tpu.pipeline_mode<synchronous>, transform_indices = @transform_12, window_bounds = array<i64: 1, 16>}, {pipeline_mode = #tpu.pipeline_mode<synchronous>, transform_indices = @transform_13, window_bounds = array<i64: 16, 16>}, {pipeline_mode = #tpu.pipeline_mode<synchronous>, transform_indices = @transform_14, window_bounds = array<i64: 1, 16>}, {pipeline_mode = #tpu.pipeline_mode<synchronous>, transform_indices = @transform_15, window_bounds = array<i64: 9, 16>}, {pipeline_mode = #tpu.pipeline_mode<synchronous>, transform_indices = @transform_16, window_bounds = array<i64: 1, 16>}, {pipeline_mode = #tpu.pipeline_mode<synchronous>, transform_indices = @transform_17, window_bounds = array<i64: 9, 16>}, {pipeline_mode = #tpu.pipeline_mode<synchronous>, transform_indices = @transform_18, window_bounds = array<i64: 1, 16>}, {pipeline_mode = #tpu.pipeline_mode<synchronous>, transform_indices = @transform_19, window_bounds = array<i64: 1, 16>}, {pipeline_mode = #tpu.pipeline_mode<synchronous>, transform_indices = @transform_20, window_bounds = array<i64: 1, 16>}, {pipeline_mode = #tpu.pipeline_mode<synchronous>, transform_indices = @transform_21, window_bounds = array<i64: 1, 16>}, {pipeline_mode = #tpu.pipeline_mode<synchronous>, transform_indices = @transform_22, window_bounds = array<i64: 1, 16>}, {transform_indices = @transform_23, window_bounds = array<i64: 1, 2, 8, 8, 16>}]} {
    %c0 = arith.constant 0 : index
    %c0_0 = arith.constant 0 : index
    %c0_1 = arith.constant 0 : index
    %c0_2 = arith.constant 0 : index
    %c0_3 = arith.constant 0 : index
    %0 = vector.load %arg1[%c0, %c0_0, %c0_1, %c0_2, %c0_3] : memref<1x4x8x8x16xbf16, #tpu.memory_space<vmem>>, vector<1x4x8x8x16xbf16>
    %cst = arith.constant 0.000000e+00 : f32
    %1 = vector.broadcast %cst : f32 to vector<4x1x1x9x16xf32>
    %cst_4 = arith.constant 0.000000e+00 : f32
    %2 = vector.broadcast %cst_4 : f32 to vector<4x1x9x1x16xf32>
    %c0_5 = arith.constant 0 : index
    %c0_6 = arith.constant 0 : index
    %c0_7 = arith.constant 0 : index
    %c0_8 = arith.constant 0 : index
    %c0_9 = arith.constant 0 : index
    %3 = vector.load %arg25[%c0_5, %c0_6, %c0_7, %c0_8, %c0_9] : memref<4x1x9x9x16xf32, #tpu.memory_space<vmem>>, vector<4x1x1x9x16xf32>
    tpu.vector_store %arg25[%c0_5, %c0_6, %c0_7, %c0_8, %c0_9], %1 {strides = array<i32>} : memref<4x1x9x9x16xf32, #tpu.memory_space<vmem>>, vector<4x1x1x9x16xf32>,
    %c0_10 = arith.constant 0 : index
    %c0_11 = arith.constant 0 : index
    %c8 = arith.constant 8 : index
    %c0_12 = arith.constant 0 : index
    %c0_13 = arith.constant 0 : index
    %4 = vector.load %arg25[%c0_10, %c0_11, %c8, %c0_12, %c0_13] : memref<4x1x9x9x16xf32, #tpu.memory_space<vmem>>, vector<4x1x1x9x16xf32>
    tpu.vector_store %arg25[%c0_10, %c0_11, %c8, %c0_12, %c0_13], %1 {strides = array<i32>} : memref<4x1x9x9x16xf32, #tpu.memory_space<vmem>>, vector<4x1x1x9x16xf32>,
    %c0_14 = arith.constant 0 : index
    %c0_15 = arith.constant 0 : index
    %c0_16 = arith.constant 0 : index
    %c0_17 = arith.constant 0 : index
    %c0_18 = arith.constant 0 : index
    %5 = vector.load %arg25[%c0_14, %c0_15, %c0_16, %c0_17, %c0_18] : memref<4x1x9x9x16xf32, #tpu.memory_space<vmem>>, vector<4x1x9x1x16xf32>
    tpu.vector_store %arg25[%c0_14, %c0_15, %c0_16, %c0_17, %c0_18], %2 {strides = array<i32>} : memref<4x1x9x9x16xf32, #tpu.memory_space<vmem>>, vector<4x1x9x1x16xf32>,
    %c0_19 = arith.constant 0 : index
    %c0_20 = arith.constant 0 : index
    %c0_21 = arith.constant 0 : index
    %c8_22 = arith.constant 8 : index
    %c0_23 = arith.constant 0 : index
    %6 = vector.load %arg25[%c0_19, %c0_20, %c0_21, %c8_22, %c0_23] : memref<4x1x9x9x16xf32, #tpu.memory_space<vmem>>, vector<4x1x9x1x16xf32>
    tpu.vector_store %arg25[%c0_19, %c0_20, %c0_21, %c8_22, %c0_23], %2 {strides = array<i32>} : memref<4x1x9x9x16xf32, #tpu.memory_space<vmem>>, vector<4x1x9x1x16xf32>,
    %7 = vector.extract_strided_slice %0 {offsets = [0, 0, 0, 0, 0], sizes = [1, 1, 8, 8, 16], strides = [1, 1, 1, 1, 1]} : vector<1x4x8x8x16xbf16> to vector<1x1x8x8x16xbf16>
    %8 = vector.shape_cast %7 : vector<1x1x8x8x16xbf16> to vector<1x8x8x16xbf16>
    %9 = arith.extf %8 : vector<1x8x8x16xbf16> to vector<1x8x8x16xf32>
    %c0_24 = arith.constant 0 : index
    %c0_25 = arith.constant 0 : index
    %c1 = arith.constant 1 : index
    %c1_26 = arith.constant 1 : index
    %c0_27 = arith.constant 0 : index
    %10 = vector.load %arg25[%c0_24, %c0_25, %c1, %c1_26, %c0_27] : memref<4x1x9x9x16xf32, #tpu.memory_space<vmem>>, vector<1x1x8x8x16xf32>
    %11 = vector.shape_cast %10 : vector<1x1x8x8x16xf32> to vector<1x8x8x16xf32>
    %12 = vector.shape_cast %9 : vector<1x8x8x16xf32> to vector<1x1x8x8x16xf32>
    tpu.vector_store %arg25[%c0_24, %c0_25, %c1, %c1_26, %c0_27], %12 {strides = array<i32>} : memref<4x1x9x9x16xf32, #tpu.memory_space<vmem>>, vector<1x1x8x8x16xf32>,
    %13 = vector.extract_strided_slice %0 {offsets = [0, 1, 0, 0, 0], sizes = [1, 1, 8, 8, 16], strides = [1, 1, 1, 1, 1]} : vector<1x4x8x8x16xbf16> to vector<1x1x8x8x16xbf16>
    %14 = vector.shape_cast %13 : vector<1x1x8x8x16xbf16> to vector<1x8x8x16xbf16>
    %15 = arith.extf %14 : vector<1x8x8x16xbf16> to vector<1x8x8x16xf32>
    %c1_28 = arith.constant 1 : index
    %c0_29 = arith.constant 0 : index
    %c1_30 = arith.constant 1 : index
    %c0_31 = arith.constant 0 : index
    %c0_32 = arith.constant 0 : index
    %16 = vector.load %arg25[%c1_28, %c0_29, %c1_30, %c0_31, %c0_32] : memref<4x1x9x9x16xf32, #tpu.memory_space<vmem>>, vector<1x1x8x8x16xf32>
    %17 = vector.shape_cast %16 : vector<1x1x8x8x16xf32> to vector<1x8x8x16xf32>
    %18 = vector.shape_cast %15 : vector<1x8x8x16xf32> to vector<1x1x8x8x16xf32>
    tpu.vector_store %arg25[%c1_28, %c0_29, %c1_30, %c0_31, %c0_32], %18 {strides = array<i32>} : memref<4x1x9x9x16xf32, #tpu.memory_space<vmem>>, vector<1x1x8x8x16xf32>,
    %19 = vector.extract_strided_slice %0 {offsets = [0, 2, 0, 0, 0], sizes = [1, 1, 8, 8, 16], strides = [1, 1, 1, 1, 1]} : vector<1x4x8x8x16xbf16> to vector<1x1x8x8x16xbf16>
    %20 = vector.shape_cast %19 : vector<1x1x8x8x16xbf16> to vector<1x8x8x16xbf16>
    %21 = arith.extf %20 : vector<1x8x8x16xbf16> to vector<1x8x8x16xf32>
    %c2 = arith.constant 2 : index
    %c0_33 = arith.constant 0 : index
    %c0_34 = arith.constant 0 : index
    %c1_35 = arith.constant 1 : index
    %c0_36 = arith.constant 0 : index
    %22 = vector.load %arg25[%c2, %c0_33, %c0_34, %c1_35, %c0_36] : memref<4x1x9x9x16xf32, #tpu.memory_space<vmem>>, vector<1x1x8x8x16xf32>
    %23 = vector.shape_cast %22 : vector<1x1x8x8x16xf32> to vector<1x8x8x16xf32>
    %24 = vector.shape_cast %21 : vector<1x8x8x16xf32> to vector<1x1x8x8x16xf32>
    tpu.vector_store %arg25[%c2, %c0_33, %c0_34, %c1_35, %c0_36], %24 {strides = array<i32>} : memref<4x1x9x9x16xf32, #tpu.memory_space<vmem>>, vector<1x1x8x8x16xf32>,
    %25 = vector.extract_strided_slice %0 {offsets = [0, 3, 0, 0, 0], sizes = [1, 1, 8, 8, 16], strides = [1, 1, 1, 1, 1]} : vector<1x4x8x8x16xbf16> to vector<1x1x8x8x16xbf16>
    %26 = vector.shape_cast %25 : vector<1x1x8x8x16xbf16> to vector<1x8x8x16xbf16>
    %27 = arith.extf %26 : vector<1x8x8x16xbf16> to vector<1x8x8x16xf32>
    %c3 = arith.constant 3 : index
    %c0_37 = arith.constant 0 : index
    %c0_38 = arith.constant 0 : index
    %c0_39 = arith.constant 0 : index
    %c0_40 = arith.constant 0 : index
    %28 = vector.load %arg25[%c3, %c0_37, %c0_38, %c0_39, %c0_40] : memref<4x1x9x9x16xf32, #tpu.memory_space<vmem>>, vector<1x1x8x8x16xf32>
    %29 = vector.shape_cast %28 : vector<1x1x8x8x16xf32> to vector<1x8x8x16xf32>
    %30 = vector.shape_cast %27 : vector<1x8x8x16xf32> to vector<1x1x8x8x16xf32>
    tpu.vector_store %arg25[%c3, %c0_37, %c0_38, %c0_39, %c0_40], %30 {strides = array<i32>} : memref<4x1x9x9x16xf32, #tpu.memory_space<vmem>>, vector<1x1x8x8x16xf32>,
    %31 = vector.shape_cast %0 : vector<1x4x8x8x16xbf16> to vector<256x16xbf16>
    %c0_41 = arith.constant 0 : index
    %c0_42 = arith.constant 0 : index
    %32 = vector.load %arg6[%c0_41, %c0_42] : memref<16x16xbf16, #tpu.memory_space<vmem>>, vector<16x16xbf16>
    %cst_43 = arith.constant dense<0.000000e+00> : vector<256x16xf32>
    %33 = tpu.matmul %31, %32, %cst_43 {dimension_numbers = #tpu.dot_dimension_numbers<[1], [0], [0], [1], [0, 0, 1, 1], [], []>} : vector<256x16xbf16>, vector<16x16xbf16>, vector<256x16xf32> -> vector<256x16xf32>
    %c0_44 = arith.constant 0 : index
    %c0_45 = arith.constant 0 : index
    %34 = vector.load %arg7[%c0_44, %c0_45] : memref<1x16xf32, #tpu.memory_space<vmem>>, vector<1x16xf32>
    %35 = vector.broadcast %34 : vector<1x16xf32> to vector<256x16xf32>
    %36 = arith.addf %33, %35 : vector<256x16xf32>
    %cst_46 = arith.constant 0.000000e+00 : f32
    %37 = vector.broadcast %cst_46 : f32 to vector<256x16xf32>
    %38 = arith.maximumf %36, %37 : vector<256x16xf32>
    %39 = vector.shape_cast %38 : vector<256x16xf32> to vector<1x4x8x8x16xf32>
    %cst_47 = arith.constant 0.000000e+00 : f32
    %40 = vector.broadcast %cst_47 : f32 to vector<4x1x1x9x16xf32>
    %cst_48 = arith.constant 0.000000e+00 : f32
    %41 = vector.broadcast %cst_48 : f32 to vector<4x1x9x1x16xf32>
    %c0_49 = arith.constant 0 : index
    %c0_50 = arith.constant 0 : index
    %c0_51 = arith.constant 0 : index
    %c0_52 = arith.constant 0 : index
    %c0_53 = arith.constant 0 : index
    %42 = vector.load %arg26[%c0_49, %c0_50, %c0_51, %c0_52, %c0_53] : memref<4x1x9x9x16xf32, #tpu.memory_space<vmem>>, vector<4x1x1x9x16xf32>
    tpu.vector_store %arg26[%c0_49, %c0_50, %c0_51, %c0_52, %c0_53], %40 {strides = array<i32>} : memref<4x1x9x9x16xf32, #tpu.memory_space<vmem>>, vector<4x1x1x9x16xf32>,
    %c0_54 = arith.constant 0 : index
    %c0_55 = arith.constant 0 : index
    %c8_56 = arith.constant 8 : index
    %c0_57 = arith.constant 0 : index
    %c0_58 = arith.constant 0 : index
    %43 = vector.load %arg26[%c0_54, %c0_55, %c8_56, %c0_57, %c0_58] : memref<4x1x9x9x16xf32, #tpu.memory_space<vmem>>, vector<4x1x1x9x16xf32>
    tpu.vector_store %arg26[%c0_54, %c0_55, %c8_56, %c0_57, %c0_58], %40 {strides = array<i32>} : memref<4x1x9x9x16xf32, #tpu.memory_space<vmem>>, vector<4x1x1x9x16xf32>,
    %c0_59 = arith.constant 0 : index
    %c0_60 = arith.constant 0 : index
    %c0_61 = arith.constant 0 : index
    %c0_62 = arith.constant 0 : index
    %c0_63 = arith.constant 0 : index
    %44 = vector.load %arg26[%c0_59, %c0_60, %c0_61, %c0_62, %c0_63] : memref<4x1x9x9x16xf32, #tpu.memory_space<vmem>>, vector<4x1x9x1x16xf32>
    tpu.vector_store %arg26[%c0_59, %c0_60, %c0_61, %c0_62, %c0_63], %41 {strides = array<i32>} : memref<4x1x9x9x16xf32, #tpu.memory_space<vmem>>, vector<4x1x9x1x16xf32>,
    %c0_64 = arith.constant 0 : index
    %c0_65 = arith.constant 0 : index
    %c0_66 = arith.constant 0 : index
    %c8_67 = arith.constant 8 : index
    %c0_68 = arith.constant 0 : index
    %45 = vector.load %arg26[%c0_64, %c0_65, %c0_66, %c8_67, %c0_68] : memref<4x1x9x9x16xf32, #tpu.memory_space<vmem>>, vector<4x1x9x1x16xf32>
    tpu.vector_store %arg26[%c0_64, %c0_65, %c0_66, %c8_67, %c0_68], %41 {strides = array<i32>} : memref<4x1x9x9x16xf32, #tpu.memory_space<vmem>>, vector<4x1x9x1x16xf32>,
    %46 = vector.extract_strided_slice %39 {offsets = [0, 0, 0, 0, 0], sizes = [1, 1, 8, 8, 16], strides = [1, 1, 1, 1, 1]} : vector<1x4x8x8x16xf32> to vector<1x1x8x8x16xf32>
    %47 = vector.shape_cast %46 : vector<1x1x8x8x16xf32> to vector<1x8x8x16xf32>
    %c0_69 = arith.constant 0 : index
    %c0_70 = arith.constant 0 : index
    %c1_71 = arith.constant 1 : index
    %c1_72 = arith.constant 1 : index
    %c0_73 = arith.constant 0 : index
    %48 = vector.load %arg26[%c0_69, %c0_70, %c1_71, %c1_72, %c0_73] : memref<4x1x9x9x16xf32, #tpu.memory_space<vmem>>, vector<1x1x8x8x16xf32>
    %49 = vector.shape_cast %48 : vector<1x1x8x8x16xf32> to vector<1x8x8x16xf32>
    %50 = vector.shape_cast %47 : vector<1x8x8x16xf32> to vector<1x1x8x8x16xf32>
    tpu.vector_store %arg26[%c0_69, %c0_70, %c1_71, %c1_72, %c0_73], %50 {strides = array<i32>} : memref<4x1x9x9x16xf32, #tpu.memory_space<vmem>>, vector<1x1x8x8x16xf32>,
    %51 = vector.extract_strided_slice %39 {offsets = [0, 1, 0, 0, 0], sizes = [1, 1, 8, 8, 16], strides = [1, 1, 1, 1, 1]} : vector<1x4x8x8x16xf32> to vector<1x1x8x8x16xf32>
    %52 = vector.shape_cast %51 : vector<1x1x8x8x16xf32> to vector<1x8x8x16xf32>
    %c1_74 = arith.constant 1 : index
    %c0_75 = arith.constant 0 : index
    %c1_76 = arith.constant 1 : index
    %c0_77 = arith.constant 0 : index
    %c0_78 = arith.constant 0 : index
    %53 = vector.load %arg26[%c1_74, %c0_75, %c1_76, %c0_77, %c0_78] : memref<4x1x9x9x16xf32, #tpu.memory_space<vmem>>, vector<1x1x8x8x16xf32>
    %54 = vector.shape_cast %53 : vector<1x1x8x8x16xf32> to vector<1x8x8x16xf32>
    %55 = vector.shape_cast %52 : vector<1x8x8x16xf32> to vector<1x1x8x8x16xf32>
    tpu.vector_store %arg26[%c1_74, %c0_75, %c1_76, %c0_77, %c0_78], %55 {strides = array<i32>} : memref<4x1x9x9x16xf32, #tpu.memory_space<vmem>>, vector<1x1x8x8x16xf32>,
    %56 = vector.extract_strided_slice %39 {offsets = [0, 2, 0, 0, 0], sizes = [1, 1, 8, 8, 16], strides = [1, 1, 1, 1, 1]} : vector<1x4x8x8x16xf32> to vector<1x1x8x8x16xf32>
    %57 = vector.shape_cast %56 : vector<1x1x8x8x16xf32> to vector<1x8x8x16xf32>
    %c2_79 = arith.constant 2 : index
    %c0_80 = arith.constant 0 : index
    %c0_81 = arith.constant 0 : index
    %c1_82 = arith.constant 1 : index
    %c0_83 = arith.constant 0 : index
    %58 = vector.load %arg26[%c2_79, %c0_80, %c0_81, %c1_82, %c0_83] : memref<4x1x9x9x16xf32, #tpu.memory_space<vmem>>, vector<1x1x8x8x16xf32>
    %59 = vector.shape_cast %58 : vector<1x1x8x8x16xf32> to vector<1x8x8x16xf32>
    %60 = vector.shape_cast %57 : vector<1x8x8x16xf32> to vector<1x1x8x8x16xf32>
    tpu.vector_store %arg26[%c2_79, %c0_80, %c0_81, %c1_82, %c0_83], %60 {strides = array<i32>} : memref<4x1x9x9x16xf32, #tpu.memory_space<vmem>>, vector<1x1x8x8x16xf32>,
    %61 = vector.extract_strided_slice %39 {offsets = [0, 3, 0, 0, 0], sizes = [1, 1, 8, 8, 16], strides = [1, 1, 1, 1, 1]} : vector<1x4x8x8x16xf32> to vector<1x1x8x8x16xf32>
    %62 = vector.shape_cast %61 : vector<1x1x8x8x16xf32> to vector<1x8x8x16xf32>
    %c3_84 = arith.constant 3 : index
    %c0_85 = arith.constant 0 : index
    %c0_86 = arith.constant 0 : index
    %c0_87 = arith.constant 0 : index
    %c0_88 = arith.constant 0 : index
    %63 = vector.load %arg26[%c3_84, %c0_85, %c0_86, %c0_87, %c0_88] : memref<4x1x9x9x16xf32, #tpu.memory_space<vmem>>, vector<1x1x8x8x16xf32>
    %64 = vector.shape_cast %63 : vector<1x1x8x8x16xf32> to vector<1x8x8x16xf32>
    %65 = vector.shape_cast %62 : vector<1x8x8x16xf32> to vector<1x1x8x8x16xf32>
    tpu.vector_store %arg26[%c3_84, %c0_85, %c0_86, %c0_87, %c0_88], %65 {strides = array<i32>} : memref<4x1x9x9x16xf32, #tpu.memory_space<vmem>>, vector<1x1x8x8x16xf32>,
    %c0_89 = arith.constant 0 : index
    %c0_90 = arith.constant 0 : index
    %66 = vector.load %arg2[%c0_89, %c0_90] : memref<9x16xf32, #tpu.memory_space<vmem>>, vector<9x16xf32>
    %c0_91 = arith.constant 0 : index
    %c0_92 = arith.constant 0 : index
    %c0_93 = arith.constant 0 : index
    %c0_94 = arith.constant 0 : index
    %c0_95 = arith.constant 0 : index
    %67 = vector.load %arg25[%c0_91, %c0_92, %c0_93, %c0_94, %c0_95] : memref<4x1x9x9x16xf32, #tpu.memory_space<vmem>>, vector<1x1x8x8x16xf32>
    %68 = vector.shape_cast %67 : vector<1x1x8x8x16xf32> to vector<1x8x8x16xf32>
    %69 = vector.extract_strided_slice %66 {offsets = [0, 0], sizes = [1, 16], strides = [1, 1]} : vector<9x16xf32> to vector<1x16xf32>
    %70 = vector.shape_cast %69 : vector<1x16xf32> to vector<1x1x1x16xf32>
    %71 = vector.broadcast %70 : vector<1x1x1x16xf32> to vector<1x8x8x16xf32>
    %72 = arith.mulf %68, %71 : vector<1x8x8x16xf32>
    %c1_96 = arith.constant 1 : index
    %c0_97 = arith.constant 0 : index
    %c0_98 = arith.constant 0 : index
    %c0_99 = arith.constant 0 : index
    %c0_100 = arith.constant 0 : index
    %73 = vector.load %arg25[%c1_96, %c0_97, %c0_98, %c0_99, %c0_100] : memref<4x1x9x9x16xf32, #tpu.memory_space<vmem>>, vector<1x1x8x8x16xf32>
    %74 = vector.shape_cast %73 : vector<1x1x8x8x16xf32> to vector<1x8x8x16xf32>
    %75 = vector.extract_strided_slice %66 {offsets = [1, 0], sizes = [1, 16], strides = [1, 1]} : vector<9x16xf32> to vector<1x16xf32>
    %76 = vector.shape_cast %75 : vector<1x16xf32> to vector<1x1x1x16xf32>
    %77 = vector.broadcast %76 : vector<1x1x1x16xf32> to vector<1x8x8x16xf32>
    %78 = arith.mulf %74, %77 : vector<1x8x8x16xf32>
    %79 = arith.addf %72, %78 : vector<1x8x8x16xf32>
    %c0_101 = arith.constant 0 : index
    %c0_102 = arith.constant 0 : index
    %c0_103 = arith.constant 0 : index
    %c1_104 = arith.constant 1 : index
    %c0_105 = arith.constant 0 : index
    %80 = vector.load %arg25[%c0_101, %c0_102, %c0_103, %c1_104, %c0_105] : memref<4x1x9x9x16xf32, #tpu.memory_space<vmem>>, vector<1x1x8x8x16xf32>
    %81 = vector.shape_cast %80 : vector<1x1x8x8x16xf32> to vector<1x8x8x16xf32>
    %82 = vector.extract_strided_slice %66 {offsets = [2, 0], sizes = [1, 16], strides = [1, 1]} : vector<9x16xf32> to vector<1x16xf32>
    %83 = vector.shape_cast %82 : vector<1x16xf32> to vector<1x1x1x16xf32>
    %84 = vector.broadcast %83 : vector<1x1x1x16xf32> to vector<1x8x8x16xf32>
    %85 = arith.mulf %81, %84 : vector<1x8x8x16xf32>
    %86 = arith.addf %79, %85 : vector<1x8x8x16xf32>
    %c2_106 = arith.constant 2 : index
    %c0_107 = arith.constant 0 : index
    %c0_108 = arith.constant 0 : index
    %c0_109 = arith.constant 0 : index
    %c0_110 = arith.constant 0 : index
    %87 = vector.load %arg25[%c2_106, %c0_107, %c0_108, %c0_109, %c0_110] : memref<4x1x9x9x16xf32, #tpu.memory_space<vmem>>, vector<1x1x8x8x16xf32>
    %88 = vector.shape_cast %87 : vector<1x1x8x8x16xf32> to vector<1x8x8x16xf32>
    %89 = vector.extract_strided_slice %66 {offsets = [3, 0], sizes = [1, 16], strides = [1, 1]} : vector<9x16xf32> to vector<1x16xf32>
    %90 = vector.shape_cast %89 : vector<1x16xf32> to vector<1x1x1x16xf32>
    %91 = vector.broadcast %90 : vector<1x1x1x16xf32> to vector<1x8x8x16xf32>
    %92 = arith.mulf %88, %91 : vector<1x8x8x16xf32>
    %93 = arith.addf %86, %92 : vector<1x8x8x16xf32>
    %c3_111 = arith.constant 3 : index
    %c0_112 = arith.constant 0 : index
    %c0_113 = arith.constant 0 : index
    %c0_114 = arith.constant 0 : index
    %c0_115 = arith.constant 0 : index
    %94 = vector.load %arg25[%c3_111, %c0_112, %c0_113, %c0_114, %c0_115] : memref<4x1x9x9x16xf32, #tpu.memory_space<vmem>>, vector<1x1x8x8x16xf32>
    %95 = vector.shape_cast %94 : vector<1x1x8x8x16xf32> to vector<1x8x8x16xf32>
    %96 = vector.extract_strided_slice %66 {offsets = [4, 0], sizes = [1, 16], strides = [1, 1]} : vector<9x16xf32> to vector<1x16xf32>
    %97 = vector.shape_cast %96 : vector<1x16xf32> to vector<1x1x1x16xf32>
    %98 = vector.broadcast %97 : vector<1x1x1x16xf32> to vector<1x8x8x16xf32>
    %99 = arith.mulf %95, %98 : vector<1x8x8x16xf32>
    %100 = arith.addf %93, %99 : vector<1x8x8x16xf32>
    %c2_116 = arith.constant 2 : index
    %c0_117 = arith.constant 0 : index
    %c0_118 = arith.constant 0 : index
    %c1_119 = arith.constant 1 : index
    %c0_120 = arith.constant 0 : index
    %101 = vector.load %arg25[%c2_116, %c0_117, %c0_118, %c1_119, %c0_120] : memref<4x1x9x9x16xf32, #tpu.memory_space<vmem>>, vector<1x1x8x8x16xf32>
    %102 = vector.shape_cast %101 : vector<1x1x8x8x16xf32> to vector<1x8x8x16xf32>
    %103 = vector.extract_strided_slice %66 {offsets = [5, 0], sizes = [1, 16], strides = [1, 1]} : vector<9x16xf32> to vector<1x16xf32>
    %104 = vector.shape_cast %103 : vector<1x16xf32> to vector<1x1x1x16xf32>
    %105 = vector.broadcast %104 : vector<1x1x1x16xf32> to vector<1x8x8x16xf32>
    %106 = arith.mulf %102, %105 : vector<1x8x8x16xf32>
    %107 = arith.addf %100, %106 : vector<1x8x8x16xf32>
    %c0_121 = arith.constant 0 : index
    %c0_122 = arith.constant 0 : index
    %c1_123 = arith.constant 1 : index
    %c0_124 = arith.constant 0 : index
    %c0_125 = arith.constant 0 : index
    %108 = vector.load %arg25[%c0_121, %c0_122, %c1_123, %c0_124, %c0_125] : memref<4x1x9x9x16xf32, #tpu.memory_space<vmem>>, vector<1x1x8x8x16xf32>
    %109 = vector.shape_cast %108 : vector<1x1x8x8x16xf32> to vector<1x8x8x16xf32>
    %110 = vector.extract_strided_slice %66 {offsets = [6, 0], sizes = [1, 16], strides = [1, 1]} : vector<9x16xf32> to vector<1x16xf32>
    %111 = vector.shape_cast %110 : vector<1x16xf32> to vector<1x1x1x16xf32>
    %112 = vector.broadcast %111 : vector<1x1x1x16xf32> to vector<1x8x8x16xf32>
    %113 = arith.mulf %109, %112 : vector<1x8x8x16xf32>
    %114 = arith.addf %107, %113 : vector<1x8x8x16xf32>
    %c1_126 = arith.constant 1 : index
    %c0_127 = arith.constant 0 : index
    %c1_128 = arith.constant 1 : index
    %c0_129 = arith.constant 0 : index
    %c0_130 = arith.constant 0 : index
    %115 = vector.load %arg25[%c1_126, %c0_127, %c1_128, %c0_129, %c0_130] : memref<4x1x9x9x16xf32, #tpu.memory_space<vmem>>, vector<1x1x8x8x16xf32>
    %116 = vector.shape_cast %115 : vector<1x1x8x8x16xf32> to vector<1x8x8x16xf32>
    %117 = vector.extract_strided_slice %66 {offsets = [7, 0], sizes = [1, 16], strides = [1, 1]} : vector<9x16xf32> to vector<1x16xf32>
    %118 = vector.shape_cast %117 : vector<1x16xf32> to vector<1x1x1x16xf32>
    %119 = vector.broadcast %118 : vector<1x1x1x16xf32> to vector<1x8x8x16xf32>
    %120 = arith.mulf %116, %119 : vector<1x8x8x16xf32>
    %121 = arith.addf %114, %120 : vector<1x8x8x16xf32>
    %c0_131 = arith.constant 0 : index
    %c0_132 = arith.constant 0 : index
    %c1_133 = arith.constant 1 : index
    %c1_134 = arith.constant 1 : index
    %c0_135 = arith.constant 0 : index
    %122 = vector.load %arg25[%c0_131, %c0_132, %c1_133, %c1_134, %c0_135] : memref<4x1x9x9x16xf32, #tpu.memory_space<vmem>>, vector<1x1x8x8x16xf32>
    %123 = vector.shape_cast %122 : vector<1x1x8x8x16xf32> to vector<1x8x8x16xf32>
    %124 = vector.extract_strided_slice %66 {offsets = [8, 0], sizes = [1, 16], strides = [1, 1]} : vector<9x16xf32> to vector<1x16xf32>
    %125 = vector.shape_cast %124 : vector<1x16xf32> to vector<1x1x1x16xf32>
    %126 = vector.broadcast %125 : vector<1x1x1x16xf32> to vector<1x8x8x16xf32>
    %127 = arith.mulf %123, %126 : vector<1x8x8x16xf32>
    %128 = arith.addf %121, %127 : vector<1x8x8x16xf32>
    %c0_136 = arith.constant 0 : index
    %c0_137 = arith.constant 0 : index
    %129 = vector.load %arg3[%c0_136, %c0_137] : memref<1x16xf32, #tpu.memory_space<vmem>>, vector<1x16xf32>
    %130 = vector.shape_cast %129 : vector<1x16xf32> to vector<1x1x1x16xf32>
    %131 = vector.broadcast %130 : vector<1x1x1x16xf32> to vector<1x8x8x16xf32>
    %132 = arith.addf %128, %131 : vector<1x8x8x16xf32>
    %133 = vector.shape_cast %132 : vector<1x8x8x16xf32> to vector<64x16xf32>
    %134 = arith.truncf %133 : vector<64x16xf32> to vector<64x16xbf16>
    %c0_138 = arith.constant 0 : index
    %c0_139 = arith.constant 0 : index
    %135 = vector.load %arg4[%c0_138, %c0_139] : memref<16x16xbf16, #tpu.memory_space<vmem>>, vector<16x16xbf16>
    %cst_140 = arith.constant dense<0.000000e+00> : vector<64x16xf32>
    %136 = tpu.matmul %134, %135, %cst_140 {dimension_numbers = #tpu.dot_dimension_numbers<[1], [0], [0], [1], [0, 0, 1, 1], [], []>} : vector<64x16xbf16>, vector<16x16xbf16>, vector<64x16xf32> -> vector<64x16xf32>
    %c0_141 = arith.constant 0 : index
    %c0_142 = arith.constant 0 : index
    %137 = vector.load %arg5[%c0_141, %c0_142] : memref<1x16xf32, #tpu.memory_space<vmem>>, vector<1x16xf32>
    %138 = vector.broadcast %137 : vector<1x16xf32> to vector<64x16xf32>
    %139 = arith.addf %136, %138 : vector<64x16xf32>
    %cst_143 = arith.constant 0.000000e+00 : f32
    %140 = vector.broadcast %cst_143 : f32 to vector<64x16xf32>
    %141 = arith.maximumf %139, %140 : vector<64x16xf32>
    %c0_144 = arith.constant 0 : index
    %c0_145 = arith.constant 0 : index
    %142 = vector.load %arg8[%c0_144, %c0_145] : memref<9x16xf32, #tpu.memory_space<vmem>>, vector<9x16xf32>
    %c0_146 = arith.constant 0 : index
    %c0_147 = arith.constant 0 : index
    %c0_148 = arith.constant 0 : index
    %c0_149 = arith.constant 0 : index
    %c0_150 = arith.constant 0 : index
    %143 = vector.load %arg26[%c0_146, %c0_147, %c0_148, %c0_149, %c0_150] : memref<4x1x9x9x16xf32, #tpu.memory_space<vmem>>, vector<1x1x8x8x16xf32>
    %144 = vector.shape_cast %143 : vector<1x1x8x8x16xf32> to vector<1x8x8x16xf32>
    %145 = vector.extract_strided_slice %142 {offsets = [0, 0], sizes = [1, 16], strides = [1, 1]} : vector<9x16xf32> to vector<1x16xf32>
    %146 = vector.shape_cast %145 : vector<1x16xf32> to vector<1x1x1x16xf32>
    %147 = vector.broadcast %146 : vector<1x1x1x16xf32> to vector<1x8x8x16xf32>
    %148 = arith.mulf %144, %147 : vector<1x8x8x16xf32>
    %c1_151 = arith.constant 1 : index
    %c0_152 = arith.constant 0 : index
    %c0_153 = arith.constant 0 : index
    %c0_154 = arith.constant 0 : index
    %c0_155 = arith.constant 0 : index
    %149 = vector.load %arg26[%c1_151, %c0_152, %c0_153, %c0_154, %c0_155] : memref<4x1x9x9x16xf32, #tpu.memory_space<vmem>>, vector<1x1x8x8x16xf32>
    %150 = vector.shape_cast %149 : vector<1x1x8x8x16xf32> to vector<1x8x8x16xf32>
    %151 = vector.extract_strided_slice %142 {offsets = [1, 0], sizes = [1, 16], strides = [1, 1]} : vector<9x16xf32> to vector<1x16xf32>
    %152 = vector.shape_cast %151 : vector<1x16xf32> to vector<1x1x1x16xf32>
    %153 = vector.broadcast %152 : vector<1x1x1x16xf32> to vector<1x8x8x16xf32>
    %154 = arith.mulf %150, %153 : vector<1x8x8x16xf32>
    %155 = arith.addf %148, %154 : vector<1x8x8x16xf32>
    %c0_156 = arith.constant 0 : index
    %c0_157 = arith.constant 0 : index
    %c0_158 = arith.constant 0 : index
    %c1_159 = arith.constant 1 : index
    %c0_160 = arith.constant 0 : index
    %156 = vector.load %arg26[%c0_156, %c0_157, %c0_158, %c1_159, %c0_160] : memref<4x1x9x9x16xf32, #tpu.memory_space<vmem>>, vector<1x1x8x8x16xf32>
    %157 = vector.shape_cast %156 : vector<1x1x8x8x16xf32> to vector<1x8x8x16xf32>
    %158 = vector.extract_strided_slice %142 {offsets = [2, 0], sizes = [1, 16], strides = [1, 1]} : vector<9x16xf32> to vector<1x16xf32>
    %159 = vector.shape_cast %158 : vector<1x16xf32> to vector<1x1x1x16xf32>
    %160 = vector.broadcast %159 : vector<1x1x1x16xf32> to vector<1x8x8x16xf32>
    %161 = arith.mulf %157, %160 : vector<1x8x8x16xf32>
    %162 = arith.addf %155, %161 : vector<1x8x8x16xf32>
    %c2_161 = arith.constant 2 : index
    %c0_162 = arith.constant 0 : index
    %c0_163 = arith.constant 0 : index
    %c0_164 = arith.constant 0 : index
    %c0_165 = arith.constant 0 : index
    %163 = vector.load %arg26[%c2_161, %c0_162, %c0_163, %c0_164, %c0_165] : memref<4x1x9x9x16xf32, #tpu.memory_space<vmem>>, vector<1x1x8x8x16xf32>
    %164 = vector.shape_cast %163 : vector<1x1x8x8x16xf32> to vector<1x8x8x16xf32>
    %165 = vector.extract_strided_slice %142 {offsets = [3, 0], sizes = [1, 16], strides = [1, 1]} : vector<9x16xf32> to vector<1x16xf32>
    %166 = vector.shape_cast %165 : vector<1x16xf32> to vector<1x1x1x16xf32>
    %167 = vector.broadcast %166 : vector<1x1x1x16xf32> to vector<1x8x8x16xf32>
    %168 = arith.mulf %164, %167 : vector<1x8x8x16xf32>
    %169 = arith.addf %162, %168 : vector<1x8x8x16xf32>
    %c3_166 = arith.constant 3 : index
    %c0_167 = arith.constant 0 : index
    %c0_168 = arith.constant 0 : index
    %c0_169 = arith.constant 0 : index
    %c0_170 = arith.constant 0 : index
    %170 = vector.load %arg26[%c3_166, %c0_167, %c0_168, %c0_169, %c0_170] : memref<4x1x9x9x16xf32, #tpu.memory_space<vmem>>, vector<1x1x8x8x16xf32>
    %171 = vector.shape_cast %170 : vector<1x1x8x8x16xf32> to vector<1x8x8x16xf32>
    %172 = vector.extract_strided_slice %142 {offsets = [4, 0], sizes = [1, 16], strides = [1, 1]} : vector<9x16xf32> to vector<1x16xf32>
    %173 = vector.shape_cast %172 : vector<1x16xf32> to vector<1x1x1x16xf32>
    %174 = vector.broadcast %173 : vector<1x1x1x16xf32> to vector<1x8x8x16xf32>
    %175 = arith.mulf %171, %174 : vector<1x8x8x16xf32>
    %176 = arith.addf %169, %175 : vector<1x8x8x16xf32>
    %c2_171 = arith.constant 2 : index
    %c0_172 = arith.constant 0 : index
    %c0_173 = arith.constant 0 : index
    %c1_174 = arith.constant 1 : index
    %c0_175 = arith.constant 0 : index
    %177 = vector.load %arg26[%c2_171, %c0_172, %c0_173, %c1_174, %c0_175] : memref<4x1x9x9x16xf32, #tpu.memory_space<vmem>>, vector<1x1x8x8x16xf32>
    %178 = vector.shape_cast %177 : vector<1x1x8x8x16xf32> to vector<1x8x8x16xf32>
    %179 = vector.extract_strided_slice %142 {offsets = [5, 0], sizes = [1, 16], strides = [1, 1]} : vector<9x16xf32> to vector<1x16xf32>
    %180 = vector.shape_cast %179 : vector<1x16xf32> to vector<1x1x1x16xf32>
    %181 = vector.broadcast %180 : vector<1x1x1x16xf32> to vector<1x8x8x16xf32>
    %182 = arith.mulf %178, %181 : vector<1x8x8x16xf32>
    %183 = arith.addf %176, %182 : vector<1x8x8x16xf32>
    %c0_176 = arith.constant 0 : index
    %c0_177 = arith.constant 0 : index
    %c1_178 = arith.constant 1 : index
    %c0_179 = arith.constant 0 : index
    %c0_180 = arith.constant 0 : index
    %184 = vector.load %arg26[%c0_176, %c0_177, %c1_178, %c0_179, %c0_180] : memref<4x1x9x9x16xf32, #tpu.memory_space<vmem>>, vector<1x1x8x8x16xf32>
    %185 = vector.shape_cast %184 : vector<1x1x8x8x16xf32> to vector<1x8x8x16xf32>
    %186 = vector.extract_strided_slice %142 {offsets = [6, 0], sizes = [1, 16], strides = [1, 1]} : vector<9x16xf32> to vector<1x16xf32>
    %187 = vector.shape_cast %186 : vector<1x16xf32> to vector<1x1x1x16xf32>
    %188 = vector.broadcast %187 : vector<1x1x1x16xf32> to vector<1x8x8x16xf32>
    %189 = arith.mulf %185, %188 : vector<1x8x8x16xf32>
    %190 = arith.addf %183, %189 : vector<1x8x8x16xf32>
    %c1_181 = arith.constant 1 : index
    %c0_182 = arith.constant 0 : index
    %c1_183 = arith.constant 1 : index
    %c0_184 = arith.constant 0 : index
    %c0_185 = arith.constant 0 : index
    %191 = vector.load %arg26[%c1_181, %c0_182, %c1_183, %c0_184, %c0_185] : memref<4x1x9x9x16xf32, #tpu.memory_space<vmem>>, vector<1x1x8x8x16xf32>
    %192 = vector.shape_cast %191 : vector<1x1x8x8x16xf32> to vector<1x8x8x16xf32>
    %193 = vector.extract_strided_slice %142 {offsets = [7, 0], sizes = [1, 16], strides = [1, 1]} : vector<9x16xf32> to vector<1x16xf32>
    %194 = vector.shape_cast %193 : vector<1x16xf32> to vector<1x1x1x16xf32>
    %195 = vector.broadcast %194 : vector<1x1x1x16xf32> to vector<1x8x8x16xf32>
    %196 = arith.mulf %192, %195 : vector<1x8x8x16xf32>
    %197 = arith.addf %190, %196 : vector<1x8x8x16xf32>
    %c0_186 = arith.constant 0 : index
    %c0_187 = arith.constant 0 : index
    %c1_188 = arith.constant 1 : index
    %c1_189 = arith.constant 1 : index
    %c0_190 = arith.constant 0 : index
    %198 = vector.load %arg26[%c0_186, %c0_187, %c1_188, %c1_189, %c0_190] : memref<4x1x9x9x16xf32, #tpu.memory_space<vmem>>, vector<1x1x8x8x16xf32>
    %199 = vector.shape_cast %198 : vector<1x1x8x8x16xf32> to vector<1x8x8x16xf32>
    %200 = vector.extract_strided_slice %142 {offsets = [8, 0], sizes = [1, 16], strides = [1, 1]} : vector<9x16xf32> to vector<1x16xf32>
    %201 = vector.shape_cast %200 : vector<1x16xf32> to vector<1x1x1x16xf32>
    %202 = vector.broadcast %201 : vector<1x1x1x16xf32> to vector<1x8x8x16xf32>
    %203 = arith.mulf %199, %202 : vector<1x8x8x16xf32>
    %204 = arith.addf %197, %203 : vector<1x8x8x16xf32>
    %c0_191 = arith.constant 0 : index
    %c0_192 = arith.constant 0 : index
    %205 = vector.load %arg9[%c0_191, %c0_192] : memref<1x16xf32, #tpu.memory_space<vmem>>, vector<1x16xf32>
    %206 = vector.shape_cast %205 : vector<1x16xf32> to vector<1x1x1x16xf32>
    %207 = vector.broadcast %206 : vector<1x1x1x16xf32> to vector<1x8x8x16xf32>
    %208 = arith.addf %204, %207 : vector<1x8x8x16xf32>
    %209 = vector.shape_cast %208 : vector<1x8x8x16xf32> to vector<1x64x16xf32>
    %cst_193 = arith.constant dense<0.000000e+00> : vector<1x16xf32>
    %210 = vector.multi_reduction <add>, %209, %cst_193 [1] : vector<1x64x16xf32> to vector<1x16xf32>
    %cst_194 = arith.constant 6.400000e+01 : f32
    %211 = vector.broadcast %cst_194 : f32 to vector<1x16xf32>
    %212 = arith.divf %210, %211 : vector<1x16xf32>
    %c0_195 = arith.constant 0 : index
    %c0_196 = arith.constant 0 : index
    %213 = vector.load %arg10[%c0_195, %c0_196] : memref<4x16xf32, #tpu.memory_space<vmem>>, vector<4x16xf32>
    %214 = vector.shape_cast %213 : vector<4x16xf32> to vector<1x4x16xf32>
    %215 = vector.shape_cast %212 : vector<1x16xf32> to vector<1x1x16xf32>
    %216 = vector.broadcast %215 : vector<1x1x16xf32> to vector<1x4x16xf32>
    %217 = arith.mulf %214, %216 : vector<1x4x16xf32>
    %cst_197 = arith.constant dense<0.000000e+00> : vector<1x4xf32>
    %218 = vector.multi_reduction <add>, %217, %cst_197 [2] : vector<1x4x16xf32> to vector<1x4xf32>
    %219 = vector.shape_cast %218 : vector<1x4xf32> to vector<1x4x1xf32>
    %c0_198 = arith.constant 0 : index
    %c0_199 = arith.constant 0 : index
    %220 = vector.load %arg11[%c0_198, %c0_199] : memref<4x1xf32, #tpu.memory_space<vmem>>, vector<4x1xf32>
    %221 = vector.shape_cast %220 : vector<4x1xf32> to vector<1x4x1xf32>
    %222 = arith.addf %219, %221 : vector<1x4x1xf32>
    %cst_200 = arith.constant 0.000000e+00 : f32
    %223 = vector.broadcast %cst_200 : f32 to vector<1x4x1xf32>
    %224 = arith.maximumf %222, %223 : vector<1x4x1xf32>
    %c0_201 = arith.constant 0 : index
    %c0_202 = arith.constant 0 : index
    %225 = vector.load %arg12[%c0_201, %c0_202] : memref<4x16xf32, #tpu.memory_space<vmem>>, vector<4x16xf32>
    %226 = vector.shape_cast %225 : vector<4x16xf32> to vector<1x4x16xf32>
    %227 = vector.broadcast %224 : vector<1x4x1xf32> to vector<1x4x16xf32>
    %228 = arith.mulf %226, %227 : vector<1x4x16xf32>
    %cst_203 = arith.constant dense<0.000000e+00> : vector<1x16xf32>
    %229 = vector.multi_reduction <add>, %228, %cst_203 [1] : vector<1x4x16xf32> to vector<1x16xf32>
    %230 = vector.shape_cast %229 : vector<1x16xf32> to vector<1x1x16xf32>
    %c0_204 = arith.constant 0 : index
    %c0_205 = arith.constant 0 : index
    %231 = vector.load %arg13[%c0_204, %c0_205] : memref<1x16xf32, #tpu.memory_space<vmem>>, vector<1x16xf32>
    %232 = vector.shape_cast %231 : vector<1x16xf32> to vector<1x1x16xf32>
    %233 = arith.addf %230, %232 : vector<1x1x16xf32>
    %234 = arith.negf %233 : vector<1x1x16xf32>
    %235 = math.exp %234 : vector<1x1x16xf32>
    %cst_206 = arith.constant 1.000000e+00 : f32
    %236 = vector.broadcast %cst_206 : f32 to vector<1x1x16xf32>
    %237 = arith.addf %236, %235 : vector<1x1x16xf32>
    %238 = arith.divf %236, %237 : vector<1x1x16xf32>
    %239 = vector.broadcast %238 : vector<1x1x16xf32> to vector<1x64x16xf32>
    %240 = arith.mulf %209, %239 : vector<1x64x16xf32>
    %241 = vector.shape_cast %240 : vector<1x64x16xf32> to vector<64x16xf32>
    %242 = arith.truncf %241 : vector<64x16xf32> to vector<64x16xbf16>
    %c0_207 = arith.constant 0 : index
    %c0_208 = arith.constant 0 : index
    %243 = vector.load %arg14[%c0_207, %c0_208] : memref<16x16xbf16, #tpu.memory_space<vmem>>, vector<16x16xbf16>
    %cst_209 = arith.constant dense<0.000000e+00> : vector<64x16xf32>
    %244 = tpu.matmul %242, %243, %cst_209 {dimension_numbers = #tpu.dot_dimension_numbers<[1], [0], [0], [1], [0, 0, 1, 1], [], []>} : vector<64x16xbf16>, vector<16x16xbf16>, vector<64x16xf32> -> vector<64x16xf32>
    %c0_210 = arith.constant 0 : index
    %c0_211 = arith.constant 0 : index
    %245 = vector.load %arg15[%c0_210, %c0_211] : memref<1x16xf32, #tpu.memory_space<vmem>>, vector<1x16xf32>
    %246 = vector.broadcast %245 : vector<1x16xf32> to vector<64x16xf32>
    %247 = arith.addf %244, %246 : vector<64x16xf32>
    %cst_212 = arith.constant 0.000000e+00 : f32
    %248 = vector.broadcast %cst_212 : f32 to vector<64x16xf32>
    %249 = arith.maximumf %247, %248 : vector<64x16xf32>
    %cst_213 = arith.constant 0.000000e+00 : f32
    %250 = vector.broadcast %cst_213 : f32 to vector<2x1x1x10x16xf32>
    %cst_214 = arith.constant 0.000000e+00 : f32
    %251 = vector.broadcast %cst_214 : f32 to vector<2x1x10x1x16xf32>
    %c0_215 = arith.constant 0 : index
    %c0_216 = arith.constant 0 : index
    %c0_217 = arith.constant 0 : index
    %c0_218 = arith.constant 0 : index
    %c0_219 = arith.constant 0 : index
    %252 = vector.load %arg27[%c0_215, %c0_216, %c0_217, %c0_218, %c0_219] : memref<2x1x10x10x16xf32, #tpu.memory_space<vmem>>, vector<2x1x1x10x16xf32>
    tpu.vector_store %arg27[%c0_215, %c0_216, %c0_217, %c0_218, %c0_219], %250 {strides = array<i32>} : memref<2x1x10x10x16xf32, #tpu.memory_space<vmem>>, vector<2x1x1x10x16xf32>,
    %c0_220 = arith.constant 0 : index
    %c0_221 = arith.constant 0 : index
    %c9 = arith.constant 9 : index
    %c0_222 = arith.constant 0 : index
    %c0_223 = arith.constant 0 : index
    %253 = vector.load %arg27[%c0_220, %c0_221, %c9, %c0_222, %c0_223] : memref<2x1x10x10x16xf32, #tpu.memory_space<vmem>>, vector<2x1x1x10x16xf32>
    tpu.vector_store %arg27[%c0_220, %c0_221, %c9, %c0_222, %c0_223], %250 {strides = array<i32>} : memref<2x1x10x10x16xf32, #tpu.memory_space<vmem>>, vector<2x1x1x10x16xf32>,
    %c0_224 = arith.constant 0 : index
    %c0_225 = arith.constant 0 : index
    %c0_226 = arith.constant 0 : index
    %c0_227 = arith.constant 0 : index
    %c0_228 = arith.constant 0 : index
    %254 = vector.load %arg27[%c0_224, %c0_225, %c0_226, %c0_227, %c0_228] : memref<2x1x10x10x16xf32, #tpu.memory_space<vmem>>, vector<2x1x10x1x16xf32>
    tpu.vector_store %arg27[%c0_224, %c0_225, %c0_226, %c0_227, %c0_228], %251 {strides = array<i32>} : memref<2x1x10x10x16xf32, #tpu.memory_space<vmem>>, vector<2x1x10x1x16xf32>,
    %c0_229 = arith.constant 0 : index
    %c0_230 = arith.constant 0 : index
    %c0_231 = arith.constant 0 : index
    %c9_232 = arith.constant 9 : index
    %c0_233 = arith.constant 0 : index
    %255 = vector.load %arg27[%c0_229, %c0_230, %c0_231, %c9_232, %c0_233] : memref<2x1x10x10x16xf32, #tpu.memory_space<vmem>>, vector<2x1x10x1x16xf32>
    tpu.vector_store %arg27[%c0_229, %c0_230, %c0_231, %c9_232, %c0_233], %251 {strides = array<i32>} : memref<2x1x10x10x16xf32, #tpu.memory_space<vmem>>, vector<2x1x10x1x16xf32>,
    %256 = vector.shape_cast %141 : vector<64x16xf32> to vector<1x8x8x16xf32>
    %c0_234 = arith.constant 0 : index
    %c0_235 = arith.constant 0 : index
    %c1_236 = arith.constant 1 : index
    %c1_237 = arith.constant 1 : index
    %c0_238 = arith.constant 0 : index
    %257 = vector.load %arg27[%c0_234, %c0_235, %c1_236, %c1_237, %c0_238] : memref<2x1x10x10x16xf32, #tpu.memory_space<vmem>>, vector<1x1x8x8x16xf32>
    %258 = vector.shape_cast %257 : vector<1x1x8x8x16xf32> to vector<1x8x8x16xf32>
    %259 = vector.shape_cast %256 : vector<1x8x8x16xf32> to vector<1x1x8x8x16xf32>
    tpu.vector_store %arg27[%c0_234, %c0_235, %c1_236, %c1_237, %c0_238], %259 {strides = array<i32>} : memref<2x1x10x10x16xf32, #tpu.memory_space<vmem>>, vector<1x1x8x8x16xf32>,
    %260 = vector.shape_cast %249 : vector<64x16xf32> to vector<1x8x8x16xf32>
    %c1_239 = arith.constant 1 : index
    %c0_240 = arith.constant 0 : index
    %c1_241 = arith.constant 1 : index
    %c1_242 = arith.constant 1 : index
    %c0_243 = arith.constant 0 : index
    %261 = vector.load %arg27[%c1_239, %c0_240, %c1_241, %c1_242, %c0_243] : memref<2x1x10x10x16xf32, #tpu.memory_space<vmem>>, vector<1x1x8x8x16xf32>
    %262 = vector.shape_cast %261 : vector<1x1x8x8x16xf32> to vector<1x8x8x16xf32>
    %263 = vector.shape_cast %260 : vector<1x8x8x16xf32> to vector<1x1x8x8x16xf32>
    tpu.vector_store %arg27[%c1_239, %c0_240, %c1_241, %c1_242, %c0_243], %263 {strides = array<i32>} : memref<2x1x10x10x16xf32, #tpu.memory_space<vmem>>, vector<1x1x8x8x16xf32>,
    %c0_244 = arith.constant 0 : index
    %c0_245 = arith.constant 0 : index
    %264 = vector.load %arg16[%c0_244, %c0_245] : memref<9x16xf32, #tpu.memory_space<vmem>>, vector<9x16xf32>
    %c0_246 = arith.constant 0 : index
    %c0_247 = arith.constant 0 : index
    %c0_248 = arith.constant 0 : index
    %c0_249 = arith.constant 0 : index
    %c0_250 = arith.constant 0 : index
    %265 = vector.load %arg27[%c0_246, %c0_247, %c0_248, %c0_249, %c0_250] : memref<2x1x10x10x16xf32, #tpu.memory_space<vmem>>, vector<1x1x8x8x16xf32>
    %266 = vector.shape_cast %265 : vector<1x1x8x8x16xf32> to vector<1x8x8x16xf32>
    %267 = vector.extract_strided_slice %264 {offsets = [0, 0], sizes = [1, 16], strides = [1, 1]} : vector<9x16xf32> to vector<1x16xf32>
    %268 = vector.shape_cast %267 : vector<1x16xf32> to vector<1x1x1x16xf32>
    %269 = vector.broadcast %268 : vector<1x1x1x16xf32> to vector<1x8x8x16xf32>
    %270 = arith.mulf %266, %269 : vector<1x8x8x16xf32>
    %c0_251 = arith.constant 0 : index
    %c0_252 = arith.constant 0 : index
    %c0_253 = arith.constant 0 : index
    %c1_254 = arith.constant 1 : index
    %c0_255 = arith.constant 0 : index
    %271 = vector.load %arg27[%c0_251, %c0_252, %c0_253, %c1_254, %c0_255] : memref<2x1x10x10x16xf32, #tpu.memory_space<vmem>>, vector<1x1x8x8x16xf32>
    %272 = vector.shape_cast %271 : vector<1x1x8x8x16xf32> to vector<1x8x8x16xf32>
    %273 = vector.extract_strided_slice %264 {offsets = [1, 0], sizes = [1, 16], strides = [1, 1]} : vector<9x16xf32> to vector<1x16xf32>
    %274 = vector.shape_cast %273 : vector<1x16xf32> to vector<1x1x1x16xf32>
    %275 = vector.broadcast %274 : vector<1x1x1x16xf32> to vector<1x8x8x16xf32>
    %276 = arith.mulf %272, %275 : vector<1x8x8x16xf32>
    %277 = arith.addf %270, %276 : vector<1x8x8x16xf32>
    %c0_256 = arith.constant 0 : index
    %c0_257 = arith.constant 0 : index
    %c0_258 = arith.constant 0 : index
    %c2_259 = arith.constant 2 : index
    %c0_260 = arith.constant 0 : index
    %278 = vector.load %arg27[%c0_256, %c0_257, %c0_258, %c2_259, %c0_260] : memref<2x1x10x10x16xf32, #tpu.memory_space<vmem>>, vector<1x1x8x8x16xf32>
    %279 = vector.shape_cast %278 : vector<1x1x8x8x16xf32> to vector<1x8x8x16xf32>
    %280 = vector.extract_strided_slice %264 {offsets = [2, 0], sizes = [1, 16], strides = [1, 1]} : vector<9x16xf32> to vector<1x16xf32>
    %281 = vector.shape_cast %280 : vector<1x16xf32> to vector<1x1x1x16xf32>
    %282 = vector.broadcast %281 : vector<1x1x1x16xf32> to vector<1x8x8x16xf32>
    %283 = arith.mulf %279, %282 : vector<1x8x8x16xf32>
    %284 = arith.addf %277, %283 : vector<1x8x8x16xf32>
    %c0_261 = arith.constant 0 : index
    %c0_262 = arith.constant 0 : index
    %c1_263 = arith.constant 1 : index
    %c0_264 = arith.constant 0 : index
    %c0_265 = arith.constant 0 : index
    %285 = vector.load %arg27[%c0_261, %c0_262, %c1_263, %c0_264, %c0_265] : memref<2x1x10x10x16xf32, #tpu.memory_space<vmem>>, vector<1x1x8x8x16xf32>
    %286 = vector.shape_cast %285 : vector<1x1x8x8x16xf32> to vector<1x8x8x16xf32>
    %287 = vector.extract_strided_slice %264 {offsets = [3, 0], sizes = [1, 16], strides = [1, 1]} : vector<9x16xf32> to vector<1x16xf32>
    %288 = vector.shape_cast %287 : vector<1x16xf32> to vector<1x1x1x16xf32>
    %289 = vector.broadcast %288 : vector<1x1x1x16xf32> to vector<1x8x8x16xf32>
    %290 = arith.mulf %286, %289 : vector<1x8x8x16xf32>
    %291 = arith.addf %284, %290 : vector<1x8x8x16xf32>
    %c0_266 = arith.constant 0 : index
    %c0_267 = arith.constant 0 : index
    %c1_268 = arith.constant 1 : index
    %c1_269 = arith.constant 1 : index
    %c0_270 = arith.constant 0 : index
    %292 = vector.load %arg27[%c0_266, %c0_267, %c1_268, %c1_269, %c0_270] : memref<2x1x10x10x16xf32, #tpu.memory_space<vmem>>, vector<1x1x8x8x16xf32>
    %293 = vector.shape_cast %292 : vector<1x1x8x8x16xf32> to vector<1x8x8x16xf32>
    %294 = vector.extract_strided_slice %264 {offsets = [4, 0], sizes = [1, 16], strides = [1, 1]} : vector<9x16xf32> to vector<1x16xf32>
    %295 = vector.shape_cast %294 : vector<1x16xf32> to vector<1x1x1x16xf32>
    %296 = vector.broadcast %295 : vector<1x1x1x16xf32> to vector<1x8x8x16xf32>
    %297 = arith.mulf %293, %296 : vector<1x8x8x16xf32>
    %298 = arith.addf %291, %297 : vector<1x8x8x16xf32>
    %c0_271 = arith.constant 0 : index
    %c0_272 = arith.constant 0 : index
    %c1_273 = arith.constant 1 : index
    %c2_274 = arith.constant 2 : index
    %c0_275 = arith.constant 0 : index
    %299 = vector.load %arg27[%c0_271, %c0_272, %c1_273, %c2_274, %c0_275] : memref<2x1x10x10x16xf32, #tpu.memory_space<vmem>>, vector<1x1x8x8x16xf32>
    %300 = vector.shape_cast %299 : vector<1x1x8x8x16xf32> to vector<1x8x8x16xf32>
    %301 = vector.extract_strided_slice %264 {offsets = [5, 0], sizes = [1, 16], strides = [1, 1]} : vector<9x16xf32> to vector<1x16xf32>
    %302 = vector.shape_cast %301 : vector<1x16xf32> to vector<1x1x1x16xf32>
    %303 = vector.broadcast %302 : vector<1x1x1x16xf32> to vector<1x8x8x16xf32>
    %304 = arith.mulf %300, %303 : vector<1x8x8x16xf32>
    %305 = arith.addf %298, %304 : vector<1x8x8x16xf32>
    %c0_276 = arith.constant 0 : index
    %c0_277 = arith.constant 0 : index
    %c2_278 = arith.constant 2 : index
    %c0_279 = arith.constant 0 : index
    %c0_280 = arith.constant 0 : index
    %306 = vector.load %arg27[%c0_276, %c0_277, %c2_278, %c0_279, %c0_280] : memref<2x1x10x10x16xf32, #tpu.memory_space<vmem>>, vector<1x1x8x8x16xf32>
    %307 = vector.shape_cast %306 : vector<1x1x8x8x16xf32> to vector<1x8x8x16xf32>
    %308 = vector.extract_strided_slice %264 {offsets = [6, 0], sizes = [1, 16], strides = [1, 1]} : vector<9x16xf32> to vector<1x16xf32>
    %309 = vector.shape_cast %308 : vector<1x16xf32> to vector<1x1x1x16xf32>
    %310 = vector.broadcast %309 : vector<1x1x1x16xf32> to vector<1x8x8x16xf32>
    %311 = arith.mulf %307, %310 : vector<1x8x8x16xf32>
    %312 = arith.addf %305, %311 : vector<1x8x8x16xf32>
    %c0_281 = arith.constant 0 : index
    %c0_282 = arith.constant 0 : index
    %c2_283 = arith.constant 2 : index
    %c1_284 = arith.constant 1 : index
    %c0_285 = arith.constant 0 : index
    %313 = vector.load %arg27[%c0_281, %c0_282, %c2_283, %c1_284, %c0_285] : memref<2x1x10x10x16xf32, #tpu.memory_space<vmem>>, vector<1x1x8x8x16xf32>
    %314 = vector.shape_cast %313 : vector<1x1x8x8x16xf32> to vector<1x8x8x16xf32>
    %315 = vector.extract_strided_slice %264 {offsets = [7, 0], sizes = [1, 16], strides = [1, 1]} : vector<9x16xf32> to vector<1x16xf32>
    %316 = vector.shape_cast %315 : vector<1x16xf32> to vector<1x1x1x16xf32>
    %317 = vector.broadcast %316 : vector<1x1x1x16xf32> to vector<1x8x8x16xf32>
    %318 = arith.mulf %314, %317 : vector<1x8x8x16xf32>
    %319 = arith.addf %312, %318 : vector<1x8x8x16xf32>
    %c0_286 = arith.constant 0 : index
    %c0_287 = arith.constant 0 : index
    %c2_288 = arith.constant 2 : index
    %c2_289 = arith.constant 2 : index
    %c0_290 = arith.constant 0 : index
    %320 = vector.load %arg27[%c0_286, %c0_287, %c2_288, %c2_289, %c0_290] : memref<2x1x10x10x16xf32, #tpu.memory_space<vmem>>, vector<1x1x8x8x16xf32>
    %321 = vector.shape_cast %320 : vector<1x1x8x8x16xf32> to vector<1x8x8x16xf32>
    %322 = vector.extract_strided_slice %264 {offsets = [8, 0], sizes = [1, 16], strides = [1, 1]} : vector<9x16xf32> to vector<1x16xf32>
    %323 = vector.shape_cast %322 : vector<1x16xf32> to vector<1x1x1x16xf32>
    %324 = vector.broadcast %323 : vector<1x1x1x16xf32> to vector<1x8x8x16xf32>
    %325 = arith.mulf %321, %324 : vector<1x8x8x16xf32>
    %326 = arith.addf %319, %325 : vector<1x8x8x16xf32>
    %c0_291 = arith.constant 0 : index
    %c0_292 = arith.constant 0 : index
    %327 = vector.load %arg17[%c0_291, %c0_292] : memref<1x16xf32, #tpu.memory_space<vmem>>, vector<1x16xf32>
    %328 = vector.shape_cast %327 : vector<1x16xf32> to vector<1x1x1x16xf32>
    %329 = vector.broadcast %328 : vector<1x1x1x16xf32> to vector<1x8x8x16xf32>
    %330 = arith.addf %326, %329 : vector<1x8x8x16xf32>
    %cst_293 = arith.constant 3.000000e+00 : f32
    %331 = vector.broadcast %cst_293 : f32 to vector<1x8x8x16xf32>
    %332 = arith.addf %330, %331 : vector<1x8x8x16xf32>
    %cst_294 = arith.constant 0.000000e+00 : f32
    %cst_295 = arith.constant 6.000000e+00 : f32
    %333 = vector.broadcast %cst_294 : f32 to vector<1x8x8x16xf32>
    %334 = arith.maximumf %333, %332 : vector<1x8x8x16xf32>
    %335 = vector.broadcast %cst_295 : f32 to vector<1x8x8x16xf32>
    %336 = arith.minimumf %335, %334 : vector<1x8x8x16xf32>
    %337 = arith.mulf %330, %336 : vector<1x8x8x16xf32>
    %cst_296 = arith.constant 0.166666672 : f32
    %338 = vector.broadcast %cst_296 : f32 to vector<1x8x8x16xf32>
    %339 = arith.mulf %337, %338 : vector<1x8x8x16xf32>
    %c0_297 = arith.constant 0 : index
    %c0_298 = arith.constant 0 : index
    %340 = vector.load %arg20[%c0_297, %c0_298] : memref<1x16xf32, #tpu.memory_space<vmem>>, vector<1x16xf32>
    %341 = vector.shape_cast %340 : vector<1x16xf32> to vector<1x1x1x16xf32>
    %342 = vector.broadcast %341 : vector<1x1x1x16xf32> to vector<1x8x8x16xf32>
    %343 = arith.mulf %339, %342 : vector<1x8x8x16xf32>
    %c0_299 = arith.constant 0 : index
    %c0_300 = arith.constant 0 : index
    %344 = vector.load %arg21[%c0_299, %c0_300] : memref<1x16xf32, #tpu.memory_space<vmem>>, vector<1x16xf32>
    %345 = vector.shape_cast %344 : vector<1x16xf32> to vector<1x1x1x16xf32>
    %346 = vector.broadcast %345 : vector<1x1x1x16xf32> to vector<1x8x8x16xf32>
    %347 = arith.addf %343, %346 : vector<1x8x8x16xf32>
    %cst_301 = arith.constant 3.000000e+00 : f32
    %348 = vector.broadcast %cst_301 : f32 to vector<1x8x8x16xf32>
    %349 = arith.addf %347, %348 : vector<1x8x8x16xf32>
    %cst_302 = arith.constant 0.000000e+00 : f32
    %cst_303 = arith.constant 6.000000e+00 : f32
    %350 = vector.broadcast %cst_302 : f32 to vector<1x8x8x16xf32>
    %351 = arith.maximumf %350, %349 : vector<1x8x8x16xf32>
    %352 = vector.broadcast %cst_303 : f32 to vector<1x8x8x16xf32>
    %353 = arith.minimumf %352, %351 : vector<1x8x8x16xf32>
    %354 = arith.mulf %347, %353 : vector<1x8x8x16xf32>
    %cst_304 = arith.constant 0.166666672 : f32
    %355 = vector.broadcast %cst_304 : f32 to vector<1x8x8x16xf32>
    %356 = arith.mulf %354, %355 : vector<1x8x8x16xf32>
    %c0_305 = arith.constant 0 : index
    %c0_306 = arith.constant 0 : index
    %357 = vector.load %arg18[%c0_305, %c0_306] : memref<9x16xf32, #tpu.memory_space<vmem>>, vector<9x16xf32>
    %c1_307 = arith.constant 1 : index
    %c0_308 = arith.constant 0 : index
    %c0_309 = arith.constant 0 : index
    %c0_310 = arith.constant 0 : index
    %c0_311 = arith.constant 0 : index
    %358 = vector.load %arg27[%c1_307, %c0_308, %c0_309, %c0_310, %c0_311] : memref<2x1x10x10x16xf32, #tpu.memory_space<vmem>>, vector<1x1x8x8x16xf32>
    %359 = vector.shape_cast %358 : vector<1x1x8x8x16xf32> to vector<1x8x8x16xf32>
    %360 = vector.extract_strided_slice %357 {offsets = [0, 0], sizes = [1, 16], strides = [1, 1]} : vector<9x16xf32> to vector<1x16xf32>
    %361 = vector.shape_cast %360 : vector<1x16xf32> to vector<1x1x1x16xf32>
    %362 = vector.broadcast %361 : vector<1x1x1x16xf32> to vector<1x8x8x16xf32>
    %363 = arith.mulf %359, %362 : vector<1x8x8x16xf32>
    %c1_312 = arith.constant 1 : index
    %c0_313 = arith.constant 0 : index
    %c0_314 = arith.constant 0 : index
    %c1_315 = arith.constant 1 : index
    %c0_316 = arith.constant 0 : index
    %364 = vector.load %arg27[%c1_312, %c0_313, %c0_314, %c1_315, %c0_316] : memref<2x1x10x10x16xf32, #tpu.memory_space<vmem>>, vector<1x1x8x8x16xf32>
    %365 = vector.shape_cast %364 : vector<1x1x8x8x16xf32> to vector<1x8x8x16xf32>
    %366 = vector.extract_strided_slice %357 {offsets = [1, 0], sizes = [1, 16], strides = [1, 1]} : vector<9x16xf32> to vector<1x16xf32>
    %367 = vector.shape_cast %366 : vector<1x16xf32> to vector<1x1x1x16xf32>
    %368 = vector.broadcast %367 : vector<1x1x1x16xf32> to vector<1x8x8x16xf32>
    %369 = arith.mulf %365, %368 : vector<1x8x8x16xf32>
    %370 = arith.addf %363, %369 : vector<1x8x8x16xf32>
    %c1_317 = arith.constant 1 : index
    %c0_318 = arith.constant 0 : index
    %c0_319 = arith.constant 0 : index
    %c2_320 = arith.constant 2 : index
    %c0_321 = arith.constant 0 : index
    %371 = vector.load %arg27[%c1_317, %c0_318, %c0_319, %c2_320, %c0_321] : memref<2x1x10x10x16xf32, #tpu.memory_space<vmem>>, vector<1x1x8x8x16xf32>
    %372 = vector.shape_cast %371 : vector<1x1x8x8x16xf32> to vector<1x8x8x16xf32>
    %373 = vector.extract_strided_slice %357 {offsets = [2, 0], sizes = [1, 16], strides = [1, 1]} : vector<9x16xf32> to vector<1x16xf32>
    %374 = vector.shape_cast %373 : vector<1x16xf32> to vector<1x1x1x16xf32>
    %375 = vector.broadcast %374 : vector<1x1x1x16xf32> to vector<1x8x8x16xf32>
    %376 = arith.mulf %372, %375 : vector<1x8x8x16xf32>
    %377 = arith.addf %370, %376 : vector<1x8x8x16xf32>
    %c1_322 = arith.constant 1 : index
    %c0_323 = arith.constant 0 : index
    %c1_324 = arith.constant 1 : index
    %c0_325 = arith.constant 0 : index
    %c0_326 = arith.constant 0 : index
    %378 = vector.load %arg27[%c1_322, %c0_323, %c1_324, %c0_325, %c0_326] : memref<2x1x10x10x16xf32, #tpu.memory_space<vmem>>, vector<1x1x8x8x16xf32>
    %379 = vector.shape_cast %378 : vector<1x1x8x8x16xf32> to vector<1x8x8x16xf32>
    %380 = vector.extract_strided_slice %357 {offsets = [3, 0], sizes = [1, 16], strides = [1, 1]} : vector<9x16xf32> to vector<1x16xf32>
    %381 = vector.shape_cast %380 : vector<1x16xf32> to vector<1x1x1x16xf32>
    %382 = vector.broadcast %381 : vector<1x1x1x16xf32> to vector<1x8x8x16xf32>
    %383 = arith.mulf %379, %382 : vector<1x8x8x16xf32>
    %384 = arith.addf %377, %383 : vector<1x8x8x16xf32>
    %c1_327 = arith.constant 1 : index
    %c0_328 = arith.constant 0 : index
    %c1_329 = arith.constant 1 : index
    %c1_330 = arith.constant 1 : index
    %c0_331 = arith.constant 0 : index
    %385 = vector.load %arg27[%c1_327, %c0_328, %c1_329, %c1_330, %c0_331] : memref<2x1x10x10x16xf32, #tpu.memory_space<vmem>>, vector<1x1x8x8x16xf32>
    %386 = vector.shape_cast %385 : vector<1x1x8x8x16xf32> to vector<1x8x8x16xf32>
    %387 = vector.extract_strided_slice %357 {offsets = [4, 0], sizes = [1, 16], strides = [1, 1]} : vector<9x16xf32> to vector<1x16xf32>
    %388 = vector.shape_cast %387 : vector<1x16xf32> to vector<1x1x1x16xf32>
    %389 = vector.broadcast %388 : vector<1x1x1x16xf32> to vector<1x8x8x16xf32>
    %390 = arith.mulf %386, %389 : vector<1x8x8x16xf32>
    %391 = arith.addf %384, %390 : vector<1x8x8x16xf32>
    %c1_332 = arith.constant 1 : index
    %c0_333 = arith.constant 0 : index
    %c1_334 = arith.constant 1 : index
    %c2_335 = arith.constant 2 : index
    %c0_336 = arith.constant 0 : index
    %392 = vector.load %arg27[%c1_332, %c0_333, %c1_334, %c2_335, %c0_336] : memref<2x1x10x10x16xf32, #tpu.memory_space<vmem>>, vector<1x1x8x8x16xf32>
    %393 = vector.shape_cast %392 : vector<1x1x8x8x16xf32> to vector<1x8x8x16xf32>
    %394 = vector.extract_strided_slice %357 {offsets = [5, 0], sizes = [1, 16], strides = [1, 1]} : vector<9x16xf32> to vector<1x16xf32>
    %395 = vector.shape_cast %394 : vector<1x16xf32> to vector<1x1x1x16xf32>
    %396 = vector.broadcast %395 : vector<1x1x1x16xf32> to vector<1x8x8x16xf32>
    %397 = arith.mulf %393, %396 : vector<1x8x8x16xf32>
    %398 = arith.addf %391, %397 : vector<1x8x8x16xf32>
    %c1_337 = arith.constant 1 : index
    %c0_338 = arith.constant 0 : index
    %c2_339 = arith.constant 2 : index
    %c0_340 = arith.constant 0 : index
    %c0_341 = arith.constant 0 : index
    %399 = vector.load %arg27[%c1_337, %c0_338, %c2_339, %c0_340, %c0_341] : memref<2x1x10x10x16xf32, #tpu.memory_space<vmem>>, vector<1x1x8x8x16xf32>
    %400 = vector.shape_cast %399 : vector<1x1x8x8x16xf32> to vector<1x8x8x16xf32>
    %401 = vector.extract_strided_slice %357 {offsets = [6, 0], sizes = [1, 16], strides = [1, 1]} : vector<9x16xf32> to vector<1x16xf32>
    %402 = vector.shape_cast %401 : vector<1x16xf32> to vector<1x1x1x16xf32>
    %403 = vector.broadcast %402 : vector<1x1x1x16xf32> to vector<1x8x8x16xf32>
    %404 = arith.mulf %400, %403 : vector<1x8x8x16xf32>
    %405 = arith.addf %398, %404 : vector<1x8x8x16xf32>
    %c1_342 = arith.constant 1 : index
    %c0_343 = arith.constant 0 : index
    %c2_344 = arith.constant 2 : index
    %c1_345 = arith.constant 1 : index
    %c0_346 = arith.constant 0 : index
    %406 = vector.load %arg27[%c1_342, %c0_343, %c2_344, %c1_345, %c0_346] : memref<2x1x10x10x16xf32, #tpu.memory_space<vmem>>, vector<1x1x8x8x16xf32>
    %407 = vector.shape_cast %406 : vector<1x1x8x8x16xf32> to vector<1x8x8x16xf32>
    %408 = vector.extract_strided_slice %357 {offsets = [7, 0], sizes = [1, 16], strides = [1, 1]} : vector<9x16xf32> to vector<1x16xf32>
    %409 = vector.shape_cast %408 : vector<1x16xf32> to vector<1x1x1x16xf32>
    %410 = vector.broadcast %409 : vector<1x1x1x16xf32> to vector<1x8x8x16xf32>
    %411 = arith.mulf %407, %410 : vector<1x8x8x16xf32>
    %412 = arith.addf %405, %411 : vector<1x8x8x16xf32>
    %c1_347 = arith.constant 1 : index
    %c0_348 = arith.constant 0 : index
    %c2_349 = arith.constant 2 : index
    %c2_350 = arith.constant 2 : index
    %c0_351 = arith.constant 0 : index
    %413 = vector.load %arg27[%c1_347, %c0_348, %c2_349, %c2_350, %c0_351] : memref<2x1x10x10x16xf32, #tpu.memory_space<vmem>>, vector<1x1x8x8x16xf32>
    %414 = vector.shape_cast %413 : vector<1x1x8x8x16xf32> to vector<1x8x8x16xf32>
    %415 = vector.extract_strided_slice %357 {offsets = [8, 0], sizes = [1, 16], strides = [1, 1]} : vector<9x16xf32> to vector<1x16xf32>
    %416 = vector.shape_cast %415 : vector<1x16xf32> to vector<1x1x1x16xf32>
    %417 = vector.broadcast %416 : vector<1x1x1x16xf32> to vector<1x8x8x16xf32>
    %418 = arith.mulf %414, %417 : vector<1x8x8x16xf32>
    %419 = arith.addf %412, %418 : vector<1x8x8x16xf32>
    %c0_352 = arith.constant 0 : index
    %c0_353 = arith.constant 0 : index
    %420 = vector.load %arg19[%c0_352, %c0_353] : memref<1x16xf32, #tpu.memory_space<vmem>>, vector<1x16xf32>
    %421 = vector.shape_cast %420 : vector<1x16xf32> to vector<1x1x1x16xf32>
    %422 = vector.broadcast %421 : vector<1x1x1x16xf32> to vector<1x8x8x16xf32>
    %423 = arith.addf %419, %422 : vector<1x8x8x16xf32>
    %cst_354 = arith.constant 3.000000e+00 : f32
    %424 = vector.broadcast %cst_354 : f32 to vector<1x8x8x16xf32>
    %425 = arith.addf %423, %424 : vector<1x8x8x16xf32>
    %cst_355 = arith.constant 0.000000e+00 : f32
    %cst_356 = arith.constant 6.000000e+00 : f32
    %426 = vector.broadcast %cst_355 : f32 to vector<1x8x8x16xf32>
    %427 = arith.maximumf %426, %425 : vector<1x8x8x16xf32>
    %428 = vector.broadcast %cst_356 : f32 to vector<1x8x8x16xf32>
    %429 = arith.minimumf %428, %427 : vector<1x8x8x16xf32>
    %430 = arith.mulf %423, %429 : vector<1x8x8x16xf32>
    %cst_357 = arith.constant 0.166666672 : f32
    %431 = vector.broadcast %cst_357 : f32 to vector<1x8x8x16xf32>
    %432 = arith.mulf %430, %431 : vector<1x8x8x16xf32>
    %c0_358 = arith.constant 0 : index
    %c0_359 = arith.constant 0 : index
    %433 = vector.load %arg22[%c0_358, %c0_359] : memref<1x16xf32, #tpu.memory_space<vmem>>, vector<1x16xf32>
    %434 = vector.shape_cast %433 : vector<1x16xf32> to vector<1x1x1x16xf32>
    %435 = vector.broadcast %434 : vector<1x1x1x16xf32> to vector<1x8x8x16xf32>
    %436 = arith.mulf %432, %435 : vector<1x8x8x16xf32>
    %c0_360 = arith.constant 0 : index
    %c0_361 = arith.constant 0 : index
    %437 = vector.load %arg23[%c0_360, %c0_361] : memref<1x16xf32, #tpu.memory_space<vmem>>, vector<1x16xf32>
    %438 = vector.shape_cast %437 : vector<1x16xf32> to vector<1x1x1x16xf32>
    %439 = vector.broadcast %438 : vector<1x1x1x16xf32> to vector<1x8x8x16xf32>
    %440 = arith.addf %436, %439 : vector<1x8x8x16xf32>
    %cst_362 = arith.constant 3.000000e+00 : f32
    %441 = vector.broadcast %cst_362 : f32 to vector<1x8x8x16xf32>
    %442 = arith.addf %440, %441 : vector<1x8x8x16xf32>
    %cst_363 = arith.constant 0.000000e+00 : f32
    %cst_364 = arith.constant 6.000000e+00 : f32
    %443 = vector.broadcast %cst_363 : f32 to vector<1x8x8x16xf32>
    %444 = arith.maximumf %443, %442 : vector<1x8x8x16xf32>
    %445 = vector.broadcast %cst_364 : f32 to vector<1x8x8x16xf32>
    %446 = arith.minimumf %445, %444 : vector<1x8x8x16xf32>
    %447 = arith.mulf %440, %446 : vector<1x8x8x16xf32>
    %cst_365 = arith.constant 0.166666672 : f32
    %448 = vector.broadcast %cst_365 : f32 to vector<1x8x8x16xf32>
    %449 = arith.mulf %447, %448 : vector<1x8x8x16xf32>
    %450 = vector.shape_cast %356 : vector<1x8x8x16xf32> to vector<1x1x8x8x16xf32>
    %c0_366 = arith.constant 0 : index
    %c0_367 = arith.constant 0 : index
    %c0_368 = arith.constant 0 : index
    %c0_369 = arith.constant 0 : index
    %c0_370 = arith.constant 0 : index
    %451 = vector.load %arg24[%c0_366, %c0_367, %c0_368, %c0_369, %c0_370] : memref<1x2x8x8x16xf32, #tpu.memory_space<vmem>>, vector<1x1x8x8x16xf32>
    tpu.vector_store %arg24[%c0_366, %c0_367, %c0_368, %c0_369, %c0_370], %450 {strides = array<i32>} : memref<1x2x8x8x16xf32, #tpu.memory_space<vmem>>, vector<1x1x8x8x16xf32>,
    %452 = vector.shape_cast %449 : vector<1x8x8x16xf32> to vector<1x1x8x8x16xf32>
    %c0_371 = arith.constant 0 : index
    %c1_372 = arith.constant 1 : index
    %c0_373 = arith.constant 0 : index
    %c0_374 = arith.constant 0 : index
    %c0_375 = arith.constant 0 : index
    %453 = vector.load %arg24[%c0_371, %c1_372, %c0_373, %c0_374, %c0_375] : memref<1x2x8x8x16xf32, #tpu.memory_space<vmem>>, vector<1x1x8x8x16xf32>
    tpu.vector_store %arg24[%c0_371, %c1_372, %c0_373, %c0_374, %c0_375], %452 {strides = array<i32>} : memref<1x2x8x8x16xf32, #tpu.memory_space<vmem>>, vector<1x1x8x8x16xf32>,
    return
  }
  func.func @transform_0(%arg0: i32) -> (i32, i32, i32, i32, i32) {
    %c0_i32 = arith.constant 0 : i32
    %c0_i32_0 = arith.constant 0 : i32
    %c0_i32_1 = arith.constant 0 : i32
    %c0_i32_2 = arith.constant 0 : i32
    %c0_i32_3 = arith.constant 0 : i32
    return %arg0, %c0_i32, %c0_i32_0, %c0_i32_1, %c0_i32_2 : i32, i32, i32, i32, i32
  }
  func.func @transform_1(%arg0: i32) -> (i32, i32) {
    %c0_i32 = arith.constant 0 : i32
    %c0_i32_0 = arith.constant 0 : i32
    %c0_i32_1 = arith.constant 0 : i32
    return %c0_i32, %c0_i32_0 : i32, i32
  }
  func.func @transform_2(%arg0: i32) -> (i32, i32) {
    %c0_i32 = arith.constant 0 : i32
    %c0_i32_0 = arith.constant 0 : i32
    %c0_i32_1 = arith.constant 0 : i32
    return %c0_i32, %c0_i32_0 : i32, i32
  }
  func.func @transform_3(%arg0: i32) -> (i32, i32) {
    %c0_i32 = arith.constant 0 : i32
    %c0_i32_0 = arith.constant 0 : i32
    %c0_i32_1 = arith.constant 0 : i32
    return %c0_i32, %c0_i32_0 : i32, i32
  }
  func.func @transform_4(%arg0: i32) -> (i32, i32) {
    %c0_i32 = arith.constant 0 : i32
    %c0_i32_0 = arith.constant 0 : i32
    %c0_i32_1 = arith.constant 0 : i32
    return %c0_i32, %c0_i32_0 : i32, i32
  }
  func.func @transform_5(%arg0: i32) -> (i32, i32) {
    %c0_i32 = arith.constant 0 : i32
    %c0_i32_0 = arith.constant 0 : i32
    %c0_i32_1 = arith.constant 0 : i32
    return %c0_i32, %c0_i32_0 : i32, i32
  }
  func.func @transform_6(%arg0: i32) -> (i32, i32) {
    %c0_i32 = arith.constant 0 : i32
    %c0_i32_0 = arith.constant 0 : i32
    %c0_i32_1 = arith.constant 0 : i32
    return %c0_i32, %c0_i32_0 : i32, i32
  }
  func.func @transform_7(%arg0: i32) -> (i32, i32) {
    %c0_i32 = arith.constant 0 : i32
    %c0_i32_0 = arith.constant 0 : i32
    %c0_i32_1 = arith.constant 0 : i32
    return %c0_i32, %c0_i32_0 : i32, i32
  }
  func.func @transform_8(%arg0: i32) -> (i32, i32) {
    %c0_i32 = arith.constant 0 : i32
    %c0_i32_0 = arith.constant 0 : i32
    %c0_i32_1 = arith.constant 0 : i32
    return %c0_i32, %c0_i32_0 : i32, i32
  }
  func.func @transform_9(%arg0: i32) -> (i32, i32) {
    %c0_i32 = arith.constant 0 : i32
    %c0_i32_0 = arith.constant 0 : i32
    %c0_i32_1 = arith.constant 0 : i32
    return %c0_i32, %c0_i32_0 : i32, i32
  }
  func.func @transform_10(%arg0: i32) -> (i32, i32) {
    %c0_i32 = arith.constant 0 : i32
    %c0_i32_0 = arith.constant 0 : i32
    %c0_i32_1 = arith.constant 0 : i32
    return %c0_i32, %c0_i32_0 : i32, i32
  }
  func.func @transform_11(%arg0: i32) -> (i32, i32) {
    %c0_i32 = arith.constant 0 : i32
    %c0_i32_0 = arith.constant 0 : i32
    %c0_i32_1 = arith.constant 0 : i32
    return %c0_i32, %c0_i32_0 : i32, i32
  }
  func.func @transform_12(%arg0: i32) -> (i32, i32) {
    %c0_i32 = arith.constant 0 : i32
    %c0_i32_0 = arith.constant 0 : i32
    %c0_i32_1 = arith.constant 0 : i32
    return %c0_i32, %c0_i32_0 : i32, i32
  }
  func.func @transform_13(%arg0: i32) -> (i32, i32) {
    %c0_i32 = arith.constant 0 : i32
    %c0_i32_0 = arith.constant 0 : i32
    %c0_i32_1 = arith.constant 0 : i32
    return %c0_i32, %c0_i32_0 : i32, i32
  }
  func.func @transform_14(%arg0: i32) -> (i32, i32) {
    %c0_i32 = arith.constant 0 : i32
    %c0_i32_0 = arith.constant 0 : i32
    %c0_i32_1 = arith.constant 0 : i32
    return %c0_i32, %c0_i32_0 : i32, i32
  }
  func.func @transform_15(%arg0: i32) -> (i32, i32) {
    %c0_i32 = arith.constant 0 : i32
    %c0_i32_0 = arith.constant 0 : i32
    %c0_i32_1 = arith.constant 0 : i32
    return %c0_i32, %c0_i32_0 : i32, i32
  }
  func.func @transform_16(%arg0: i32) -> (i32, i32) {
    %c0_i32 = arith.constant 0 : i32
    %c0_i32_0 = arith.constant 0 : i32
    %c0_i32_1 = arith.constant 0 : i32
    return %c0_i32, %c0_i32_0 : i32, i32
  }
  func.func @transform_17(%arg0: i32) -> (i32, i32) {
    %c0_i32 = arith.constant 0 : i32
    %c0_i32_0 = arith.constant 0 : i32
    %c0_i32_1 = arith.constant 0 : i32
    return %c0_i32, %c0_i32_0 : i32, i32
  }
  func.func @transform_18(%arg0: i32) -> (i32, i32) {
    %c0_i32 = arith.constant 0 : i32
    %c0_i32_0 = arith.constant 0 : i32
    %c0_i32_1 = arith.constant 0 : i32
    return %c0_i32, %c0_i32_0 : i32, i32
  }
  func.func @transform_19(%arg0: i32) -> (i32, i32) {
    %c0_i32 = arith.constant 0 : i32
    %c0_i32_0 = arith.constant 0 : i32
    %c0_i32_1 = arith.constant 0 : i32
    return %c0_i32, %c0_i32_0 : i32, i32
  }
  func.func @transform_20(%arg0: i32) -> (i32, i32) {
    %c0_i32 = arith.constant 0 : i32
    %c0_i32_0 = arith.constant 0 : i32
    %c0_i32_1 = arith.constant 0 : i32
    return %c0_i32, %c0_i32_0 : i32, i32
  }
  func.func @transform_21(%arg0: i32) -> (i32, i32) {
    %c0_i32 = arith.constant 0 : i32
    %c0_i32_0 = arith.constant 0 : i32
    %c0_i32_1 = arith.constant 0 : i32
    return %c0_i32, %c0_i32_0 : i32, i32
  }
  func.func @transform_22(%arg0: i32) -> (i32, i32) {
    %c0_i32 = arith.constant 0 : i32
    %c0_i32_0 = arith.constant 0 : i32
    %c0_i32_1 = arith.constant 0 : i32
    return %c0_i32, %c0_i32_0 : i32, i32
  }
  func.func @transform_23(%arg0: i32) -> (i32, i32, i32, i32, i32) {
    %c0_i32 = arith.constant 0 : i32
    %c0_i32_0 = arith.constant 0 : i32
    %c0_i32_1 = arith.constant 0 : i32
    %c0_i32_2 = arith.constant 0 : i32
    %c0_i32_3 = arith.constant 0 : i32
    return %arg0, %c0_i32, %c0_i32_0, %c0_i32_1, %c0_i32_2 : i32, i32, i32, i32, i32
  }
}

</mosaic_0001>

<bundles_post_ra>
// kernel: inverted_res_ds.1
= control target key start
LH: loop header
LB: loop body
LE: loop exit
PB: predicated region body
PF: predicated region fallthrough
CT: control target
= control target key end

     0   :  { %s4832_s0 = inlined_call_operand.vmem [shape: bf16[2,4,8,8,16], index: 0, kind: input, shape index: {}]   ;;  %s4833_s1 = inlined_call_operand.vmem [shape: f32[9,16], index: 1, kind: input, shape index: {}]   ;;  %s4834_s2 = inlined_call_operand.vmem [shape: f32[1,16], index: 2, kind: input, shape index: {}]   ;;  %s4835_s3 = inlined_call_operand.vmem [shape: bf16[16,16], index: 3, kind: input, shape index: {}]   ;;  %s4836_s4 = inlined_call_operand.vmem [shape: f32[1,16], index: 4, kind: input, shape index: {}]   ;;  %s4837_s5 = inlined_call_operand.vmem [shape: bf16[16,16], index: 5, kind: input, shape index: {}]   ;;  %s4838_s6 = inlined_call_operand.vmem [shape: f32[1,16], index: 6, kind: input, shape index: {}]   ;;  %s4839_s7 = inlined_call_operand.vmem [shape: f32[9,16], index: 7, kind: input, shape index: {}]   ;;  %s4840_s8 = inlined_call_operand.vmem [shape: f32[1,16], index: 8, kind: input, shape index: {}]   ;;  %s4841_s9 = inlined_call_operand.vmem [shape: f32[4,16], index: 9, kind: input, shape index: {}]   ;;  %s4842_s10 = inlined_call_operand.vmem [shape: f32[4,1], index: 10, kind: input, shape index: {}]   ;;  %s4843_s11 = inlined_call_operand.vmem [shape: f32[4,16], index: 11, kind: input, shape index: {}]   ;;  %s4844_s12 = inlined_call_operand.vmem [shape: f32[1,16], index: 12, kind: input, shape index: {}]   ;;  %s4845_s13 = inlined_call_operand.vmem [shape: bf16[16,16], index: 13, kind: input, shape index: {}]   ;;  %s4846_s14 = inlined_call_operand.vmem [shape: f32[1,16], index: 14, kind: input, shape index: {}]   ;;  %s4847_s15 = inlined_call_operand.vmem [shape: f32[9,16], index: 15, kind: input, shape index: {}]   ;;  %s4848_s16 = inlined_call_operand.vmem [shape: f32[1,16], index: 16, kind: input, shape index: {}]   ;;  %s4849_s17 = inlined_call_operand.vmem [shape: f32[9,16], index: 17, kind: input, shape index: {}]   ;;  %s4850_s18 = inlined_call_operand.vmem [shape: f32[1,16], index: 18, kind: input, shape index: {}]   ;;  %s4851_s19 = inlined_call_operand.vmem [shape: f32[1,16], index: 19, kind: input, shape index: {}]   ;;  %s4852_s20 = inlined_call_operand.vmem [shape: f32[1,16], index: 20, kind: input, shape index: {}]   ;;  %s4853_s21 = inlined_call_operand.vmem [shape: f32[1,16], index: 21, kind: input, shape index: {}]   ;;  %s4854_s22 = inlined_call_operand.vmem [shape: f32[1,16], index: 22, kind: input, shape index: {}]   ;;  %s4855_s23 = inlined_call_operand.vmem [shape: f32[2,2,8,8,16], index: 23, kind: output, shape index: {}]  }
   0x1   :  { %4881 = sst [smem:[#allocation19_spill]] %s4832_s0 }
   0x2   :  { %4882 = sst [smem:[#allocation20_spill]] %s4833_s1 }
   0x3   :  { %4883 = sst [smem:[#allocation21_spill]] %s4834_s2 }
   0x4   :  { %4884 = sst [smem:[#allocation22_spill]] %s4835_s3 }
   0x5   :  { %4885 = sst [smem:[#allocation23_spill]] %s4836_s4  ;;  %s3374_s4 = smov 0  }
   0x6   :  { %4886 = sst [smem:[#allocation24_spill]] %s4837_s5 }
   0x7   :  { %4887 = sst [smem:[#allocation25_spill]] %s4838_s6 }
   0x8   :  { %4888 = sst [smem:[#allocation26_spill]] %s4839_s7 }
   0x9 LB: > { %s3047_s30 = sadd.s32 4294967295, %s3250_s4   ;;  %p3051_p0 = scmp.ge.s32.totalorder %s3250_s4, 1  ;;  %s3250_s4 = sphi %s3374_s4, %s33_s4  }
   0xa   : > { %p637_p1 = scmp.lt.s32.totalorder %s3250_s4, 3 }
   0xc   : > { %p638_p2 = pnand %p3051_p0, %p637_p1 }
   0xe   : > { %641 = sbr.rel (%p638_p2) target bundleno = 925 (0x39d), region = 112 }
  0x13   : > { %s4889_s5 = sld [smem:[#allocation24_spill]]  ;;  %p701_p3 = scmp.lt.s32.totalorder %s3047_s30, 1  ;;  %vm744_vm0 = vcmask 130048   ;;  %vm746_vm1 = vcmask 122880   ;;  %v4858_v1 = vmov 0.0   ;;  %vm2017_vm2 = vcmask 125952  }
  0x14   : > { %800 = vst.msk [vmem:[#allocation2 + $0x18] sm:$0x1] %vm746_vm1, %v4858_v1  ;;  %801 = vst.msk [vmem:[#allocation2 + $0x28] sm:$0x1] %vm746_vm1, %v4858_v1  ;;  %s4890_s6 = sld [smem:[#allocation19_spill]]  ;;  %vm2163_vm3 = vcmask 123904  }
  0x15   : > { %s4927_s30 = smov (!%p701_p3, %s3047_s30), 1  ;;  %745 = vst.msk [vmem:[#allocation2] sm:$0xff] %vm744_vm0, %v4858_v1  ;;  %748 = vst.msk [vmem:[#allocation2 + $0x90] sm:$0xff] %vm744_vm0, %v4858_v1  ;;  %s4891_s29 = sld [smem:[#allocation25_spill]] }
  0x16   : > { %747 = vst.msk [vmem:[#allocation2 + $0x8] sm:$0x1] %vm746_vm1, %v4858_v1  ;;  %751 = vst.msk [vmem:[#allocation2 + $0x128] sm:$0x1] %vm746_vm1, %v4858_v1  ;;  %s3125_s1 = sshll.u32 %s4927_s30, 7  ;;  %s4893_s24 = sld [smem:[#allocation26_spill]] }
  0x17   : > { %750 = vst.msk [vmem:[#allocation2 + $0x120] sm:$0xff] %vm744_vm0, %v4858_v1  ;;  %752 = vst.msk [vmem:[#allocation2 + $0x1b0] sm:$0xff] %vm744_vm0, %v4858_v1  ;;  %s4923_s28 = sld [smem:[#allocation21_spill]]  ;;  %s4571_s0 = scalar_lea.vmem %s4855_s23, %s3125_s1 }
  0x18   : > { %755 = vst.msk [vmem:[#allocation2 + $0x80] sm:$0xff] %vm744_vm0, %v4858_v1  ;;  %757 = vst.msk [vmem:[#allocation2 + $0x110] sm:$0xff] %vm744_vm0, %v4858_v1  ;;  %s4925_s3 = sld [smem:[#allocation23_spill]] }
  0x19   : > { %v3385_v0 = vld [vmem:[%s4889_s5] sm:$0xff]   ;;  %756 = vst.msk [vmem:[#allocation2 + $0x88] sm:$0x1] %vm746_vm1, %v4858_v1  ;;  %764 = vst.msk [vmem:[#allocation2 + $0x10] sm:$0x1] %vm746_vm1, %v4858_v1 }
  0x1a   : > { %3154 = vmatprep.subr.bf16.mxu0 %v3385_v0  ;;  %765 = vst.msk [vmem:[#allocation2 + $0x20] sm:$0x1] %vm746_vm1, %v4858_v1  ;;  %766 = vst.msk [vmem:[#allocation2 + $0x30] sm:$0x1] %vm746_vm1, %v4858_v1  ;;  %3208 = vmatprep.subr.bf16.mxu1 %v3385_v0  ;;  %s3719_s27 = scalar_lea.vmem %s4890_s6, %s3125_s1  ;;  %s4922_s6 = sld [smem:[#allocation22_spill]] }
  0x1b   : > { %767 = vst.msk [vmem:[#allocation2 + $0x40] sm:$0x1] %vm746_vm1, %v4858_v1  ;;  %768 = vst.msk [vmem:[#allocation2 + $0x50] sm:$0x1] %vm746_vm1, %v4858_v1  ;;  %3155 = vmatpush3.bf16.msra.mxu0 %v3385_v0  ;;  %3209 = vmatpush3.bf16.msra.mxu1 %v3385_v0  ;;  %v712_v2 = vld [vmem:[%s3719_s27] sm:$0xff]   ;;  %v714_v3 = vld [vmem:[%s3719_s27 + $0x8] sm:$0xff]   ;;  %v1374_v0 = vlaneseq }
  0x1c   : > { %769 = vst.msk [vmem:[#allocation2 + $0x60] sm:$0x1] %vm746_vm1, %v4858_v1  ;;  %770 = vst.msk [vmem:[#allocation2 + $0x70] sm:$0x1] %vm746_vm1, %v4858_v1  ;;  %v716_v4 = vld [vmem:[%s3719_s27 + $0x10] sm:$0xff]   ;;  %v835_v5 = vunpack.c.l.bf16 %v712_v2  ;;  %v836_v6 = vunpack.c.h.bf16 %v712_v2  ;;  %v837_v7 = vunpack.c.l.bf16 %v714_v3  ;;  %v838_v8 = vunpack.c.h.bf16 %v714_v3  ;;  %v3725_v11 = vld [vmem:[%s3719_s27 + $0x18] sm:$0xff]   ;;  %3156 = vmatprep.mubr.msk.bf16.mxu0 %vm744_vm0, %v712_v2 }
  0x1d   : > { %773 = vst.msk [vmem:[#allocation2 + $0xa0] sm:$0x1] %vm746_vm1, %v4858_v1  ;;  %774 = vst.msk [vmem:[#allocation2 + $0xb0] sm:$0x1] %vm746_vm1, %v4858_v1  ;;  %v839_v9 = vunpack.c.l.bf16 %v716_v4  ;;  %v840_v10 = vunpack.c.h.bf16 %v716_v4  ;;  %v841_v12 = vunpack.c.l.bf16 %v3725_v11  ;;  %v842_v13 = vunpack.c.h.bf16 %v3725_v11  ;;  %v3734_v14 = vld [vmem:[%s3719_s27 + $0x20] sm:$0xff]   ;;  %v3737_v15 = vld [vmem:[%s3719_s27 + $0x28] sm:$0xff]  }
  0x1e   : > { %775 = vst.msk [vmem:[#allocation2 + $0xc0] sm:$0x1] %vm746_vm1, %v4858_v1  ;;  %776 = vst.msk [vmem:[#allocation2 + $0xd0] sm:$0x1] %vm746_vm1, %v4858_v1  ;;  %3157 = vmatmul.mubr.msk.bf16.vlgmr.msra.gmra.mxu0 %vm744_vm0, %v714_v3  ;;  %v852_v16 = vunpack.c.l.bf16 %v3734_v14  ;;  %v853_v17 = vunpack.c.h.bf16 %v3734_v14  ;;  %v854_v18 = vunpack.c.l.bf16 %v3737_v15  ;;  %v3747_v19 = vld [vmem:[%s3719_s27 + $0x30] sm:$0xff]   ;;  %v736_v20 = vld [vmem:[%s3719_s27 + $0x60] sm:$0xff]   ;;  %v855_v21 = vunpack.c.h.bf16 %v3737_v15 }
  0x1f   : > { %777 = vst.msk [vmem:[#allocation2 + $0xe0] sm:$0x1] %vm746_vm1, %v4858_v1  ;;  %778 = vst.msk [vmem:[#allocation2 + $0xf0] sm:$0x1] %vm746_vm1, %v4858_v1  ;;  %3160 = vmatprep.mubr.msk.bf16.mxu0 %vm744_vm0, %v716_v4  ;;  %v856_v22 = vunpack.c.l.bf16 %v3747_v19  ;;  %v857_v23 = vunpack.c.h.bf16 %v3747_v19  ;;  %v726_v24 = vld [vmem:[%s3719_s27 + $0x38] sm:$0xff]   ;;  %v738_v25 = vld [vmem:[%s3719_s27 + $0x68] sm:$0xff]   ;;  %v886_v28 = vunpack.c.l.bf16 %v736_v20  ;;  %v887_v29 = vunpack.c.h.bf16 %v736_v20  ;;  %3180 = vmatprep.mubr.msk.bf16.mxu1 %vm744_vm0, %v736_v20 }
  0x20   : > { %779 = vst.msk [vmem:[#allocation2 + $0x100] sm:$0x1] %vm746_vm1, %v4858_v1  ;;  %782 = vst.msk [vmem:[#allocation2 + $0x130] sm:$0x1] %vm746_vm1, %v4858_v1  ;;  %v858_v26 = vunpack.c.l.bf16 %v726_v24  ;;  %v859_v27 = vunpack.c.h.bf16 %v726_v24  ;;  %v888_v30 = vunpack.c.l.bf16 %v738_v25  ;;  %v728_v31 = vld [vmem:[%s3719_s27 + $0x40] sm:$0xff]   ;;  %v740_v32 = vld [vmem:[%s3719_s27 + $0x70] sm:$0xff]   ;;  %v889_v33 = vunpack.c.h.bf16 %v738_v25  ;;  %3181 = vmatmul.mubr.msk.bf16.vlgmr.msra.gmra.mxu1 %vm744_vm0, %v738_v25 }
  0x21   : > { %783 = vst.msk [vmem:[#allocation2 + $0x140] sm:$0x1] %vm746_vm1, %v4858_v1  ;;  %784 = vst.msk [vmem:[#allocation2 + $0x150] sm:$0x1] %vm746_vm1, %v4858_v1  ;;  %v869_v34 = vunpack.c.l.bf16 %v728_v31  ;;  %v870_v35 = vunpack.c.h.bf16 %v728_v31  ;;  %v730_v36 = vld [vmem:[%s3719_s27 + $0x48] sm:$0xff]   ;;  %v742_v39 = vld [vmem:[%s3719_s27 + $0x78] sm:$0xff]   ;;  %v890_v40 = vunpack.c.l.bf16 %v740_v32  ;;  %v891_v41 = vunpack.c.h.bf16 %v740_v32  ;;  %3184 = vmatprep.mubr.msk.bf16.mxu1 %vm744_vm0, %v740_v32 }
  0x22   : > { %785 = vst.msk [vmem:[#allocation2 + $0x160] sm:$0x1] %vm746_vm1, %v4858_v1  ;;  %786 = vst.msk [vmem:[#allocation2 + $0x170] sm:$0x1] %vm746_vm1, %v4858_v1  ;;  %v871_v37 = vunpack.c.l.bf16 %v730_v36  ;;  %v872_v38 = vunpack.c.h.bf16 %v730_v36  ;;  %v892_v42 = vunpack.c.l.bf16 %v742_v39  ;;  %v732_v43 = vld [vmem:[%s3719_s27 + $0x50] sm:$0xff]   ;;  %v893_v44 = vunpack.c.h.bf16 %v742_v39  ;;  %v734_v47 = vld [vmem:[%s3719_s27 + $0x58] sm:$0xff]  }
  0x23   : > { %787 = vst.msk [vmem:[#allocation2 + $0x180] sm:$0x1] %vm746_vm1, %v4858_v1  ;;  %788 = vst.msk [vmem:[#allocation2 + $0x190] sm:$0x1] %vm746_vm1, %v4858_v1  ;;  %v873_v45 = vunpack.c.l.bf16 %v732_v43  ;;  %v874_v46 = vunpack.c.h.bf16 %v732_v43  ;;  %v875_v48 = vunpack.c.l.bf16 %v734_v47  ;;  %v876_v49 = vunpack.c.h.bf16 %v734_v47  ;;  %v3808_v50 = vld [vmem:[%s4891_s29] ss:$0 sm:$0xff] }
  0x24   : > { %791 = vst.msk [vmem:[#allocation2 + $0x1c0] sm:$0x1] %vm746_vm1, %v4858_v1  ;;  %792 = vst.msk [vmem:[#allocation2 + $0x1d0] sm:$0x1] %vm746_vm1, %v4858_v1  ;;  %s4913_s29 = sld [smem:[#allocation20_spill]] }
  0x25   : > { %793 = vst.msk [vmem:[#allocation2 + $0x1e0] sm:$0x1] %vm746_vm1, %v4858_v1  ;;  %794 = vst.msk [vmem:[#allocation2 + $0x1f0] sm:$0x1] %vm746_vm1, %v4858_v1 }
  0x26   : > { %795 = vst.msk [vmem:[#allocation2 + $0x200] sm:$0x1] %vm746_vm1, %v4858_v1  ;;  %796 = vst.msk [vmem:[#allocation2 + $0x210] sm:$0x1] %vm746_vm1, %v4858_v1  ;;  %3161 = vmatmul.mubr.msk.bf16.gmra.mxu0 %vm744_vm0, %v3725_v11 }
  0x27   : > { %797 = vst.msk [vmem:[#allocation2 + $0x220] sm:$0x1] %vm746_vm1, %v4858_v1  ;;  %802 = vst.msk [vmem:[#allocation2 + $0x38] sm:$0x1] %vm746_vm1, %v4858_v1  ;;  %3164 = vmatprep.mubr.msk.bf16.mxu0 %vm744_vm0, %v3734_v14  ;;  %v3824_v14 = vshrl.u32 %v1374_v0, 7 }
  0x28   : > { %803 = vst.msk [vmem:[#allocation2 + $0x48] sm:$0x1] %vm746_vm1, %v4858_v1  ;;  %804 = vst.msk [vmem:[#allocation2 + $0x58] sm:$0x1] %vm746_vm1, %v4858_v1  ;;  %3185 = vmatmul.mubr.msk.bf16.gmra.mxu1 %vm744_vm0, %v742_v39 }
  0x29   : > { %805 = vst.msk [vmem:[#allocation2 + $0x68] sm:$0x1] %vm746_vm1, %v4858_v1  ;;  %806 = vst.msk [vmem:[#allocation2 + $0x78] sm:$0x1] %vm746_vm1, %v4858_v1  ;;  %v3834_v25 = vsub.s32 0, %v3824_v14 }
  0x2a   : > { %818 = vst.msk [vmem:[#allocation2 + $0x138] sm:$0x1] %vm746_vm1, %v4858_v1  ;;  %819 = vst.msk [vmem:[#allocation2 + $0x148] sm:$0x1] %vm746_vm1, %v4858_v1 }
  0x2b   : > { %820 = vst.msk [vmem:[#allocation2 + $0x158] sm:$0x1] %vm746_vm1, %v4858_v1  ;;  %821 = vst.msk [vmem:[#allocation2 + $0x168] sm:$0x1] %vm746_vm1, %v4858_v1 }
  0x2c   : > { %822 = vst.msk [vmem:[#allocation2 + $0x178] sm:$0x1] %vm746_vm1, %v4858_v1  ;;  %823 = vst.msk [vmem:[#allocation2 + $0x188] sm:$0x1] %vm746_vm1, %v4858_v1 }
  0x2d   : > { %824 = vst.msk [vmem:[#allocation2 + $0x198] sm:$0x1] %vm746_vm1, %v4858_v1  ;;  %1240 = vst.msk [vmem:[#allocation3 + $0x8] sm:$0x1] %vm746_vm1, %v4858_v1 }
  0x2e   : > { %1239 = vst.msk [vmem:[#allocation3] sm:$0xff] %vm744_vm0, %v4858_v1  ;;  %1241 = vst.msk [vmem:[#allocation3 + $0x90] sm:$0xff] %vm744_vm0, %v4858_v1  ;;  %3165 = vmatmul.mubr.msk.bf16.gmra.mxu0 %vm744_vm0, %v3737_v15 }
  0x2f   : > { %1243 = vst.msk [vmem:[#allocation3 + $0x120] sm:$0xff] %vm744_vm0, %v4858_v1  ;;  %1245 = vst.msk [vmem:[#allocation3 + $0x1b0] sm:$0xff] %vm744_vm0, %v4858_v1  ;;  %3168 = vmatprep.mubr.msk.bf16.mxu0 %vm744_vm0, %v3747_v19 }
  0x30   : > { %1244 = vst.msk [vmem:[#allocation3 + $0x128] sm:$0x1] %vm746_vm1, %v4858_v1  ;;  %1249 = vst.msk [vmem:[#allocation3 + $0x88] sm:$0x1] %vm746_vm1, %v4858_v1 }
  0x31   : > { %1248 = vst.msk [vmem:[#allocation3 + $0x80] sm:$0xff] %vm744_vm0, %v4858_v1  ;;  %1250 = vst.msk [vmem:[#allocation3 + $0x110] sm:$0xff] %vm744_vm0, %v4858_v1 }
  0x32   : > { %1257 = vst.msk [vmem:[#allocation3 + $0x10] sm:$0x1] %vm746_vm1, %v4858_v1  ;;  %1258 = vst.msk [vmem:[#allocation3 + $0x20] sm:$0x1] %vm746_vm1, %v4858_v1 }
  0x33   : > { %1259 = vst.msk [vmem:[#allocation3 + $0x30] sm:$0x1] %vm746_vm1, %v4858_v1  ;;  %1260 = vst.msk [vmem:[#allocation3 + $0x40] sm:$0x1] %vm746_vm1, %v4858_v1 }
  0x34   : > { %1261 = vst.msk [vmem:[#allocation3 + $0x50] sm:$0x1] %vm746_vm1, %v4858_v1  ;;  %1262 = vst.msk [vmem:[#allocation3 + $0x60] sm:$0x1] %vm746_vm1, %v4858_v1 }
  0x35   : > { %1263 = vst.msk [vmem:[#allocation3 + $0x70] sm:$0x1] %vm746_vm1, %v4858_v1  ;;  %1266 = vst.msk [vmem:[#allocation3 + $0xa0] sm:$0x1] %vm746_vm1, %v4858_v1 }
  0x36   : > { %1267 = vst.msk [vmem:[#allocation3 + $0xb0] sm:$0x1] %vm746_vm1, %v4858_v1  ;;  %1268 = vst.msk [vmem:[#allocation3 + $0xc0] sm:$0x1] %vm746_vm1, %v4858_v1  ;;  %3169 = vmatmul.mubr.msk.bf16.gmra.mxu0 %vm744_vm0, %v726_v24 }
  0x37   : > { %1269 = vst.msk [vmem:[#allocation3 + $0xd0] sm:$0x1] %vm746_vm1, %v4858_v1  ;;  %1270 = vst.msk [vmem:[#allocation3 + $0xe0] sm:$0x1] %vm746_vm1, %v4858_v1  ;;  %3172 = vmatprep.mubr.msk.bf16.mxu0 %vm744_vm0, %v728_v31 }
  0x38   : > { %1271 = vst.msk [vmem:[#allocation3 + $0xf0] sm:$0x1] %vm746_vm1, %v4858_v1  ;;  %1272 = vst.msk [vmem:[#allocation3 + $0x100] sm:$0x1] %vm746_vm1, %v4858_v1 }
  0x39   : > { %1275 = vst.msk [vmem:[#allocation3 + $0x130] sm:$0x1] %vm746_vm1, %v4858_v1  ;;  %1276 = vst.msk [vmem:[#allocation3 + $0x140] sm:$0x1] %vm746_vm1, %v4858_v1 }
  0x3a   : > { %1277 = vst.msk [vmem:[#allocation3 + $0x150] sm:$0x1] %vm746_vm1, %v4858_v1  ;;  %1278 = vst.msk [vmem:[#allocation3 + $0x160] sm:$0x1] %vm746_vm1, %v4858_v1 }
  0x3b   : > { %1279 = vst.msk [vmem:[#allocation3 + $0x170] sm:$0x1] %vm746_vm1, %v4858_v1  ;;  %1280 = vst.msk [vmem:[#allocation3 + $0x180] sm:$0x1] %vm746_vm1, %v4858_v1 }
  0x3c   : > { %1281 = vst.msk [vmem:[#allocation3 + $0x190] sm:$0x1] %vm746_vm1, %v4858_v1  ;;  %1284 = vst.msk [vmem:[#allocation3 + $0x1c0] sm:$0x1] %vm746_vm1, %v4858_v1 }
  0x3d   : > { %1285 = vst.msk [vmem:[#allocation3 + $0x1d0] sm:$0x1] %vm746_vm1, %v4858_v1  ;;  %1286 = vst.msk [vmem:[#allocation3 + $0x1e0] sm:$0x1] %vm746_vm1, %v4858_v1 }
  0x3e   : > { %1287 = vst.msk [vmem:[#allocation3 + $0x1f0] sm:$0x1] %vm746_vm1, %v4858_v1  ;;  %1288 = vst.msk [vmem:[#allocation3 + $0x200] sm:$0x1] %vm746_vm1, %v4858_v1  ;;  %3173 = vmatmul.mubr.msk.bf16.gmra.mxu0 %vm744_vm0, %v730_v36 }
  0x3f   : > { %1289 = vst.msk [vmem:[#allocation3 + $0x210] sm:$0x1] %vm746_vm1, %v4858_v1  ;;  %1290 = vst.msk [vmem:[#allocation3 + $0x220] sm:$0x1] %vm746_vm1, %v4858_v1  ;;  %3176 = vmatprep.mubr.msk.bf16.mxu0 %vm744_vm0, %v732_v43 }
  0x40   : > { %1293 = vst.msk [vmem:[#allocation3 + $0x18] sm:$0x1] %vm746_vm1, %v4858_v1  ;;  %1294 = vst.msk [vmem:[#allocation3 + $0x28] sm:$0x1] %vm746_vm1, %v4858_v1 }
  0x41   : > { %1295 = vst.msk [vmem:[#allocation3 + $0x38] sm:$0x1] %vm746_vm1, %v4858_v1  ;;  %1296 = vst.msk [vmem:[#allocation3 + $0x48] sm:$0x1] %vm746_vm1, %v4858_v1 }
  0x42   : > { %1297 = vst.msk [vmem:[#allocation3 + $0x58] sm:$0x1] %vm746_vm1, %v4858_v1  ;;  %1298 = vst.msk [vmem:[#allocation3 + $0x68] sm:$0x1] %vm746_vm1, %v4858_v1 }
  0x43   : > { %1299 = vst.msk [vmem:[#allocation3 + $0x78] sm:$0x1] %vm746_vm1, %v4858_v1  ;;  %1311 = vst.msk [vmem:[#allocation3 + $0x138] sm:$0x1] %vm746_vm1, %v4858_v1 }
  0x44   : > { %1312 = vst.msk [vmem:[#allocation3 + $0x148] sm:$0x1] %vm746_vm1, %v4858_v1  ;;  %1313 = vst.msk [vmem:[#allocation3 + $0x158] sm:$0x1] %vm746_vm1, %v4858_v1 }
  0x45   : > { %1314 = vst.msk [vmem:[#allocation3 + $0x168] sm:$0x1] %vm746_vm1, %v4858_v1  ;;  %1315 = vst.msk [vmem:[#allocation3 + $0x178] sm:$0x1] %vm746_vm1, %v4858_v1 }
  0x46   : > { %1316 = vst.msk [vmem:[#allocation3 + $0x188] sm:$0x1] %vm746_vm1, %v4858_v1  ;;  %1317 = vst.msk [vmem:[#allocation3 + $0x198] sm:$0x1] %vm746_vm1, %v4858_v1  ;;  %3177 = vmatmul.mubr.msk.bf16.gmra.mxu0 %vm744_vm0, %v734_v47 }
  0x47   : > { %2162 = vst.msk [vmem:[#allocation4] sm:$0xff] %vm744_vm0, %v4858_v1  ;;  %2165 = vst.msk [vmem:[#allocation4 + $0xa0] sm:$0xff] %vm744_vm0, %v4858_v1 }
  0x48   : > { %2168 = vst.msk [vmem:[#allocation4 + $0x90] sm:$0xff] %vm744_vm0, %v4858_v1  ;;  %2170 = vst.msk [vmem:[#allocation4 + $0x130] sm:$0xff] %vm744_vm0, %v4858_v1 }
  0x49   : > { %2173 = vst.msk [vmem:[#allocation4 + $0x10] sm:$0x1] %vm746_vm1, %v4858_v1  ;;  %2174 = vst.msk [vmem:[#allocation4 + $0x20] sm:$0x1] %vm746_vm1, %v4858_v1 }
  0x4a   : > { %2175 = vst.msk [vmem:[#allocation4 + $0x30] sm:$0x1] %vm746_vm1, %v4858_v1  ;;  %2176 = vst.msk [vmem:[#allocation4 + $0x40] sm:$0x1] %vm746_vm1, %v4858_v1 }
  0x4b   : > { %2177 = vst.msk [vmem:[#allocation4 + $0x50] sm:$0x1] %vm746_vm1, %v4858_v1  ;;  %2178 = vst.msk [vmem:[#allocation4 + $0x60] sm:$0x1] %vm746_vm1, %v4858_v1 }
  0x4c   : > { %2179 = vst.msk [vmem:[#allocation4 + $0x70] sm:$0x1] %vm746_vm1, %v4858_v1  ;;  %2180 = vst.msk [vmem:[#allocation4 + $0x80] sm:$0x1] %vm746_vm1, %v4858_v1 }
  0x4d   : > { %2183 = vst.msk [vmem:[#allocation4 + $0xb0] sm:$0x1] %vm746_vm1, %v4858_v1  ;;  %2184 = vst.msk [vmem:[#allocation4 + $0xc0] sm:$0x1] %vm746_vm1, %v4858_v1 }
  0x4e   : > { %2185 = vst.msk [vmem:[#allocation4 + $0xd0] sm:$0x1] %vm746_vm1, %v4858_v1  ;;  %2186 = vst.msk [vmem:[#allocation4 + $0xe0] sm:$0x1] %vm746_vm1, %v4858_v1 }
  0x4f   : > { %2187 = vst.msk [vmem:[#allocation4 + $0xf0] sm:$0x1] %vm746_vm1, %v4858_v1  ;;  %2188 = vst.msk [vmem:[#allocation4 + $0x100] sm:$0x1] %vm746_vm1, %v4858_v1 }
  0x50   : > { %2189 = vst.msk [vmem:[#allocation4 + $0x110] sm:$0x1] %vm746_vm1, %v4858_v1  ;;  %2190 = vst.msk [vmem:[#allocation4 + $0x120] sm:$0x1] %vm746_vm1, %v4858_v1 }
  0x51   : > { %2193 = vst.msk [vmem:[#allocation4 + $0x19] sm:$0x1] %vm746_vm1, %v4858_v1  ;;  %2194 = vst.msk [vmem:[#allocation4 + $0x29] sm:$0x1] %vm746_vm1, %v4858_v1 }
  0x52   : > { %2195 = vst.msk [vmem:[#allocation4 + $0x39] sm:$0x1] %vm746_vm1, %v4858_v1  ;;  %2196 = vst.msk [vmem:[#allocation4 + $0x49] sm:$0x1] %vm746_vm1, %v4858_v1 }
  0x53   : > { %2197 = vst.msk [vmem:[#allocation4 + $0x59] sm:$0x1] %vm746_vm1, %v4858_v1  ;;  %2198 = vst.msk [vmem:[#allocation4 + $0x69] sm:$0x1] %vm746_vm1, %v4858_v1 }
  0x54   : > { %2199 = vst.msk [vmem:[#allocation4 + $0x79] sm:$0x1] %vm746_vm1, %v4858_v1  ;;  %2200 = vst.msk [vmem:[#allocation4 + $0x89] sm:$0x1] %vm746_vm1, %v4858_v1 }
  0x55   : > { %2203 = vst.msk [vmem:[#allocation4 + $0xb9] sm:$0x1] %vm746_vm1, %v4858_v1  ;;  %2204 = vst.msk [vmem:[#allocation4 + $0xc9] sm:$0x1] %vm746_vm1, %v4858_v1 }
  0x56   : > { %2205 = vst.msk [vmem:[#allocation4 + $0xd9] sm:$0x1] %vm746_vm1, %v4858_v1  ;;  %2206 = vst.msk [vmem:[#allocation4 + $0xe9] sm:$0x1] %vm746_vm1, %v4858_v1 }
  0x57   : > { %2207 = vst.msk [vmem:[#allocation4 + $0xf9] sm:$0x1] %vm746_vm1, %v4858_v1  ;;  %2208 = vst.msk [vmem:[#allocation4 + $0x109] sm:$0x1] %vm746_vm1, %v4858_v1 }
  0x58   : > { %2209 = vst.msk [vmem:[#allocation4 + $0x119] sm:$0x1] %vm746_vm1, %v4858_v1  ;;  %2210 = vst.msk [vmem:[#allocation4 + $0x129] sm:$0x1] %vm746_vm1, %v4858_v1 }
  0x59   : > { %763 = vst.msk [vmem:[#allocation2] sm:$0x1] %vm746_vm1, %v4858_v1  ;;  %771 = vst.msk [vmem:[#allocation2 + $0x80] sm:$0x1] %vm746_vm1, %v4858_v1 }
  0x5a   : > { %772 = vst.msk [vmem:[#allocation2 + $0x90] sm:$0x1] %vm746_vm1, %v4858_v1  ;;  %780 = vst.msk [vmem:[#allocation2 + $0x110] sm:$0x1] %vm746_vm1, %v4858_v1 }
  0x5b   : > { %781 = vst.msk [vmem:[#allocation2 + $0x120] sm:$0x1] %vm746_vm1, %v4858_v1  ;;  %790 = vst.msk [vmem:[#allocation2 + $0x1b0] sm:$0x1] %vm746_vm1, %v4858_v1 }
  0x5c   : > { %799 = vst.msk [vmem:[#allocation2 + $0x8] sm:$0x1] %vm746_vm1, %v4858_v1  ;;  %807 = vst.msk [vmem:[#allocation2 + $0x88] sm:$0x1] %vm746_vm1, %v4858_v1 }
  0x5d   : > { %817 = vst.msk [vmem:[#allocation2 + $0x128] sm:$0x1] %vm746_vm1, %v4858_v1  ;;  %1256 = vst.msk [vmem:[#allocation3] sm:$0x1] %vm746_vm1, %v4858_v1 }
  0x5e   : > { %1264 = vst.msk [vmem:[#allocation3 + $0x80] sm:$0x1] %vm746_vm1, %v4858_v1  ;;  %1265 = vst.msk [vmem:[#allocation3 + $0x90] sm:$0x1] %vm746_vm1, %v4858_v1 }
  0x5f   : > { %1273 = vst.msk [vmem:[#allocation3 + $0x110] sm:$0x1] %vm746_vm1, %v4858_v1  ;;  %1274 = vst.msk [vmem:[#allocation3 + $0x120] sm:$0x1] %vm746_vm1, %v4858_v1 }
  0x60   : > { %1283 = vst.msk [vmem:[#allocation3 + $0x1b0] sm:$0x1] %vm746_vm1, %v4858_v1  ;;  %1292 = vst.msk [vmem:[#allocation3 + $0x8] sm:$0x1] %vm746_vm1, %v4858_v1 }
  0x61   : > { %1300 = vst.msk [vmem:[#allocation3 + $0x88] sm:$0x1] %vm746_vm1, %v4858_v1  ;;  %1310 = vst.msk [vmem:[#allocation3 + $0x128] sm:$0x1] %vm746_vm1, %v4858_v1 }
  0x62   : > { %2172 = vst.msk [vmem:[#allocation4] sm:$0x1] %vm746_vm1, %v4858_v1  ;;  %2181 = vst.msk [vmem:[#allocation4 + $0x90] sm:$0x1] %vm746_vm1, %v4858_v1 }
  0x63   : > { %2182 = vst.msk [vmem:[#allocation4 + $0xa0] sm:$0x1] %vm746_vm1, %v4858_v1  ;;  %2191 = vst.msk [vmem:[#allocation4 + $0x130] sm:$0x1] %vm746_vm1, %v4858_v1 }
  0x64   : > { %844 = vst.msk [vmem:[#allocation2 + $0x11] sm:$0xff] %vm744_vm0, %v835_v5  ;;  %845 = vst.msk [vmem:[#allocation2 + $0x21] sm:$0xff] %vm744_vm0, %v836_v6 }
  0x65   : > { %846 = vst.msk [vmem:[#allocation2 + $0x31] sm:$0xff] %vm744_vm0, %v837_v7  ;;  %847 = vst.msk [vmem:[#allocation2 + $0x41] sm:$0xff] %vm744_vm0, %v838_v8  ;;  %v1753_v47 = vld [vmem:[#allocation3 + $0x90] sm:$0xff] }
  0x66   : > { %848 = vst.msk [vmem:[#allocation2 + $0x51] sm:$0xff] %vm744_vm0, %v839_v9  ;;  %849 = vst.msk [vmem:[#allocation2 + $0x61] sm:$0xff] %vm744_vm0, %v840_v10 }
  0x67   : > { %850 = vst.msk [vmem:[#allocation2 + $0x71] sm:$0xff] %vm744_vm0, %v841_v12  ;;  %851 = vst.msk [vmem:[#allocation2 + $0x81] sm:$0xff] %vm744_vm0, %v842_v13 }
  0x68   : > { %861 = vst.msk [vmem:[#allocation2 + $0xa0] sm:$0xff] %vm744_vm0, %v852_v16  ;;  %862 = vst.msk [vmem:[#allocation2 + $0xb0] sm:$0xff] %vm744_vm0, %v853_v17 }
  0x69   : > { %863 = vst.msk [vmem:[#allocation2 + $0xc0] sm:$0xff] %vm744_vm0, %v854_v18  ;;  %864 = vst.msk [vmem:[#allocation2 + $0xd0] sm:$0xff] %vm744_vm0, %v855_v21 }
  0x6a   : > { %865 = vst.msk [vmem:[#allocation2 + $0xe0] sm:$0xff] %vm744_vm0, %v856_v22  ;;  %866 = vst.msk [vmem:[#allocation2 + $0xf0] sm:$0xff] %vm744_vm0, %v857_v23 }
  0x6b   : > { %867 = vst.msk [vmem:[#allocation2 + $0x100] sm:$0xff] %vm744_vm0, %v858_v26  ;;  %868 = vst.msk [vmem:[#allocation2 + $0x110] sm:$0xff] %vm744_vm0, %v859_v27 }
  0x6c   : > { %895 = vst.msk [vmem:[#allocation2 + $0x1b0] sm:$0xff] %vm744_vm0, %v886_v28  ;;  %896 = vst.msk [vmem:[#allocation2 + $0x1c0] sm:$0xff] %vm744_vm0, %v887_v29 }
  0x6d   : > { %897 = vst.msk [vmem:[#allocation2 + $0x1d0] sm:$0xff] %vm744_vm0, %v888_v30  ;;  %898 = vst.msk [vmem:[#allocation2 + $0x1e0] sm:$0xff] %vm744_vm0, %v889_v33  ;;  %v3840_v30 = vld [vmem:[%s4893_s24] sm:$0xff]  ;;  %v3845_v33 = vsub.s32 1, %v3824_v14 }
  0x6e   : > { %878 = vst.msk [vmem:[#allocation2 + $0x121] sm:$0xff] %vm744_vm0, %v869_v34  ;;  %879 = vst.msk [vmem:[#allocation2 + $0x131] sm:$0xff] %vm744_vm0, %v870_v35 }
  0x6f   : > { %880 = vst.msk [vmem:[#allocation2 + $0x141] sm:$0xff] %vm744_vm0, %v871_v37  ;;  %881 = vst.msk [vmem:[#allocation2 + $0x151] sm:$0xff] %vm744_vm0, %v872_v38 }
  0x70   : > { %899 = vst.msk [vmem:[#allocation2 + $0x1f0] sm:$0xff] %vm744_vm0, %v890_v40  ;;  %900 = vst.msk [vmem:[#allocation2 + $0x200] sm:$0xff] %vm744_vm0, %v891_v41  ;;  %v1732_v40 = vld [vmem:[#allocation3] sm:$0xff]  ;;  %v3853_v41 = vrot.slane %v3840_v30, %v3834_v25 }
  0x71   : > { %901 = vst.msk [vmem:[#allocation2 + $0x210] sm:$0xff] %vm744_vm0, %v892_v42  ;;  %902 = vst.msk [vmem:[#allocation2 + $0x220] sm:$0xff] %vm744_vm0, %v893_v44  ;;  %v3856_v42 = vsub.s32 2, %v3824_v14 }
  0x72   : > { %882 = vst.msk [vmem:[#allocation2 + $0x161] sm:$0xff] %vm744_vm0, %v873_v45  ;;  %883 = vst.msk [vmem:[#allocation2 + $0x171] sm:$0xff] %vm744_vm0, %v874_v46 }
  0x73   : > { %884 = vst.msk [vmem:[#allocation2 + $0x181] sm:$0xff] %vm744_vm0, %v875_v48  ;;  %885 = vst.msk [vmem:[#allocation2 + $0x191] sm:$0xff] %vm744_vm0, %v876_v49  ;;  %v3863_v48 = vrot.slane %v3840_v30, %v3845_v33 }
  0x74   : > { %4892 = vst [vmem:[#allocation5_spill] sm:$0xff] %v3834_v25  ;;  %4894 = vst [vmem:[#allocation6_spill] sm:$0xff] %v3845_v33 }
  0x75   : > { %4895 = vst [vmem:[#allocation7_spill] sm:$0xff] %v3856_v42 }
  0xde   : > { %v3158_v51 = vpop.f32.mrf.mxu0 }
  0xdf   : > { %v1089_v52 = vadd.f32 %v3158_v51, %v3808_v50 }
  0xe0   : > { %v1080_v53 = vpop.f32.mrf.mxu0  ;;  %v3182_v60 = vpop.f32.mrf.mxu1 }
  0xe1   : > { %v1209_v54 = vmax.f32 %v1089_v52, 0.0  ;;  %v1081_v55 = vadd.f32 %v3808_v50, %v1080_v53  ;;  %v1185_v63 = vadd.f32 %v3182_v60, %v3808_v50 }
  0xe2   : > { %v3159_v56 = vpop.f32.mrf.mxu0  ;;  %v1176_v3 = vpop.f32.mrf.mxu1 }
  0xe3   : > { %1331 = vst.msk [vmem:[#allocation3 + $0x31] sm:$0xff] %vm744_vm0, %v1209_v54  ;;  %v1207_v57 = vmax.f32 %v1081_v55, 0.0  ;;  %v1092_v58 = vadd.f32 %v3159_v56, %v3808_v50  ;;  %v1233_v6 = vmax.f32 %v1185_v63, 0.0  ;;  %v1177_v7 = vadd.f32 %v3808_v50, %v1176_v3 }
  0xe4   : > { %v1083_v59 = vpop.f32.mrf.mxu0  ;;  %v3183_v9 = vpop.f32.mrf.mxu1  ;;  %v1744_v55 = vmul.f32 %v3853_v41, %v1732_v40  ;;  %v3878_v63 = vrot.slane %v3840_v30, %v3856_v42 }
  0xe5   : > { %1329 = vst.msk [vmem:[#allocation3 + $0x11] sm:$0xff] %vm744_vm0, %v1207_v57  ;;  %v1210_v61 = vmax.f32 %v1092_v58, 0.0  ;;  %v1084_v62 = vadd.f32 %v3808_v50, %v1083_v59  ;;  %1358 = vst.msk [vmem:[#allocation3 + $0x1d0] sm:$0xff] %vm744_vm0, %v1233_v6  ;;  %v1231_v12 = vmax.f32 %v1177_v7, 0.0  ;;  %v1188_v13 = vadd.f32 %v3183_v9, %v3808_v50 }
  0xe6   : > { %v3162_v2 = vpop.f32.mrf.mxu0  ;;  %v1179_v16 = vpop.f32.mrf.mxu1  ;;  %v1765_v59 = vmul.f32 %v3863_v48, %v1753_v47  ;;  %v3890_v6 = vsub.s32 5, %v3824_v14  ;;  %v3893_v7 = vsub.s32 7, %v3824_v14 }
  0xe7   : > { %1332 = vst.msk [vmem:[#allocation3 + $0x41] sm:$0xff] %vm744_vm0, %v1210_v61  ;;  %v1208_v4 = vmax.f32 %v1084_v62, 0.0  ;;  %v1105_v5 = vadd.f32 %v3162_v2, %v3808_v50  ;;  %1356 = vst.msk [vmem:[#allocation3 + $0x1b0] sm:$0xff] %vm744_vm0, %v1231_v12  ;;  %v1234_v19 = vmax.f32 %v1188_v13, 0.0  ;;  %v1180_v21 = vadd.f32 %v3808_v50, %v1179_v16  ;;  %v1781_v62 = vld [vmem:[#allocation3 + $0x1] sm:$0xff] }
  0xe8   : > { %v1096_v8 = vpop.f32.mrf.mxu0  ;;  %v3186_v22 = vpop.f32.mrf.mxu1  ;;  %v3874_v61 = vsub.s32 6, %v3824_v14  ;;  %4899 = vst [vmem:[#allocation11_spill] sm:$0xff] %v3890_v6  ;;  %4900 = vst [vmem:[#allocation12_spill] sm:$0xff] %v3893_v7 }
  0xe9   : > { %1330 = vst.msk [vmem:[#allocation3 + $0x21] sm:$0xff] %vm744_vm0, %v1208_v4  ;;  %v1213_v10 = vmax.f32 %v1105_v5, 0.0  ;;  %v1097_v11 = vadd.f32 %v3808_v50, %v1096_v8  ;;  %1359 = vst.msk [vmem:[#allocation3 + $0x1e0] sm:$0xff] %vm744_vm0, %v1234_v19  ;;  %v1232_v27 = vmax.f32 %v1180_v21, 0.0  ;;  %v1201_v28 = vadd.f32 %v3186_v22, %v3808_v50 }
  0xea   : > { %v3163_v15 = vpop.f32.mrf.mxu0  ;;  %v1192_v29 = vpop.f32.mrf.mxu1  ;;  %4896 = vst [vmem:[#allocation8_spill] sm:$0xff] %v3874_v61  ;;  %v3884_v4 = vsub.s32 3, %v3824_v14  ;;  %v3887_v5 = vsub.s32 4, %v3824_v14  ;;  %v3900_v13 = vrot.slane %v3840_v30, %v3874_v61  ;;  %v1784_v16 = vld [vmem:[#allocation3 + $0x31] sm:$0xff] }
  0xeb   : > { %1335 = vst.msk [vmem:[#allocation3 + $0x71] sm:$0xff] %vm744_vm0, %v1213_v10  ;;  %v1211_v17 = vmax.f32 %v1097_v11, 0.0  ;;  %v1108_v18 = vadd.f32 %v3163_v15, %v3808_v50  ;;  %v1193_v34 = vadd.f32 %v3808_v50, %v1192_v29  ;;  %1357 = vst.msk [vmem:[#allocation3 + $0x1c0] sm:$0xff] %vm744_vm0, %v1232_v27  ;;  %v1237_v36 = vmax.f32 %v1201_v28, 0.0  ;;  %v1735_v15 = vld [vmem:[#allocation3 + $0x30] sm:$0xff] }
  0xec   : > { %v1099_v20 = vpop.f32.mrf.mxu0  ;;  %v3187_v37 = vpop.f32.mrf.mxu1  ;;  %4897 = vst [vmem:[#allocation9_spill] sm:$0xff] %v3884_v4  ;;  %4898 = vst [vmem:[#allocation10_spill] sm:$0xff] %v3887_v5  ;;  %v1773_v10 = vadd.f32 %v1765_v59, %v1744_v55  ;;  %v1793_v11 = vmul.f32 %v3878_v63, %v1781_v62  ;;  %v1733_v19 = vld [vmem:[#allocation3 + $0x10] sm:$0xff]  ;;  %v3911_v22 = vrot.slane %v3840_v30, %v3884_v4 }
  0xed   : > { %1333 = vst.msk [vmem:[#allocation3 + $0x51] sm:$0xff] %vm744_vm0, %v1211_v17  ;;  %v1214_v23 = vmax.f32 %v1108_v18, 0.0  ;;  %v1100_v24 = vadd.f32 %v3808_v50, %v1099_v20  ;;  %1362 = vst.msk [vmem:[#allocation3 + $0x210] sm:$0xff] %vm744_vm0, %v1237_v36  ;;  %v1235_v44 = vmax.f32 %v1193_v34, 0.0  ;;  %v1204_v45 = vadd.f32 %v3187_v37, %v3808_v50  ;;  %v3907_v18 = vld [vmem:[%s4893_s24 + $0x8] ss:$0 sm:$0xff] }
  0xee   : > { %v3166_v26 = vpop.f32.mrf.mxu0  ;;  %v1195_v46 = vpop.f32.mrf.mxu1  ;;  %4901 = vst [vmem:[#allocation13_spill] sm:$0xff] %v3907_v18  ;;  %v1782_v20 = vld [vmem:[#allocation3 + $0x11] sm:$0xff]  ;;  %v1785_v29 = vld [vmem:[#allocation3 + $0x41] sm:$0xff]  ;;  %v3930_v34 = vmul.f32 %v3853_v41, %v1735_v15  ;;  %v3933_v36 = vmul.f32 %v3878_v63, %v1784_v16  ;;  %v3936_v37 = vmul.f32 %v3900_v13, %v1735_v15 }
  0xef   : > { %1336 = vst.msk [vmem:[#allocation3 + $0x81] sm:$0xff] %vm744_vm0, %v1214_v23  ;;  %v1212_v31 = vmax.f32 %v1100_v24, 0.0  ;;  %v1121_v32 = vadd.f32 %v3166_v26, %v3808_v50  ;;  %v1196_v52 = vadd.f32 %v3808_v50, %v1195_v46  ;;  %1360 = vst.msk [vmem:[#allocation3 + $0x1f0] sm:$0xff] %vm744_vm0, %v1235_v44  ;;  %v1238_v54 = vmax.f32 %v1204_v45, 0.0  ;;  %v1736_v26 = vld [vmem:[#allocation3 + $0x40] sm:$0xff]  ;;  %v1839_v46 = vld [vmem:[#allocation3 + $0x1d0] sm:$0xff] }
  0xf0   : > { %v1112_v35 = vpop.f32.mrf.mxu0  ;;  %v3915_v23 = vrot.slane %v3840_v30, %v3890_v6  ;;  %v3919_v24 = vrot.slane %v3840_v30, %v3893_v7  ;;  %v3945_v40 = vmul.f32 %v3878_v63, %v1782_v20  ;;  %v3961_v55 = vmul.f32 %v3907_v18, %v1782_v20 }
  0xf1   : > { %1334 = vst.msk [vmem:[#allocation3 + $0x61] sm:$0xff] %vm744_vm0, %v1212_v31  ;;  %v1217_v38 = vmax.f32 %v1121_v32, 0.0  ;;  %v1113_v39 = vadd.f32 %v3808_v50, %v1112_v35  ;;  %v1236_v58 = vmax.f32 %v1196_v52, 0.0  ;;  %1363 = vst.msk [vmem:[#allocation3 + $0x220] sm:$0xff] %vm744_vm0, %v1238_v54  ;;  %v3923_v31 = vadd.f32 %v1793_v11, %v1773_v10 }
  0xf2   : > { %v3167_v43 = vpop.f32.mrf.mxu0  ;;  %v3927_v32 = vrot.slane %v3840_v30, %v3887_v5  ;;  %v1734_v30 = vld [vmem:[#allocation3 + $0x20] sm:$0xff]  ;;  %v3952_v52 = vld [vmem:[#allocation3 + $0x71] sm:$0xff]  ;;  %v3958_v54 = vmul.f32 %v3900_v13, %v1733_v19  ;;  %v3970_v62 = vmul.f32 %v3900_v13, %v1736_v26 }
  0xf3   : > { %1340 = vst.msk [vmem:[#allocation3 + $0xc0] sm:$0xff] %vm744_vm0, %v1217_v38  ;;  %v1215_v49 = vmax.f32 %v1113_v39, 0.0  ;;  %v1124_v51 = vadd.f32 %v3167_v43, %v3808_v50  ;;  %1361 = vst.msk [vmem:[#allocation3 + $0x200] sm:$0xff] %vm744_vm0, %v1236_v58  ;;  %v3939_v38 = vmul.f32 %v3907_v18, %v1784_v16  ;;  %v3942_v39 = vmul.f32 %v3853_v41, %v1733_v19  ;;  %v1783_v43 = vld [vmem:[#allocation3 + $0x21] sm:$0xff] }
  0xf4   : > { %v1115_v53 = vpop.f32.mrf.mxu0  ;;  %4902 = vst [vmem:[#allocation14_spill] sm:$0xff] %v3952_v52  ;;  %v1786_v10 = vld [vmem:[#allocation3 + $0x51] sm:$0xff]  ;;  %v3980_v11 = vmul.f32 %v3927_v32, %v1839_v46  ;;  %v1840_v19 = vld [vmem:[#allocation3 + $0x1e0] sm:$0xff] }
  0xf5   : > { %1338 = vst.msk [vmem:[#allocation3 + $0xa0] sm:$0xff] %vm744_vm0, %v1215_v49  ;;  %v1218_v56 = vmax.f32 %v1124_v51, 0.0  ;;  %v1116_v57 = vadd.f32 %v3808_v50, %v1115_v53  ;;  %v1739_v49 = vld [vmem:[#allocation3 + $0x70] sm:$0xff]  ;;  %v3950_v51 = vmul.f32 %v3853_v41, %v1736_v26  ;;  %v3955_v53 = vmul.f32 %v3878_v63, %v1785_v29 }
  0xf6   : > { %v3170_v60 = vpop.f32.mrf.mxu0  ;;  %v1900_v20 = vld [vmem:[#allocation3 + $0x80] sm:$0xff]  ;;  %v1841_v61 = vld [vmem:[#allocation3 + $0x1f0] sm:$0xff] }
  0xf7   : > { %1341 = vst.msk [vmem:[#allocation3 + $0xd0] sm:$0xff] %vm744_vm0, %v1218_v56  ;;  %v1216_v0 = vmax.f32 %v1116_v57, 0.0  ;;  %v1137_v2 = vadd.f32 %v3170_v60, %v3808_v50  ;;  %v1837_v60 = vld [vmem:[#allocation3 + $0x1b0] sm:$0xff] }
  0xf8   : > { %v1128_v3 = vpop.f32.mrf.mxu0  ;;  %v4006_v46 = vld [vmem:[#allocation3 + $0x60] sm:$0xff] }
  0xf9   : > { %1339 = vst.msk [vmem:[#allocation3 + $0xb0] sm:$0xff] %vm744_vm0, %v1216_v0  ;;  %v1221_v8 = vmax.f32 %v1137_v2, 0.0  ;;  %v1129_v9 = vadd.f32 %v3808_v50, %v1128_v3  ;;  %v3973_v0 = vmul.f32 %v3907_v18, %v1785_v29  ;;  %v1746_v2 = vmul.f32 %v3853_v41, %v1734_v30  ;;  %v1844_v6 = vld [vmem:[#allocation3 + $0x220] sm:$0xff] }
  0xfa   : > { %v3171_v12 = vpop.f32.mrf.mxu0  ;;  %v3963_v56 = vld [vmem:[#allocation3 + $0xc0] sm:$0xff]  ;;  %v3977_v3 = vmul.f32 %v3878_v63, %v1783_v43  ;;  %v3999_v29 = vmul.f32 %v3927_v32, %v1837_v60 }
  0xfb   : > { %1344 = vst.msk [vmem:[#allocation3 + $0x100] sm:$0xff] %vm744_vm0, %v1221_v8  ;;  %v1219_v17 = vmax.f32 %v1129_v9, 0.0  ;;  %v1140_v14 = vadd.f32 %v3171_v12, %v3808_v50  ;;  %v1737_v9 = vld [vmem:[#allocation3 + $0x50] sm:$0xff]  ;;  %v3983_v12 = vmul.f32 %v3900_v13, %v1734_v30  ;;  %v4014_v60 = vld [vmem:[#allocation3 + $0x61] sm:$0xff] }
  0xfc   : > { %v1131_v21 = vpop.f32.mrf.mxu0  ;;  %v1754_v30 = vld [vmem:[#allocation3 + $0xa0] sm:$0xff]  ;;  %4903 = vst [vmem:[#allocation15_spill] sm:$0xff] %v4014_v60 }
  0xfd   : > { %1342 = vst.msk [vmem:[#allocation3 + $0xe0] sm:$0xff] %vm744_vm0, %v1219_v17  ;;  %v1222_v27 = vmax.f32 %v1140_v14, 0.0  ;;  %v1132_v28 = vadd.f32 %v3808_v50, %v1131_v21  ;;  %v3988_v17 = vmul.f32 %v3853_v41, %v1739_v49  ;;  %v3992_v14 = vmul.f32 %v3878_v63, %v3952_v52 }
  0xfe   : > { %v3174_v35 = vpop.f32.mrf.mxu0  ;;  %v1768_v21 = vmul.f32 %v3863_v48, %v3963_v56 }
  0xff   : > { %1345 = vst.msk [vmem:[#allocation3 + $0x110] sm:$0xff] %vm744_vm0, %v1222_v27  ;;  %v1220_v44 = vmax.f32 %v1132_v28, 0.0  ;;  %v1153_v45 = vadd.f32 %v3174_v35, %v3808_v50  ;;  %v1838_v27 = vld [vmem:[#allocation3 + $0x1c0] sm:$0xff]  ;;  %v4002_v35 = vmul.f32 %v3900_v13, %v1739_v49  ;;  %v4017_v49 = vmul.f32 %v3927_v32, %v1840_v19 }
 0x100   : > { %v1144_v47 = vpop.f32.mrf.mxu0  ;;  %v3965_v57 = vld [vmem:[#allocation3 + $0xb0] sm:$0xff]  ;;  %v4031_v5 = vmul.f32 %v3927_v32, %v1838_v27  ;;  %v4034_v19 = vmul.f32 %v3907_v18, %v1786_v10 }
 0x101   : > { %1343 = vst.msk [vmem:[#allocation3 + $0xf0] sm:$0xff] %vm744_vm0, %v1220_v44  ;;  %v1225_v58 = vmax.f32 %v1153_v45, 0.0  ;;  %v1145_v59 = vadd.f32 %v3808_v50, %v1144_v47  ;;  %v1767_v26 = vmul.f32 %v3863_v48, %v3965_v57  ;;  %v4009_v47 = vmul.f32 %v3853_v41, %v1737_v9 }
 0x102   : > { %v3175_v8 = vpop.f32.mrf.mxu0  ;;  %4905 = vst [vmem:[#allocation17_spill] sm:$0xff] %v4034_v19 }
 0x103   : > { %1349 = vst.msk [vmem:[#allocation3 + $0x141] sm:$0xff] %vm744_vm0, %v1225_v58  ;;  %v1223_v15 = vmax.f32 %v1145_v59, 0.0  ;;  %v1156_v16 = vadd.f32 %v3175_v8, %v3808_v50  ;;  %v4012_v58 = vmul.f32 %v3878_v63, %v1786_v10  ;;  %v1843_v8 = vld [vmem:[#allocation3 + $0x210] sm:$0xff]  ;;  %v1799_v10 = vmul.f32 %v3878_v63, %v4014_v60 }
 0x104   : > { %v1147_v28 = vpop.f32.mrf.mxu0  ;;  %v4047_v33 = vmul.f32 %v3927_v32, %v1843_v8  ;;  %v1842_v8 = vld [vmem:[#allocation3 + $0x200] sm:$0xff] }
 0x105   : > { %1347 = vst.msk [vmem:[#allocation3 + $0x121] sm:$0xff] %vm744_vm0, %v1223_v15  ;;  %v1226_v44 = vmax.f32 %v1156_v16, 0.0  ;;  %v1148_v45 = vadd.f32 %v3808_v50, %v1147_v28  ;;  %v4020_v15 = vmul.f32 %v3900_v13, %v1737_v9  ;;  %v4023_v16 = vmul.f32 %v3900_v13, %v1900_v20 }
 0x106   : > { %v3178_v59 = vpop.f32.mrf.mxu0  ;;  %v4026_v28 = vmul.f32 %v3907_v18, %v1783_v43  ;;  %v1766_v9 = vmul.f32 %v3863_v48, %v1754_v30  ;;  %v1750_v43 = vmul.f32 %v3853_v41, %v4006_v46  ;;  %v4049_v41 = vld [vmem:[#allocation3 + $0x100] sm:$0xff] }
 0x107   : > { %4904 = vst [vmem:[#allocation16_spill] sm:$0xff] %v4023_v16  ;;  %1350 = vst.msk [vmem:[#allocation3 + $0x151] sm:$0xff] %vm744_vm0, %v1226_v44  ;;  %v1224_v1 = vmax.f32 %v1148_v45, 0.0  ;;  %v1169_v7 = vadd.f32 %v3178_v59, %v3808_v50  ;;  %v1775_v44 = vadd.f32 %v1767_v26, %v1746_v2  ;;  %v1776_v45 = vadd.f32 %v1768_v21, %v3930_v34  ;;  %v1757_v59 = vld [vmem:[#allocation3 + $0xd0] sm:$0xff]  ;;  %v4066_v26 = vld [vmem:[#allocation3 + $0xe0] sm:$0xff] }
 0x108   : > { %v1160_v20 = vpop.f32.mrf.mxu0  ;;  %v4039_v4 = vld [vmem:[#allocation3 + $0xf0] sm:$0xff]  ;;  %v4052_v2 = vmul.f32 %v3927_v32, %v1841_v61  ;;  %v4055_v34 = vmul.f32 %v3927_v32, %v1844_v6  ;;  %v1769_v60 = vmul.f32 %v3863_v48, %v1757_v59  ;;  %v1772_v52 = vmul.f32 %v3863_v48, %v4049_v41 }
 0x109   : > { %4906 = vst [vmem:[#allocation18_spill] sm:$0xff] %v4039_v4  ;;  %1348 = vst.msk [vmem:[#allocation3 + $0x131] sm:$0xff] %vm744_vm0, %v1224_v1  ;;  %v1229_v42 = vmax.f32 %v1169_v7, 0.0  ;;  %v1161_v27 = vadd.f32 %v3808_v50, %v1160_v20  ;;  %v4058_v1 = vmul.f32 %v3919_v24, %v1754_v30  ;;  %v4062_v7 = vmul.f32 %v3919_v24, %v3963_v56 }
 0x10a   : > { %v1811_v25 = vld [vmem:[#allocation3 + $0x140] sm:$0xff]  ;;  %v3179_v19 = vpop.f32.mrf.mxu0  ;;  %v1771_v61 = vmul.f32 %v3863_v48, %v4039_v4  ;;  %v1774_v30 = vadd.f32 %v1766_v9, %v3942_v39  ;;  %v1803_v56 = vadd.f32 %v3977_v3, %v1775_v44  ;;  %v1770_v39 = vmul.f32 %v3863_v48, %v4066_v26 }
 0x10b   : > { %1353 = vst.msk [vmem:[#allocation3 + $0x181] sm:$0xff] %vm744_vm0, %v1229_v42  ;;  %v1227_v63 = vmax.f32 %v1161_v27, 0.0  ;;  %v1172_v21 = vadd.f32 %v3179_v19, %v3808_v50  ;;  %v1823_v6 = vmul.f32 %v3911_v22, %v1811_v25  ;;  %v1804_v42 = vadd.f32 %v3933_v36, %v1776_v45  ;;  %v1867_v4 = vld [vmem:[#allocation3 + $0x141] sm:$0xff] }
 0x10c   : > { %v1163_v20 = vpop.f32.mrf.mxu0  ;;  %v1809_v27 = vld [vmem:[#allocation3 + $0x120] sm:$0xff]  ;;  %v4083_v3 = vmul.f32 %v3927_v32, %v1842_v8  ;;  %v1936_v36 = vmul.f32 %v3919_v24, %v1757_v59  ;;  %v1802_v48 = vadd.f32 %v3945_v40, %v1774_v30  ;;  %v1879_v32 = vmul.f32 %v3915_v23, %v1867_v4 }
 0x10d   : > { %1351 = vst.msk [vmem:[#allocation3 + $0x161] sm:$0xff] %vm744_vm0, %v1227_v63  ;;  %v1230_v19 = vmax.f32 %v1172_v21, 0.0  ;;  %v1164_v18 = vadd.f32 %v3808_v50, %v1163_v20  ;;  %v1821_v25 = vmul.f32 %v3911_v22, %v1809_v27  ;;  %v1831_v16 = vadd.f32 %v1823_v6, %v1803_v56  ;;  %v1865_v21 = vld [vmem:[#allocation3 + $0x121] sm:$0xff] }
 0x10e   : > { %v1812_v9 = vld [vmem:[#allocation3 + $0x150] sm:$0xff]  ;;  %v1779_v50 = vadd.f32 %v1771_v61, %v1750_v43  ;;  %v1777_v27 = vadd.f32 %v1769_v60, %v3950_v51  ;;  %v1778_v8 = vadd.f32 %v1770_v39, %v4009_v47  ;;  %v1877_v51 = vmul.f32 %v3915_v23, %v1865_v21 }
 0x10f   : > { %1354 = vst.msk [vmem:[#allocation3 + $0x191] sm:$0xff] %vm744_vm0, %v1230_v19  ;;  %v1228_v44 = vmax.f32 %v1164_v18, 0.0  ;;  %v1824_v45 = vmul.f32 %v3911_v22, %v1812_v9  ;;  %v1829_v63 = vadd.f32 %v1821_v25, %v3923_v31  ;;  %v1859_v6 = vadd.f32 %v3980_v11, %v1831_v16  ;;  %v1868_v31 = vld [vmem:[#allocation3 + $0x151] sm:$0xff] }
 0x110   : > { %v1810_v20 = vld [vmem:[#allocation3 + $0x130] sm:$0xff]  ;;  %v1780_v18 = vadd.f32 %v1772_v52, %v3988_v17  ;;  %v1934_v11 = vmul.f32 %v3919_v24, %v3965_v57  ;;  %v1807_v4 = vadd.f32 %v1799_v10, %v1779_v50  ;;  %v1805_v17 = vadd.f32 %v3955_v53, %v1777_v27 }
 0x111   : > { %v1822_v59 = vmul.f32 %v3911_v22, %v1810_v20  ;;  %1352 = vst.msk [vmem:[#allocation3 + $0x171] sm:$0xff] %vm744_vm0, %v1228_v44  ;;  %v1832_v43 = vadd.f32 %v1824_v45, %v1804_v42  ;;  %v1857_v61 = vadd.f32 %v3999_v29, %v1829_v63  ;;  %v1887_v40 = vadd.f32 %v1879_v32, %v1859_v6  ;;  %v1866_v52 = vld [vmem:[#allocation3 + $0x131] sm:$0xff] }
 0x112   : > { %v1815_v56 = vld [vmem:[#allocation3 + $0x180] sm:$0xff]  ;;  %v1880_v47 = vmul.f32 %v3915_v23, %v1868_v31  ;;  %v1808_v39 = vadd.f32 %v3992_v14, %v1780_v18  ;;  %v1806_v44 = vadd.f32 %v4012_v58, %v1778_v8  ;;  %v1878_v53 = vmul.f32 %v3915_v23, %v1866_v52 }
 0x113   : > { %v1827_v60 = vmul.f32 %v3911_v22, %v1815_v56  ;;  %v1830_v16 = vadd.f32 %v1822_v59, %v1802_v48  ;;  %v1860_v30 = vadd.f32 %v4017_v49, %v1832_v43  ;;  %v1871_v42 = vld [vmem:[#allocation3 + $0x181] sm:$0xff]  ;;  %v1885_v19 = vadd.f32 %v1877_v51, %v1857_v61 }
 0x114   : > { %v1813_v29 = vld [vmem:[#allocation3 + $0x160] sm:$0xff]  ;;  %v1915_v25 = vadd.f32 %v3936_v37, %v1887_v40  ;;  %v1883_v14 = vmul.f32 %v3915_v23, %v1871_v42 }
 0x115   : > { %v1825_v57 = vmul.f32 %v3911_v22, %v1813_v29  ;;  %v1835_v10 = vadd.f32 %v1827_v60, %v1807_v4  ;;  %v1858_v9 = vadd.f32 %v4031_v5, %v1830_v16  ;;  %v1869_v50 = vld [vmem:[#allocation3 + $0x161] sm:$0xff]  ;;  %v1888_v45 = vadd.f32 %v1880_v47, %v1860_v30  ;;  %v1928_v16 = vld [vmem:[#allocation3 + $0x110] sm:$0xff]  ;;  %v4907_v30 = vld [vmem:[#allocation16_spill] sm:$0xff] }
 0x116   : > { %v1816_v49 = vld [vmem:[#allocation3 + $0x190] sm:$0xff]  ;;  %v1913_v63 = vadd.f32 %v3958_v54, %v1885_v19  ;;  %v1943_v32 = vadd.f32 %v4062_v7, %v1915_v25  ;;  %v1881_v43 = vmul.f32 %v3915_v23, %v1869_v50  ;;  %v1956_v19 = vld [vmem:[#allocation3 + $0x81] sm:$0xff] }
 0x117   : > { %v1828_v21 = vmul.f32 %v3911_v22, %v1816_v49  ;;  %v1833_v20 = vadd.f32 %v1825_v57, %v1805_v17  ;;  %v1863_v37 = vadd.f32 %v4047_v33, %v1835_v10  ;;  %v1872_v48 = vld [vmem:[#allocation3 + $0x191] sm:$0xff]  ;;  %v1886_v6 = vadd.f32 %v1878_v53, %v1858_v9  ;;  %v4909_v25 = vld [vmem:[#allocation14_spill] sm:$0xff]  ;;  %v4911_v10 = vld [vmem:[#allocation17_spill] sm:$0xff] }
 0x118   : > { %v1814_v27 = vld [vmem:[#allocation3 + $0x170] sm:$0xff]  ;;  %v1916_v5 = vadd.f32 %v3970_v62, %v1888_v45  ;;  %v1941_v58 = vadd.f32 %v4058_v1, %v1913_v63  ;;  %v1884_v1 = vmul.f32 %v3915_v23, %v1872_v48  ;;  %v1971_v4 = vadd.f32 %v3939_v38, %v1943_v32 }
 0x119   : > { %v1826_v59 = vmul.f32 %v3911_v22, %v1814_v27  ;;  %v1836_v18 = vadd.f32 %v1828_v21, %v1808_v39  ;;  %v1861_v54 = vadd.f32 %v4052_v2, %v1833_v20  ;;  %v1870_v61 = vld [vmem:[#allocation3 + $0x171] sm:$0xff]  ;;  %v1891_v33 = vadd.f32 %v1883_v14, %v1863_v37  ;;  %v4910_v39 = vld [vmem:[#allocation13_spill] sm:$0xff] }
 0x11a   : > { %v1914_v31 = vadd.f32 %v3983_v12, %v1886_v6  ;;  %v1944_v8 = vadd.f32 %v1936_v36, %v1916_v5  ;;  %v1969_v56 = vadd.f32 %v3961_v55, %v1941_v58  ;;  %v1937_v2 = vmul.f32 %v3919_v24, %v4066_v26  ;;  %v4912_v53 = vld [vmem:[#allocation15_spill] sm:$0xff] }
 0x11b   : > { %v1834_v51 = vadd.f32 %v1826_v59, %v1806_v44  ;;  %v1864_v62 = vadd.f32 %v4055_v34, %v1836_v18  ;;  %v1889_v7 = vadd.f32 %v1881_v43, %v1861_v54  ;;  %v1919_v22 = vadd.f32 %v4002_v35, %v1891_v33  ;;  %v3099_v34 = vld [vmem:[%s4840_s8] ss:$0 sm:$0xff] }
 0x11c   : > { %v1942_v40 = vadd.f32 %v1934_v11, %v1914_v31  ;;  %v1882_v12 = vmul.f32 %v3915_v23, %v1870_v61  ;;  %v1939_v35 = vmul.f32 %v3919_v24, %v4049_v41  ;;  %v1972_v11 = vadd.f32 %v3973_v0, %v1944_v8 }
 0x11d   : > { %v1862_v60 = vadd.f32 %v4083_v3, %v1834_v51  ;;  %v1892_v36 = vadd.f32 %v1884_v1, %v1864_v62  ;;  %v1917_v55 = vadd.f32 %v4020_v15, %v1889_v7  ;;  %v4139_v38 = vadd.f32 %v3099_v34, %v1969_v56 }
 0x11e   : > { %v1970_v26 = vadd.f32 %v4026_v28, %v1942_v40  ;;  %v1910_v23 = vmul.f32 %v3900_v13, %v4006_v46  ;;  %v1940_v17 = vmul.f32 %v3919_v24, %v1928_v16  ;;  %v1947_v29 = vadd.f32 %v1939_v35, %v1919_v22  ;;  %v4908_v28 = vld [vmem:[#allocation18_spill] sm:$0xff]  ;;  %v2015_v40 = vld [vmem:[%s4841_s9] sm:$0xf] }
 0x11f   : > { %v1890_v3 = vadd.f32 %v1882_v12, %v1862_v60  ;;  %v1920_v15 = vadd.f32 %v4907_v30, %v1892_v36  ;;  %v1945_v52 = vadd.f32 %v1937_v2, %v1917_v55  ;;  %v4147_v47 = vadd.f32 %v3099_v34, %v1971_v4  ;;  %v4190_v55 = vld [vmem:[%s4913_s29] sm:$0xff]  ;;  %v4915_v35 = vld [vmem:[#allocation6_spill] sm:$0xff] }
 0x120   : > { %v4145_v42 = vadd.f32 %v3099_v34, %v1970_v26  ;;  %v1938_v0 = vmul.f32 %v3919_v24, %v4908_v28  ;;  %v1967_v57 = vmul.f32 %v4910_v39, %v4909_v25  ;;  %v4154_v9 = vadd.f32 %v3099_v34, %v1972_v11  ;;  %v4914_v16 = vld [vmem:[#allocation5_spill] sm:$0xff] }
 0x121   : > { %v1918_v41 = vadd.f32 %v1910_v23, %v1890_v3  ;;  %v1973_v13 = vadd.f32 %v4911_v10, %v1945_v52  ;;  %v1948_v46 = vadd.f32 %v1940_v17, %v1920_v15  ;;  %v1992_v44 = vsel %vm744_vm0, %v4139_v38, 0.0  ;;  %v1366_v11 = vld [vmem:[#allocation2] sm:$0xff]  ;;  %v4200_v3 = vld [vmem:[#allocation2 + $0x10] sm:$0xff] }
 0x122   : > { %v1993_v49 = vsel %vm744_vm0, %v4145_v42, 0.0  ;;  %v1966_v45 = vmul.f32 %v4910_v39, %v4912_v53  ;;  %v1968_v63 = vmul.f32 %v4910_v39, %v1956_v19  ;;  %v1975_v21 = vadd.f32 %v1967_v57, %v1947_v29  ;;  %v1387_v23 = vld [vmem:[#allocation2 + $0x90] sm:$0xff]  ;;  %v4205_v52 = vld [vmem:[#allocation2 + $0xa0] sm:$0xff] }
 0x123   : > { %v1946_v50 = vadd.f32 %v1938_v0, %v1918_v41  ;;  %v1994_v24 = vadd.f32 %v1993_v49, %v1992_v44  ;;  %v4163_v20 = vadd.f32 %v3099_v34, %v1973_v13  ;;  %v1995_v37 = vsel %vm744_vm0, %v4147_v47, 0.0  ;;  %v4916_v29 = vld [vmem:[#allocation7_spill] sm:$0xff]  ;;  %v1528_v28 = vld [vmem:[#allocation2 + $0x20] sm:$0xff] }
 0x124   : > { %v1976_v48 = vadd.f32 %v1968_v63, %v1948_v46  ;;  %v1997_v6 = vsel %vm744_vm0, %v4154_v9, 0.0  ;;  %v4171_v32 = vadd.f32 %v3099_v34, %v1975_v21  ;;  %v3253_v36 = vmov 0   ;;  %v4212_v0 = vld [vmem:[#allocation2 + $0xb0] sm:$0xff]  ;;  %v1415_v25 = vld [vmem:[#allocation2 + $0x1] sm:$0xff] }
 0x125   : > { %v1974_v14 = vadd.f32 %v1966_v45, %v1946_v50  ;;  %v1996_v27 = vadd.f32 %v1995_v37, %v1994_v24  ;;  %v1999_v59 = vsel %vm744_vm0, %v4163_v20, 0.0  ;;  %3220 = vset.pattern.permute.xlu0 %v3253_v36  ;;  %v4198_v26 = vrot.slane %v4190_v55, %v4915_v35  ;;  %v4216_v39 = vld [vmem:[#allocation2 + $0x11] sm:$0xff]  ;;  %v4917_v50 = vld [vmem:[#allocation9_spill] sm:$0xff] }
 0x126   : > { %v4177_v43 = vadd.f32 %v3099_v34, %v1976_v48  ;;  %v2003_v33 = vsel %vm744_vm0, %v4171_v32, 0.0  ;;  %v4210_v41 = vrot.slane %v4190_v55, %v4916_v29  ;;  %v4218_v57 = vld [vmem:[#allocation2 + $0x30] sm:$0xff]  ;;  %v4228_v53 = vrot.slane %v4190_v55, %v4917_v50  ;;  %v4230_v45 = vld [vmem:[#allocation2 + $0x21] sm:$0xff] }
 0x127   : > { %v4169_v5 = vadd.f32 %v3099_v34, %v1974_v14  ;;  %v1998_v58 = vadd.f32 %v1997_v6, %v1996_v27  ;;  %v4194_v34 = vrot.slane %v4190_v55, %v4914_v16  ;;  %v1399_v17 = vmul.f32 %v4198_v26, %v1387_v23  ;;  %v4232_v24 = vld [vmem:[#allocation2 + $0xc0] sm:$0xff]  ;;  %v4234_v63 = vld [vmem:[#allocation2 + $0x31] sm:$0xff] }
 0x128   : > { %v2005_v8 = vsel %vm744_vm0, %v4177_v43, 0.0  ;;  %v1400_v19 = vmul.f32 %v4198_v26, %v4205_v52  ;;  %v1401_v13 = vmul.f32 %v4212_v0, %v4198_v26  ;;  %v1427_v44 = vmul.f32 %v4210_v41, %v1415_v25  ;;  %v1443_v37 = vld [vmem:[#allocation2 + $0x120] sm:$0xff]  ;;  %v1444_v14 = vld [vmem:[#allocation2 + $0x130] sm:$0xff] }
 0x129   : > { %v2000_v18 = vadd.f32 %v1999_v59, %v1998_v58  ;;  %v2001_v54 = vsel %vm744_vm0, %v4169_v5, 0.0  ;;  %v1378_v30 = vmul.f32 %v4194_v34, %v1366_v11  ;;  %v1379_v15 = vmul.f32 %v4194_v34, %v4200_v3  ;;  %v1499_v11 = vld [vmem:[#allocation2 + $0x121] sm:$0xff]  ;;  %v1500_v23 = vld [vmem:[#allocation2 + $0x131] sm:$0xff] }
 0x12a   : > { %v1380_v10 = vmul.f32 %v1528_v28, %v4194_v34  ;;  %v1428_v49 = vmul.f32 %v4210_v41, %v4216_v39  ;;  %v1381_v27 = vmul.f32 %v4194_v34, %v4218_v57  ;;  %v1402_v48 = vmul.f32 %v4198_v26, %v4232_v24 }
 0x12b   : > { %v2002_v61 = vadd.f32 %v2001_v54, %v2000_v18  ;;  %v1407_v46 = vadd.f32 %v1399_v17, %v1378_v30  ;;  %v1408_v21 = vadd.f32 %v1400_v19, %v1379_v15  ;;  %v1455_v59 = vmul.f32 %v4228_v53, %v1443_v37  ;;  %v4918_v54 = vld [vmem:[#allocation10_spill] sm:$0xff]  ;;  %v2021_v19 = vld [vmem:[%s4842_s10] sm:$0xf] }
 0x12c   : > { %v1409_v6 = vadd.f32 %v1401_v13, %v1380_v10  ;;  %v1456_v18 = vmul.f32 %v4228_v53, %v1444_v14 }
 0x12d   : > { %v2004_v31 = vadd.f32 %v2003_v33, %v2002_v61  ;;  %v1435_v58 = vadd.f32 %v1427_v44, %v1407_v46  ;;  %v4244_v61 = vrot.slane %v4190_v55, %v4918_v54  ;;  %v1445_v33 = vld [vmem:[#allocation2 + $0x140] sm:$0xff]  ;;  %v4920_v46 = vld [vmem:[#allocation8_spill] sm:$0xff] }
 0x12e   : > { %v1457_v17 = vmul.f32 %v4228_v53, %v1445_v33  ;;  %v4264_v44 = vrot.slane %v4190_v55, %v4920_v46 }
 0x12f   : > { %v2006_v56 = vadd.f32 %v2005_v8, %v2004_v31  ;;  %v1436_v31 = vadd.f32 %v1428_v49, %v1408_v21  ;;  %v1471_v8 = vld [vmem:[#allocation2 + $0x1b0] sm:$0xff]  ;;  %v1474_v49 = vld [vmem:[#allocation2 + $0x1e0] sm:$0xff] }
 0x131   : > { %v2007_v51 = vrot.slane %v2006_v56, 4  ;;  %v1464_v36 = vadd.f32 %v1456_v18, %v1436_v31  ;;  %v4921_v18 = vld [vmem:[#allocation12_spill] sm:$0xff]  ;;  %v1501_v31 = vld [vmem:[#allocation2 + $0x141] sm:$0xff] }
 0x132   : > { %v4273_v33 = vrot.slane %v4190_v55, %v4921_v18 }
 0x133   : > { %v2008_v62 = vadd.f32 %v2007_v51, %v2006_v56  ;;  %v1472_v56 = vld [vmem:[#allocation2 + $0x1c0] sm:$0xff]  ;;  %v1410_v51 = vadd.f32 %v1402_v48, %v1381_v27 }
 0x135   : > { %v2009_v1 = vrot.slane %v2008_v62, 2 }
 0x137   : > { %v2010_v7 = vadd.f32 %v2009_v1, %v2008_v62  ;;  %v1429_v62 = vmul.f32 %v4230_v45, %v4210_v41  ;;  %v1430_v1 = vmul.f32 %v4210_v41, %v4234_v63 }
 0x139   : > { %v2011_v22 = vrot.slane %v2010_v7, 1  ;;  %v1437_v30 = vadd.f32 %v1429_v62, %v1409_v6  ;;  %v1438_v15 = vadd.f32 %v1430_v1, %v1410_v51  ;;  %v1486_v62 = vmul.f32 %v4244_v61, %v1474_v49  ;;  %v1502_v1 = vld [vmem:[#allocation2 + $0x151] sm:$0xff] }
 0x13b   : > { %v2012_v2 = vadd.f32 %v2011_v22, %v2010_v7  ;;  %v1463_v7 = vadd.f32 %v1455_v59, %v1435_v58  ;;  %v1483_v22 = vmul.f32 %v4244_v61, %v1471_v8  ;;  %v1465_v14 = vadd.f32 %v1457_v17, %v1437_v30  ;;  %v1530_v30 = vld [vmem:[#allocation2 + $0x40] sm:$0xff] }
 0x13c   : > { %v1539_v58 = vmul.f32 %v4264_v44, %v4200_v3  ;;  %v1540_v59 = vmul.f32 %v4264_v44, %v1528_v28  ;;  %v1568_v3 = vmul.f32 %v4273_v33, %v4212_v0 }
 0x13d   : > { %v2014_v4 = vmul.f32 0.015625, %v2012_v2  ;;  %v1484_v2 = vmul.f32 %v4244_v61, %v1472_v56  ;;  %v1491_v25 = vadd.f32 %v1483_v22, %v1463_v7  ;;  %v1567_v22 = vmul.f32 %v4273_v33, %v4205_v52 }
 0x13f   : > { %v2016_v60 = vmul.f32 %v2015_v40, %v2014_v4  ;;  %v4919_v40 = vld [vmem:[#allocation11_spill] sm:$0xff]  ;;  %v1492_v21 = vadd.f32 %v1484_v2, %v1464_v36 }
 0x140   : > { %v4254_v4 = vrot.slane %v4190_v55, %v4919_v40  ;;  %v4283_v55 = vld [vmem:[%s4913_s29 + $0x8] ss:$0 sm:$0xff] }
 0x141   : > { %v2018_v12 = vsel %vm2017_vm2, %v2016_v60, 0.0  ;;  %v1446_v60 = vld [vmem:[#allocation2 + $0x150] sm:$0xff]  ;;  %v1596_v52 = vmul.f32 %v4283_v55, %v4230_v45 }
 0x142   : > { %2019 = vadd.xlane.f32.xlu0 %v2018_v12  ;;  %v1473_v12 = vld [vmem:[#allocation2 + $0x1d0] sm:$0xff]  ;;  %v1511_v10 = vmul.f32 %v4254_v4, %v1499_v11  ;;  %v1512_v13 = vmul.f32 %v4254_v4, %v1500_v23  ;;  %v1458_v37 = vmul.f32 %v4228_v53, %v1446_v60  ;;  %v1513_v36 = vmul.f32 %v4254_v4, %v1501_v31  ;;  %v1447_v31 = vld [vmem:[#allocation2 + $0x160] sm:$0xff] }
 0x143   : > { %v1485_v27 = vmul.f32 %v4244_v61, %v1473_v12  ;;  %v1595_v23 = vmul.f32 %v4283_v55, %v4216_v39  ;;  %v1514_v0 = vmul.f32 %v4254_v4, %v1502_v1  ;;  %v1569_v39 = vmul.f32 %v4273_v33, %v4232_v24 }
 0x144   : > { %v1519_v6 = vadd.f32 %v1511_v10, %v1491_v25  ;;  %v1520_v56 = vadd.f32 %v1512_v13, %v1492_v21  ;;  %v1466_v51 = vadd.f32 %v1458_v37, %v1438_v15  ;;  %v1542_v25 = vmul.f32 %v4264_v44, %v1530_v30  ;;  %v1558_v10 = vld [vmem:[#allocation2 + $0xd0] sm:$0xff]  ;;  %v1586_v37 = vld [vmem:[#allocation2 + $0x41] sm:$0xff] }
 0x145   : > { %v1493_v2 = vadd.f32 %v1485_v27, %v1465_v14  ;;  %v1371_v13 = vld [vmem:[#allocation2 + $0x50] sm:$0xff]  ;;  %v1570_v45 = vmul.f32 %v4273_v33, %v1558_v10  ;;  %v1392_v14 = vld [vmem:[#allocation2 + $0xe0] sm:$0xff]  ;;  %v1597_v24 = vmul.f32 %v4283_v55, %v4234_v63 }
 0x146   : > { %v1547_v7 = vadd.f32 %v1539_v58, %v1519_v6  ;;  %v1548_v60 = vadd.f32 %v1540_v59, %v1520_v56  ;;  %v1494_v12 = vadd.f32 %v1486_v62, %v1466_v51  ;;  %v4297_v27 = vld [vmem:[#allocation2 + $0x51] sm:$0xff]  ;;  %v4305_v6 = vld [vmem:[%s4923_s28] ss:$0 sm:$0xff]  ;;  %v1598_v59 = vmul.f32 %v4283_v55, %v1586_v37 }
 0x147   : > { %v1521_v17 = vadd.f32 %v1513_v36, %v1493_v2  ;;  %v1382_v51 = vmul.f32 %v1530_v30, %v4194_v34  ;;  %v1383_v62 = vmul.f32 %v4194_v34, %v1371_v13  ;;  %v1448_v2 = vld [vmem:[#allocation2 + $0x170] sm:$0xff]  ;;  %v1459_v36 = vmul.f32 %v4228_v53, %v1447_v31 }
 0x148   : > { %v1575_v11 = vadd.f32 %v1567_v22, %v1547_v7  ;;  %v1576_v15 = vadd.f32 %v1568_v3, %v1548_v60  ;;  %v1522_v21 = vadd.f32 %v1514_v0, %v1494_v12  ;;  %v1403_v22 = vmul.f32 %v1558_v10, %v4198_v26  ;;  %v1475_v63 = vld [vmem:[#allocation2 + $0x1f0] sm:$0xff] }
 0x149   : > { %v1404_v3 = vmul.f32 %v4198_v26, %v1392_v14  ;;  %v1431_v60 = vmul.f32 %v1586_v37, %v4210_v41  ;;  %v1432_v12 = vmul.f32 %v4210_v41, %v4297_v27  ;;  %v1504_v10 = vld [vmem:[#allocation2 + $0x171] sm:$0xff]  ;;  %v1532_v37 = vld [vmem:[#allocation2 + $0x60] sm:$0xff] }
 0x14a   : > { %v1603_v49 = vadd.f32 %v1595_v23, %v1575_v11  ;;  %v1550_v56 = vadd.f32 %v1542_v25, %v1522_v21  ;;  %v1476_v11 = vld [vmem:[#allocation2 + $0x200] sm:$0xff]  ;;  %v1411_v0 = vadd.f32 %v1403_v22, %v1382_v51  ;;  %v1487_v25 = vmul.f32 %v4244_v61, %v1475_v63 }
 0x14b   : > { %v1412_v30 = vadd.f32 %v1404_v3, %v1383_v62  ;;  %v1588_v51 = vld [vmem:[#allocation2 + $0x61] sm:$0xff]  ;;  %v1544_v22 = vmul.f32 %v4264_v44, %v1532_v37  ;;  %v1571_v3 = vmul.f32 %v4273_v33, %v1392_v14 }
 0x14c   : > { %v1439_v21 = vadd.f32 %v1431_v60, %v1411_v0  ;;  %v1394_v62 = vld [vmem:[#allocation2 + $0x100] sm:$0xff]  ;;  %v1477_v0 = vld [vmem:[#allocation2 + $0x210] sm:$0xff] }
 0x14d   : > { %v1449_v63 = vld [vmem:[#allocation2 + $0x180] sm:$0xff] }
 0x1cb   : > { %v2020_v48 = vpop.xlane.xlu0 %2019 }
 0x1cc   : > { %v2022_v8 = vadd.f32 %v2021_v19, %v2020_v48  ;;  %v1541_v19 = vmul.f32 %v4264_v44, %v4218_v57  ;;  %v3222_v48 = vld [vmem:[%s4922_s6] sm:$0xff]   ;;  %v1604_v57 = vadd.f32 %v1596_v52, %v1576_v15 }
 0x1cd   : > { %3188 = vmatprep.subr.bf16.mxu1 %v3222_v48  ;;  %v1503_v15 = vld [vmem:[#allocation2 + $0x161] sm:$0xff] }
 0x1ce   : > { %v2023_v28 = vmax.f32 %v2022_v8, 0.0  ;;  %v1549_v58 = vadd.f32 %v1541_v19, %v1521_v17  ;;  %v1618_v8 = vadd.f32 %v4305_v6, %v1603_v49  ;;  %v1619_v1 = vadd.f32 %v4305_v6, %v1604_v57  ;;  %3189 = vmatpush3.bf16.msra.mxu1 %v3222_v48 }
 0x1cf   : > { %v1460_v19 = vmul.f32 %v4228_v53, %v1448_v2  ;;  %v1515_v57 = vmul.f32 %v4254_v4, %v1503_v15  ;;  %v1384_v2 = vmul.f32 %v1532_v37, %v4194_v34 }
 0x1d0   : > { %2027 = vperm.xlu0 %3220, %v2023_v28   ;;  %v1577_v7 = vadd.f32 %v1569_v39, %v1549_v58  ;;  %v1578_v28 = vadd.f32 %v1570_v45, %v1550_v56  ;;  %v1626_v23 = vpack.c.bf16 %v1619_v1, %v1618_v8  ;;  %v1440_v39 = vadd.f32 %v1432_v12, %v1412_v30  ;;  %v1560_v58 = vld [vmem:[#allocation2 + $0xf0] sm:$0xff] }
 0x1d1   : > { %v1488_v45 = vmul.f32 %v4244_v61, %v1476_v11  ;;  %v1516_v8 = vmul.f32 %v4254_v4, %v1504_v10  ;;  %v1543_v56 = vmul.f32 %v4264_v44, %v1371_v13  ;;  %v1422_v1 = vld [vmem:[#allocation2 + $0x71] sm:$0xff]  ;;  %v1572_v13 = vmul.f32 %v4273_v33, %v1560_v58 }
 0x1d2   : > { %v1605_v52 = vadd.f32 %v1597_v24, %v1577_v7  ;;  %v1606_v17 = vadd.f32 %v1598_v59, %v1578_v28  ;;  %3190 = vmatprep.mubr.msk.bf16.mxu1 %vm744_vm0, %v1626_v23  ;;  %v1373_v24 = vld [vmem:[#allocation2 + $0x70] sm:$0xff]  ;;  %v1467_v59 = vadd.f32 %v1459_v36, %v1439_v21  ;;  %v1468_v31 = vadd.f32 %v1460_v19, %v1440_v39 }
 0x1d3   : > { %v1385_v12 = vmul.f32 %v4194_v34, %v1373_v24  ;;  %v1405_v36 = vmul.f32 %v1560_v58, %v4198_v26  ;;  %v1450_v11 = vld [vmem:[#allocation2 + $0x190] sm:$0xff]  ;;  %v1406_v23 = vmul.f32 %v4198_v26, %v1394_v62  ;;  %v1434_v14 = vmul.f32 %v4210_v41, %v1422_v1  ;;  %v1478_v34 = vld [vmem:[#allocation2 + $0x220] sm:$0xff] }
 0x1d4   : > { %v1620_v49 = vadd.f32 %v4305_v6, %v1605_v52  ;;  %v1621_v48 = vadd.f32 %v4305_v6, %v1606_v17  ;;  %v1495_v28 = vadd.f32 %v1487_v25, %v1467_v59  ;;  %v1496_v60 = vadd.f32 %v1488_v45, %v1468_v31  ;;  %v1505_v26 = vld [vmem:[#allocation2 + $0x181] sm:$0xff] }
 0x1d5   : > { %v1433_v52 = vmul.f32 %v1588_v51, %v4210_v41  ;;  %v1413_v17 = vadd.f32 %v1405_v36, %v1384_v2  ;;  %v1461_v19 = vmul.f32 %v4228_v53, %v1449_v63  ;;  %v1599_v25 = vmul.f32 %v4283_v55, %v4297_v27 }
 0x1d6   : > { %v1627_v7 = vpack.c.bf16 %v1621_v48, %v1620_v49  ;;  %v1523_v30 = vadd.f32 %v1515_v57, %v1495_v28  ;;  %v1524_v15 = vadd.f32 %v1516_v8, %v1496_v60  ;;  %v1600_v10 = vmul.f32 %v4283_v55, %v1588_v51  ;;  %v1506_v48 = vld [vmem:[#allocation2 + $0x191] sm:$0xff] }
 0x1d7   : > { %v1414_v49 = vadd.f32 %v1406_v23, %v1385_v12  ;;  %v1462_v21 = vmul.f32 %v4228_v53, %v1450_v11  ;;  %v1441_v37 = vadd.f32 %v1433_v52, %v1413_v17  ;;  %v1489_v41 = vmul.f32 %v4244_v61, %v1477_v0  ;;  %v1562_v28 = vld [vmem:[#allocation2 + $0x110] sm:$0xff] }
 0x1d8   : > { %3191 = vmatmul.mubr.msk.bf16.vlgmr.msra.gmra.mxu1 %vm744_vm0, %v1627_v7  ;;  %v1551_v39 = vadd.f32 %v1543_v56, %v1523_v30  ;;  %v1552_v45 = vadd.f32 %v1544_v22, %v1524_v15  ;;  %v1490_v58 = vmul.f32 %v4244_v61, %v1478_v34  ;;  %v1517_v27 = vmul.f32 %v4254_v4, %v1505_v26  ;;  %v1534_v7 = vld [vmem:[#allocation2 + $0x80] sm:$0xff] }
 0x1d9   : > { %v1442_v57 = vadd.f32 %v1434_v14, %v1414_v49  ;;  %v1469_v8 = vadd.f32 %v1461_v19, %v1441_v37  ;;  %v1518_v2 = vmul.f32 %v4254_v4, %v1506_v48  ;;  %v1545_v22 = vmul.f32 %v4264_v44, %v1373_v24 }
 0x1da   : > { %v1579_v59 = vadd.f32 %v1571_v3, %v1551_v39  ;;  %v1580_v31 = vadd.f32 %v1572_v13, %v1552_v45  ;;  %v1546_v12 = vmul.f32 %v4264_v44, %v1534_v7  ;;  %v1573_v11 = vmul.f32 %v4273_v33, %v1394_v62  ;;  %v1590_v13 = vld [vmem:[#allocation2 + $0x81] sm:$0xff] }
 0x1db   : > { %v1470_v51 = vadd.f32 %v1462_v21, %v1442_v57  ;;  %v1497_v56 = vadd.f32 %v1489_v41, %v1469_v8  ;;  %v1574_v4 = vmul.f32 %v4273_v33, %v1562_v28  ;;  %v1601_v0 = vmul.f32 %v4283_v55, %v1422_v1  ;;  %v3223_v33 = vld [vmem:[%s4845_s13] sm:$0xff]  }
 0x1dc   : > { %v1607_v53 = vadd.f32 %v1599_v25, %v1579_v59  ;;  %v1608_v63 = vadd.f32 %v1600_v10, %v1580_v31  ;;  %v1602_v30 = vmul.f32 %v4283_v55, %v1590_v13  ;;  %3198 = vmatprep.subr.bf16.mxu1 %v3223_v33  ;;  %v4924_v55 = vmov 0.0   ;;  %v2038_v41 = vld [vmem:[%s4844_s12] sm:$0x1] }
 0x1dd   : > { %v1498_v60 = vadd.f32 %v1490_v58, %v1470_v51  ;;  %v1525_v36 = vadd.f32 %v1517_v27, %v1497_v56  ;;  %3199 = vmatpush3.bf16.msra.mxu1 %v3223_v33  ;;  %2164 = vst.msk [vmem:[#allocation4 + $0x8] sm:$0x3] %vm2163_vm3, %v4924_v55  ;;  %2166 = vst.msk [vmem:[#allocation4 + $0xa8] sm:$0x3] %vm2163_vm3, %v4924_v55 }
 0x1de   : > { %v1622_v61 = vadd.f32 %v4305_v6, %v1607_v53  ;;  %v1623_v3 = vadd.f32 %v4305_v6, %v1608_v63  ;;  %2169 = vst.msk [vmem:[#allocation4 + $0x98] sm:$0x3] %vm2163_vm3, %v4924_v55  ;;  %2171 = vst.msk [vmem:[#allocation4 + $0x138] sm:$0x3] %vm2163_vm3, %v4924_v55 }
 0x1df   : > { %v1526_v23 = vadd.f32 %v1518_v2, %v1498_v60  ;;  %v1553_v14 = vadd.f32 %v1545_v22, %v1525_v36  ;;  %2192 = vst.msk [vmem:[#allocation4 + $0x9] sm:$0x1] %vm746_vm1, %v4924_v55  ;;  %2201 = vst.msk [vmem:[#allocation4 + $0x99] sm:$0x1] %vm746_vm1, %v4924_v55 }
 0x1e0   : > { %v1628_v52 = vpack.c.bf16 %v1623_v3, %v1622_v61  ;;  %2202 = vst.msk [vmem:[#allocation4 + $0xa9] sm:$0x1] %vm746_vm1, %v4924_v55  ;;  %2211 = vst.msk [vmem:[#allocation4 + $0x139] sm:$0x1] %vm746_vm1, %v4924_v55 }
 0x1e1   : > { %v1554_v24 = vadd.f32 %v1546_v12, %v1526_v23  ;;  %v1581_v44 = vadd.f32 %v1573_v11, %v1553_v14  ;;  %v2232_v11 = vld [vmem:[#allocation4] sm:$0xff] }
 0x1e2   : > { %3194 = vmatprep.mubr.msk.bf16.mxu1 %vm744_vm0, %v1628_v52 }
 0x1e3   : > { %v1582_v15 = vadd.f32 %v1574_v4, %v1554_v24  ;;  %v1609_v17 = vadd.f32 %v1601_v0, %v1581_v44 }
 0x1e4   : > { %v2252_v13 = vld [vmem:[#allocation4 + $0x1] sm:$0xff] }
 0x1e5   : > { %v1610_v19 = vadd.f32 %v1602_v30, %v1582_v15  ;;  %v1624_v34 = vadd.f32 %v4305_v6, %v1609_v17 }
 0x1e6   : > { %v2280_v44 = vld [vmem:[#allocation4 + $0x2] sm:$0xff] }
 0x1e7   : > { %v1625_v62 = vadd.f32 %v4305_v6, %v1610_v19  ;;  %v2024_v6 = vld [vmem:[%s4843_s11] sm:$0xf] }
 0x1e9   : > { %v1629_v25 = vpack.c.bf16 %v1625_v62, %v1624_v34 }
 0x1eb   : > { %3195 = vmatmul.mubr.msk.bf16.gmra.mxu1 %vm744_vm0, %v1629_v25 }
 0x24b   : > { %v2028_v1 = vpop.permute.xlu0 %2027 }
 0x24c   : > { %v2030_v10 = vmul.f32 %v2028_v1, %v2024_v6 }
 0x24e   : > { %v2031_v49 = vsel %vm2017_vm2, %v2030_v10, 0.0 }
 0x24f   : > { %v2032_v21 = vrot.slane %v2031_v49, 4 }
 0x251   : > { %v2033_v26 = vadd.f32 %v2032_v21, %v2031_v49 }
 0x253   : > { %v2034_v39 = vrot.slane %v2033_v26, 2 }
 0x255   : > { %v2035_v45 = vadd.f32 %v2034_v39, %v2033_v26 }
 0x257   : > { %v2036_v37 = vrot.slane %v2035_v45, 1 }
 0x259   : > { %v2037_v48 = vadd.f32 %v2036_v37, %v2035_v45 }
 0x25b   : > { %v2039_v57 = vadd.f32 %v2038_v41, %v2037_v48 }
 0x25d   : > { %v3100_v58 = vmul.f32 -1.442695, %v2039_v57 }
 0x25f   : > { %3240 = vpow2.f32 %v3100_v58 }
 0x26c   : > { %v3241_v59 = vpop.eup %3240 }
 0x26d   : > { %v2043_v31 = vadd.f32 1.0, %v3241_v59 }
 0x26f   : > { %3242 = vrcp.f32 %v2043_v31 }
 0x27c   : > { %v3243_v8 = vpop.eup %3242 }
 0x27d   : > { %v2049_v27 = vrot.slane %v3243_v8, %v4914_v16 }
 0x27f   : > { %v2050_v7 = vmul.f32 %v2049_v27, %v4139_v38  ;;  %v2051_v51 = vmul.f32 %v2049_v27, %v4145_v42  ;;  %v2052_v2 = vmul.f32 %v2049_v27, %v4147_v47  ;;  %v2053_v53 = vmul.f32 %v2049_v27, %v4154_v9  ;;  %v2230_v9 = vld [vmem:[%s4847_s15] sm:$0xff] }
 0x280   : > { %v2054_v63 = vmul.f32 %v2049_v27, %v4163_v20  ;;  %v2055_v56 = vmul.f32 %v2049_v27, %v4169_v5  ;;  %v2056_v38 = vmul.f32 %v2049_v27, %v4171_v32  ;;  %v2057_v42 = vmul.f32 %v2049_v27, %v4177_v43  ;;  %v4401_v5 = vld [vmem:[%s4925_s3] ss:$0 sm:$0xff] }
 0x281   : > { %v2058_v22 = vpack.c.bf16 %v2051_v51, %v2050_v7  ;;  %v2059_v28 = vpack.c.bf16 %v2053_v53, %v2052_v2  ;;  %v4405_v61 = vrot.slane %v2230_v9, %v4914_v16  ;;  %v4408_v32 = vrot.slane %v2230_v9, %v4915_v35 }
 0x282   : > { %v2060_v60 = vpack.c.bf16 %v2055_v56, %v2054_v63  ;;  %v2061_v47 = vpack.c.bf16 %v2057_v42, %v2056_v38  ;;  %v4414_v14 = vrot.slane %v2230_v9, %v4916_v29  ;;  %v4424_v33 = vrot.slane %v2230_v9, %v4917_v50 }
 0x283   : > { %3200 = vmatprep.mubr.msk.bf16.mxu1 %vm744_vm0, %v2058_v22  ;;  %v2244_v0 = vmul.f32 %v4405_v61, %v2232_v11  ;;  %v2264_v24 = vmul.f32 %v4408_v32, %v2252_v13  ;;  %v4427_v55 = vrot.slane %v2230_v9, %v4918_v54  ;;  %v4430_v1 = vrot.slane %v2230_v9, %v4919_v40 }
 0x284   : > { %3201 = vmatmul.mubr.msk.bf16.vlgmr.msra.gmra.mxu1 %vm744_vm0, %v2059_v28  ;;  %v2292_v62 = vmul.f32 %v4414_v14, %v2280_v44  ;;  %v4442_v31 = vrot.slane %v2230_v9, %v4920_v46  ;;  %v4445_v27 = vrot.slane %v2230_v9, %v4921_v18 }
 0x285   : > { %3204 = vmatprep.mubr.msk.bf16.mxu1 %vm744_vm0, %v2060_v60  ;;  %v2272_v34 = vadd.f32 %v2264_v24, %v2244_v0 }
 0x287   : > { %v2300_v26 = vadd.f32 %v2292_v62, %v2272_v34 }
 0x28c   : > { %3205 = vmatmul.mubr.msk.bf16.gmra.mxu1 %vm744_vm0, %v2061_v47 }
 0x298   : > { %v3192_v20 = vpop.f32.mrf.mxu1 }
 0x299   : > { %v1700_v12 = vadd.f32 %v3192_v20, %v4401_v5 }
 0x29a   : > { %v1691_v43 = vpop.f32.mrf.mxu1 }
 0x29b   : > { %v1724_v3 = vmax.f32 %v1700_v12, 0.0  ;;  %v1692_v36 = vadd.f32 %v4401_v5, %v1691_v43 }
 0x29c   : > { %v3193_v23 = vpop.f32.mrf.mxu1 }
 0x29d   : > { %2215 = vst.msk [vmem:[#allocation4 + $0x31] sm:$0xff] %vm744_vm0, %v1724_v3  ;;  %v1722_v4 = vmax.f32 %v1692_v36, 0.0  ;;  %v1703_v52 = vadd.f32 %v3193_v23, %v4401_v5  ;;  %v4461_v3 = vld [vmem:[%s4847_s15 + $0x8] ss:$0 sm:$0xff] }
 0x29e   : > { %v1694_v30 = vpop.f32.mrf.mxu1 }
 0x29f   : > { %2213 = vst.msk [vmem:[#allocation4 + $0x11] sm:$0xff] %vm744_vm0, %v1722_v4  ;;  %v1725_v15 = vmax.f32 %v1703_v52, 0.0  ;;  %v1695_v17 = vadd.f32 %v4401_v5, %v1694_v30 }
 0x2a1   : > { %2216 = vst.msk [vmem:[#allocation4 + $0x41] sm:$0xff] %vm744_vm0, %v1725_v15  ;;  %v1723_v19 = vmax.f32 %v1695_v17, 0.0 }
 0x2a3   : > { %2214 = vst.msk [vmem:[#allocation4 + $0x21] sm:$0xff] %vm744_vm0, %v1723_v19 }
 0x2a4   : > { %v2255_v25 = vld [vmem:[#allocation4 + $0x31] sm:$0xff] }
 0x2a5   : > { %v2235_v6 = vld [vmem:[#allocation4 + $0x30] sm:$0xff]  ;;  %v2267_v45 = vmul.f32 %v4408_v32, %v2255_v25  ;;  %v2350_v60 = vmul.f32 %v4427_v55, %v2255_v25  ;;  %v2434_v36 = vmul.f32 %v4445_v27, %v2255_v25 }
 0x2a6   : > { %v2233_v10 = vld [vmem:[#allocation4 + $0x10] sm:$0xff]  ;;  %v2247_v39 = vmul.f32 %v4405_v61, %v2235_v6  ;;  %v2322_v28 = vmul.f32 %v4424_v33, %v2235_v6  ;;  %v2406_v9 = vmul.f32 %v4442_v31, %v2235_v6 }
 0x2a7   : > { %v2253_v49 = vld [vmem:[#allocation4 + $0x11] sm:$0xff]  ;;  %v2245_v37 = vmul.f32 %v4405_v61, %v2233_v10  ;;  %v2320_v58 = vmul.f32 %v4424_v33, %v2233_v10 }
 0x2a8   : > { %v2281_v21 = vld [vmem:[#allocation4 + $0x12] sm:$0xff]  ;;  %v2265_v41 = vmul.f32 %v4408_v32, %v2253_v49  ;;  %v2348_v59 = vmul.f32 %v4427_v55, %v2253_v49  ;;  %v2275_v56 = vadd.f32 %v2267_v45, %v2247_v39  ;;  %v2236_v0 = vld [vmem:[#allocation4 + $0x40] sm:$0xff] }
 0x2a9   : > { %v4436_v48 = vld [vmem:[#allocation4 + $0x32] sm:$0xff]  ;;  %v2293_v57 = vmul.f32 %v4414_v14, %v2281_v21  ;;  %v2328_v7 = vadd.f32 %v2320_v58, %v2300_v26  ;;  %v2376_v51 = vmul.f32 %v4430_v1, %v2281_v21  ;;  %v2256_v24 = vld [vmem:[#allocation4 + $0x41] sm:$0xff]  ;;  %v2323_v17 = vmul.f32 %v4424_v33, %v2236_v0 }
 0x2aa   : > { %v2273_v8 = vadd.f32 %v2265_v41, %v2245_v37  ;;  %v2234_v2 = vld [vmem:[#allocation4 + $0x20] sm:$0xff]  ;;  %v2295_v22 = vmul.f32 %v4414_v14, %v4436_v48  ;;  %v2378_v38 = vmul.f32 %v4430_v1, %v4436_v48  ;;  %v2248_v26 = vmul.f32 %v4405_v61, %v2236_v0 }
 0x2ab   : > { %v2254_v53 = vld [vmem:[#allocation4 + $0x21] sm:$0xff]  ;;  %v2356_v47 = vadd.f32 %v2348_v59, %v2328_v7  ;;  %v2246_v20 = vmul.f32 %v4405_v61, %v2234_v2  ;;  %v2321_v13 = vmul.f32 %v4424_v33, %v2234_v2  ;;  %v3196_v4 = vpop.f32.mrf.mxu1  ;;  %v2405_v44 = vmul.f32 %v4442_v31, %v2234_v2 }
 0x2ac   : > { %v2282_v63 = vld [vmem:[#allocation4 + $0x22] sm:$0xff]  ;;  %v2301_v42 = vadd.f32 %v2293_v57, %v2273_v8  ;;  %v2266_v12 = vmul.f32 %v4408_v32, %v2254_v53  ;;  %v2349_v23 = vmul.f32 %v4427_v55, %v2254_v53  ;;  %v2303_v52 = vadd.f32 %v2295_v22, %v2275_v56  ;;  %v4481_v56 = vld [vmem:[%s4848_s16] ss:$0 sm:$0xff] }
 0x2ad   : > { %v2294_v43 = vmul.f32 %v4414_v14, %v2282_v63  ;;  %v2384_v11 = vadd.f32 %v2376_v51, %v2356_v47  ;;  %v2433_v15 = vmul.f32 %v4445_v27, %v2254_v53  ;;  %v2377_v34 = vmul.f32 %v4430_v1, %v2282_v63  ;;  %v1707_v25 = vpop.f32.mrf.mxu1  ;;  %v2284_v57 = vld [vmem:[#allocation4 + $0x42] sm:$0xff] }
 0x2ae   : > { %v2274_v30 = vadd.f32 %v2266_v12, %v2246_v20  ;;  %v2329_v19 = vadd.f32 %v2321_v13, %v2301_v42  ;;  %v1716_v62 = vadd.f32 %v3196_v4, %v4401_v5  ;;  %v2461_v49 = vmul.f32 %v4461_v3, %v2282_v63 }
 0x2af   : > { %v2413_v10 = vadd.f32 %v2405_v44, %v2384_v11  ;;  %v1708_v21 = vadd.f32 %v4401_v5, %v1707_v25  ;;  %v2268_v39 = vmul.f32 %v4408_v32, %v2256_v24  ;;  %v3197_v41 = vpop.f32.mrf.mxu1  ;;  %v2331_v51 = vadd.f32 %v2323_v17, %v2303_v52  ;;  %v2456_v17 = vld [vmem:[#allocation4 + $0x92] sm:$0xff] }
 0x2b0   : > { %v2302_v6 = vadd.f32 %v2294_v43, %v2274_v30  ;;  %v2357_v45 = vadd.f32 %v2349_v23, %v2329_v19  ;;  %v1728_v37 = vmax.f32 %v1716_v62, 0.0  ;;  %v1719_v7 = vadd.f32 %v3197_v41, %v4401_v5 }
 0x2b1   : > { %v2441_v59 = vadd.f32 %v2433_v15, %v2413_v10  ;;  %v1726_v8 = vmax.f32 %v1708_v21, 0.0  ;;  %v2351_v2 = vmul.f32 %v4427_v55, %v2256_v24  ;;  %v2407_v53 = vmul.f32 %v4442_v31, %v2236_v0  ;;  %v1710_v22 = vpop.f32.mrf.mxu1  ;;  %v2428_v0 = vld [vmem:[#allocation4 + $0x91] sm:$0xff] }
 0x2b2   : > { %v2330_v58 = vadd.f32 %v2322_v28, %v2302_v6  ;;  %v2385_v63 = vadd.f32 %v2377_v34, %v2357_v45  ;;  %2219 = vst.msk [vmem:[#allocation4 + $0x71] sm:$0xff] %vm744_vm0, %v1728_v37  ;;  %v1729_v47 = vmax.f32 %v1719_v7, 0.0  ;;  %v1711_v20 = vadd.f32 %v4401_v5, %v1710_v22 }
 0x2b3   : > { %v2469_v28 = vadd.f32 %v2461_v49, %v2441_v59  ;;  %2217 = vst.msk [vmem:[#allocation4 + $0x51] sm:$0xff] %vm744_vm0, %v1726_v8  ;;  %v2462_v12 = vmul.f32 %v4461_v3, %v4436_v48  ;;  %v2276_v43 = vadd.f32 %v2268_v39, %v2248_v26  ;;  %v2296_v11 = vmul.f32 %v4414_v14, %v2284_v57 }
 0x2b4   : > { %v2358_v42 = vadd.f32 %v2350_v60, %v2330_v58  ;;  %v2414_v13 = vadd.f32 %v2406_v9, %v2385_v63  ;;  %v2435_v23 = vmul.f32 %v4445_v27, %v2256_v24  ;;  %2220 = vst.msk [vmem:[#allocation4 + $0x81] sm:$0xff] %vm744_vm0, %v1729_v47  ;;  %v2400_v60 = vld [vmem:[#allocation4 + $0x90] sm:$0xff]  ;;  %v1727_v30 = vmax.f32 %v1711_v20, 0.0 }
 0x2b5   : > { %v2484_v52 = vadd.f32 %v4481_v56, %v2469_v28  ;;  %v2359_v44 = vadd.f32 %v2351_v2, %v2331_v51  ;;  %v2379_v5 = vmul.f32 %v4430_v1, %v2284_v57  ;;  %v2463_v48 = vmul.f32 %v4461_v3, %v2284_v57 }
 0x2b6   : > { %v2386_v4 = vadd.f32 %v2378_v38, %v2358_v42  ;;  %v2442_v15 = vadd.f32 %v2434_v36, %v2414_v13  ;;  %2218 = vst.msk [vmem:[#allocation4 + $0x61] sm:$0xff] %vm744_vm0, %v1727_v30  ;;  %v4496_v38 = vmul.f32 %v4442_v31, %v2400_v60  ;;  %v4499_v24 = vmul.f32 %v4445_v27, %v2428_v0 }
 0x2b7   : > { %v2492_v34 = vadd.f32 3.0, %v2484_v52  ;;  %v2304_v62 = vadd.f32 %v2296_v11, %v2276_v43  ;;  %v4502_v21 = vmul.f32 %v4461_v3, %v2456_v17  ;;  %v2387_v26 = vadd.f32 %v2379_v5, %v2359_v44  ;;  %v4527_v43 = vld [vmem:[%s4851_s19] ss:$0 sm:$0xff] }
 0x2b8   : > { %v2415_v19 = vadd.f32 %v2407_v53, %v2386_v4  ;;  %v2470_v9 = vadd.f32 %v2462_v12, %v2442_v15  ;;  %v4538_v44 = vld [vmem:[%s4852_s20] ss:$0 sm:$0xff] }
 0x2b9   : > { %v2500_v6 = vmax.f32 %v2492_v34, 0.0  ;;  %v2239_v10 = vld [vmem:[#allocation4 + $0x70] sm:$0xff] }
 0x2ba   : > { %v2443_v25 = vadd.f32 %v2435_v23, %v2415_v19  ;;  %v2259_v49 = vld [vmem:[#allocation4 + $0x71] sm:$0xff]  ;;  %v2485_v39 = vadd.f32 %v4481_v56, %v2470_v9  ;;  %v2251_v45 = vmul.f32 %v4405_v61, %v2239_v10  ;;  %v4509_v59 = vmul.f32 %v4424_v33, %v2239_v10 }
 0x2bb   : > { %v2287_v36 = vld [vmem:[#allocation4 + $0x72] sm:$0xff]  ;;  %v2271_v37 = vmul.f32 %v4408_v32, %v2259_v49  ;;  %v2508_v57 = vmin.f32 %v2500_v6, 6.0  ;;  %v4512_v53 = vmul.f32 %v4427_v55, %v2259_v49  ;;  %v4519_v28 = vmul.f32 %v4442_v31, %v2239_v10  ;;  %v2343_v6 = vld [vmem:[#allocation4 + $0x81] sm:$0xff] }
 0x2bc   : > { %v2471_v41 = vadd.f32 %v2463_v48, %v2443_v25  ;;  %v2299_v58 = vmul.f32 %v4414_v14, %v2287_v36  ;;  %v2237_v8 = vld [vmem:[#allocation4 + $0x50] sm:$0xff]  ;;  %v2493_v51 = vadd.f32 3.0, %v2485_v39  ;;  %v4515_v63 = vmul.f32 %v4430_v1, %v2287_v36  ;;  %v2315_v25 = vld [vmem:[#allocation4 + $0x80] sm:$0xff] }
 0x2bd   : > { %v2257_v7 = vld [vmem:[#allocation4 + $0x51] sm:$0xff]  ;;  %v2279_v2 = vadd.f32 %v2271_v37, %v2251_v45  ;;  %v2516_v42 = vmul.f32 %v2508_v57, %v2484_v52  ;;  %v4522_v47 = vmul.f32 %v4445_v27, %v2259_v49  ;;  %v4530_v11 = vmul.f32 %v4461_v3, %v2287_v36  ;;  %v4547_v37 = vld [vmem:[#allocation4 + $0x82] sm:$0xff] }
 0x2be   : > { %v2486_v22 = vadd.f32 %v4481_v56, %v2471_v41  ;;  %v2285_v20 = vld [vmem:[#allocation4 + $0x52] sm:$0xff]  ;;  %v2501_v12 = vmax.f32 %v2493_v51, 0.0  ;;  %v2249_v13 = vmul.f32 %v4405_v61, %v2237_v8  ;;  %v2269_v23 = vmul.f32 %v4408_v32, %v2257_v7 }
 0x2bf   : > { %v2524_v52 = vmul.f32 0.16666667, %v2516_v42  ;;  %v2307_v60 = vadd.f32 %v2299_v58, %v2279_v2  ;;  %v2324_v0 = vmul.f32 %v4424_v33, %v2237_v8  ;;  %v2297_v15 = vmul.f32 %v4414_v14, %v2285_v20 }
 0x2c0   : > { %v2494_v4 = vadd.f32 3.0, %v2486_v22  ;;  %v2509_v30 = vmin.f32 %v2501_v12, 6.0  ;;  %v2277_v5 = vadd.f32 %v2269_v23, %v2249_v13  ;;  %v2352_v17 = vmul.f32 %v4427_v55, %v2257_v7  ;;  %v2258_v23 = vld [vmem:[#allocation4 + $0x61] sm:$0xff] }
 0x2c1   : > { %v2539_v19 = vmul.f32 %v4527_v43, %v2524_v52  ;;  %v2332_v34 = vadd.f32 %v2324_v0, %v2304_v62  ;;  %v2408_v9 = vmul.f32 %v4442_v31, %v2237_v8  ;;  %v2380_v49 = vmul.f32 %v4430_v1, %v2285_v20 }
 0x2c2   : > { %v2502_v48 = vmax.f32 %v2494_v4, 0.0  ;;  %v2517_v10 = vmul.f32 %v2509_v30, %v2485_v39  ;;  %v2436_v36 = vmul.f32 %v4445_v27, %v2257_v7  ;;  %v2464_v45 = vmul.f32 %v4461_v3, %v2285_v20  ;;  %v2238_v20 = vld [vmem:[#allocation4 + $0x60] sm:$0xff] }
 0x2c3   : > { %v2554_v57 = vadd.f32 %v4538_v44, %v2539_v19  ;;  %v2360_v58 = vadd.f32 %v2352_v17, %v2332_v34  ;;  %v2416_v51 = vadd.f32 %v2408_v9, %v2387_v26  ;;  %v2305_v62 = vadd.f32 %v2297_v15, %v2277_v5  ;;  %v2286_v30 = vld [vmem:[#allocation4 + $0x62] sm:$0xff] }
 0x2c4   : > { %v2510_v41 = vmin.f32 %v2502_v48, 6.0  ;;  %v2525_v2 = vmul.f32 0.16666667, %v2517_v10  ;;  %v2327_v8 = vmul.f32 %v4424_v33, %v2315_v25  ;;  %v2355_v42 = vmul.f32 %v4427_v55, %v2343_v6 }
 0x2c5   : > { %v2562_v12 = vadd.f32 3.0, %v2554_v57  ;;  %v2444_v13 = vadd.f32 %v2436_v36, %v2416_v51  ;;  %v2383_v7 = vmul.f32 %v4430_v1, %v4547_v37  ;;  %v2388_v52 = vadd.f32 %v2380_v49, %v2360_v58 }
 0x2c6   : > { %v2518_v39 = vmul.f32 %v2510_v41, %v2486_v22  ;;  %v2540_v4 = vmul.f32 %v4527_v43, %v2525_v2  ;;  %v2335_v0 = vadd.f32 %v2327_v8, %v2307_v60  ;;  %v2411_v26 = vmul.f32 %v4442_v31, %v2315_v25 }
 0x2c7   : > { %v2570_v15 = vmax.f32 %v2562_v12, 0.0  ;;  %v2472_v17 = vadd.f32 %v2464_v45, %v2444_v13  ;;  %v2439_v48 = vmul.f32 %v4445_v27, %v2343_v6  ;;  %v2250_v34 = vmul.f32 %v4405_v61, %v2238_v20 }
 0x2c8   : > { %v2526_v5 = vmul.f32 0.16666667, %v2518_v39  ;;  %v2555_v22 = vadd.f32 %v4538_v44, %v2540_v4  ;;  %v2363_v19 = vadd.f32 %v2355_v42, %v2335_v0  ;;  %v2270_v9 = vmul.f32 %v4408_v32, %v2258_v23 }
 0x2c9   : > { %v2578_v49 = vmin.f32 %v2570_v15, 6.0  ;;  %v2487_v60 = vadd.f32 %v4481_v56, %v2472_v17  ;;  %v2298_v25 = vmul.f32 %v4414_v14, %v2286_v30  ;;  %v2325_v6 = vmul.f32 %v4424_v33, %v2238_v20 }
 0x2ca   : > { %v2541_v10 = vmul.f32 %v4527_v43, %v2526_v5  ;;  %v2563_v36 = vadd.f32 3.0, %v2555_v22  ;;  %v2391_v41 = vadd.f32 %v2383_v7, %v2363_v19  ;;  %v2278_v45 = vadd.f32 %v2270_v9, %v2250_v34 }
 0x2cb   : > { %v2586_v51 = vmul.f32 %v2578_v49, %v2554_v57  ;;  %v2495_v2 = vadd.f32 3.0, %v2487_v60  ;;  %v2353_v61 = vmul.f32 %v4427_v55, %v2258_v23  ;;  %v2333_v42 = vadd.f32 %v2325_v6, %v2305_v62 }
 0x2cc   : > { %v2556_v58 = vadd.f32 %v4538_v44, %v2541_v10  ;;  %v2571_v32 = vmax.f32 %v2563_v36, 0.0  ;;  %v2420_v14 = vadd.f32 %v4496_v38, %v2391_v41  ;;  %v2306_v8 = vadd.f32 %v2298_v25, %v2278_v45 }
 0x2cd   : > { %v2594_v33 = vmul.f32 0.16666667, %v2586_v51  ;;  %v2503_v12 = vmax.f32 %v2495_v2, 0.0  ;;  %v2381_v57 = vmul.f32 %v4430_v1, %v2286_v30  ;;  %v2361_v4 = vadd.f32 %v2353_v61, %v2333_v42 }
 0x2ce   : > { %v2564_v39 = vadd.f32 3.0, %v2556_v58  ;;  %v2579_v13 = vmin.f32 %v2571_v32, 6.0  ;;  %v2448_v55 = vadd.f32 %v4499_v24, %v2420_v14  ;;  %v2334_v7 = vadd.f32 %v4509_v59, %v2306_v8 }
 0x2cf   : > { %2975 = vst.msk [vmem:[%s4571_s0] sm:$0xff] %vm744_vm0, %v2594_v33  ;;  %v2511_v5 = vmin.f32 %v2503_v12, 6.0  ;;  %v2409_v15 = vmul.f32 %v4442_v31, %v2238_v20  ;;  %v2437_v38 = vmul.f32 %v4445_v27, %v2258_v23  ;;  %v2389_v19 = vadd.f32 %v2381_v57, %v2361_v4 }
 0x2d0   : > { %v2572_v0 = vmax.f32 %v2564_v39, 0.0  ;;  %v2587_v62 = vmul.f32 %v2579_v13, %v2555_v22  ;;  %v2476_v17 = vadd.f32 %v4502_v21, %v2448_v55  ;;  %v2362_v1 = vadd.f32 %v4512_v53, %v2334_v7 }
 0x2d1   : > { %v2519_v24 = vmul.f32 %v2511_v5, %v2487_v60  ;;  %v2417_v9 = vadd.f32 %v2409_v15, %v2388_v52  ;;  %v2465_v59 = vmul.f32 %v4461_v3, %v2286_v30  ;;  %v2418_v31 = vadd.f32 %v4519_v28, %v2389_v19 }
 0x2d2   : > { %v2580_v34 = vmin.f32 %v2572_v0, 6.0  ;;  %v2595_v10 = vmul.f32 0.16666667, %v2587_v62  ;;  %v2491_v49 = vadd.f32 %v4481_v56, %v2476_v17  ;;  %v2390_v25 = vadd.f32 %v4515_v63, %v2362_v1 }
 0x2d3   : > { %v2527_v20 = vmul.f32 0.16666667, %v2519_v24  ;;  %v2445_v23 = vadd.f32 %v2437_v38, %v2417_v9  ;;  %v2467_v21 = vmul.f32 %v4461_v3, %v4547_v37  ;;  %v2446_v30 = vadd.f32 %v4522_v47, %v2418_v31 }
 0x2d4   : > { %v2588_v27 = vmul.f32 %v2580_v34, %v2556_v58  ;;  %2976 = vst.msk [vmem:[%s4571_s0 + $0x8] sm:$0xff] %vm744_vm0, %v2595_v10  ;;  %v2499_v53 = vadd.f32 3.0, %v2491_v49  ;;  %v2419_v52 = vadd.f32 %v2411_v26, %v2390_v25 }
 0x2d5   : > { %v2542_v60 = vmul.f32 %v4527_v43, %v2527_v20  ;;  %v2473_v36 = vadd.f32 %v2465_v59, %v2445_v23  ;;  %v2474_v28 = vadd.f32 %v4530_v11, %v2446_v30 }
 0x2d6   : > { %v2596_v22 = vmul.f32 0.16666667, %v2588_v27  ;;  %v2507_v63 = vmax.f32 %v2499_v53, 0.0  ;;  %v2447_v41 = vadd.f32 %v2439_v48, %v2419_v52 }
 0x2d7   : > { %v2557_v45 = vadd.f32 %v4538_v44, %v2542_v60  ;;  %v2488_v6 = vadd.f32 %v4481_v56, %v2473_v36  ;;  %v2489_v37 = vadd.f32 %v4481_v56, %v2474_v28 }
 0x2d8   : > { %2977 = vst.msk [vmem:[%s4571_s0 + $0x10] sm:$0xff] %vm744_vm0, %v2596_v22  ;;  %v2515_v58 = vmin.f32 %v2507_v63, 6.0  ;;  %v2475_v3 = vadd.f32 %v2467_v21, %v2447_v41 }
 0x2d9   : > { %v2565_v26 = vadd.f32 3.0, %v2557_v45  ;;  %v2496_v47 = vadd.f32 3.0, %v2488_v6  ;;  %v2497_v61 = vadd.f32 3.0, %v2489_v37 }
 0x2da   : > { %v2523_v51 = vmul.f32 %v2515_v58, %v2491_v49  ;;  %v2490_v2 = vadd.f32 %v4481_v56, %v2475_v3 }
 0x2db   : > { %v2573_v32 = vmax.f32 %v2565_v26, 0.0  ;;  %v2504_v48 = vmax.f32 %v2496_v47, 0.0  ;;  %v2505_v8 = vmax.f32 %v2497_v61, 0.0  ;;  %v2605_v61 = vld [vmem:[#allocation4 + $0xa0] sm:$0xff] }
 0x2dc   : > { %v2531_v14 = vmul.f32 0.16666667, %v2523_v51  ;;  %v2498_v11 = vadd.f32 3.0, %v2490_v2 }
 0x2dd   : > { %v2581_v42 = vmin.f32 %v2573_v32, 6.0  ;;  %v2512_v39 = vmin.f32 %v2504_v48, 6.0  ;;  %v2513_v57 = vmin.f32 %v2505_v8, 6.0  ;;  %v2625_v32 = vld [vmem:[#allocation4 + $0xa1] sm:$0xff] }
 0x2de   : > { %v2546_v33 = vmul.f32 %v4527_v43, %v2531_v14  ;;  %v2506_v12 = vmax.f32 %v2498_v11, 0.0 }
 0x2df   : > { %v2589_v13 = vmul.f32 %v2581_v42, %v2557_v45  ;;  %v2520_v55 = vmul.f32 %v2512_v39, %v2488_v6  ;;  %v2521_v0 = vmul.f32 %v2513_v57, %v2489_v37  ;;  %v4621_v45 = vld [vmem:[%s4846_s14] ss:$0 sm:$0xff]  ;;  %v2653_v39 = vld [vmem:[#allocation4 + $0xa2] sm:$0xff] }
 0x2e0   : > { %v2561_v7 = vadd.f32 %v4538_v44, %v2546_v33  ;;  %v2514_v4 = vmin.f32 %v2506_v12, 6.0  ;;  %v2602_v6 = vld [vmem:[%s4849_s17] sm:$0xff] }
 0x2e1   : > { %v2597_v56 = vmul.f32 0.16666667, %v2589_v13  ;;  %v2528_v5 = vmul.f32 0.16666667, %v2520_v55  ;;  %v2529_v62 = vmul.f32 0.16666667, %v2521_v0  ;;  %v4628_v37 = vrot.slane %v2602_v6, %v4914_v16 }
 0x2e2   : > { %v2569_v15 = vadd.f32 3.0, %v2561_v7  ;;  %v2522_v38 = vmul.f32 %v2514_v4, %v2490_v2  ;;  %v4631_v26 = vrot.slane %v2602_v6, %v4915_v35  ;;  %v4637_v8 = vrot.slane %v2602_v6, %v4916_v29 }
 0x2e3   : > { %2978 = vst.msk [vmem:[%s4571_s0 + $0x18] sm:$0xff] %vm744_vm0, %v2597_v56  ;;  %v2543_v17 = vmul.f32 %v4527_v43, %v2528_v5  ;;  %v2544_v34 = vmul.f32 %v4527_v43, %v2529_v62  ;;  %v2617_v16 = vmul.f32 %v4628_v37, %v2605_v61 }
 0x2e4   : > { %v2577_v1 = vmax.f32 %v2569_v15, 0.0  ;;  %v2530_v19 = vmul.f32 0.16666667, %v2522_v38  ;;  %v2637_v35 = vmul.f32 %v4631_v26, %v2625_v32  ;;  %v2665_v29 = vmul.f32 %v4637_v8, %v2653_v39 }
 0x2e5   : > { %v2558_v24 = vadd.f32 %v4538_v44, %v2543_v17  ;;  %v2559_v10 = vadd.f32 %v4538_v44, %v2544_v34  ;;  %v4651_v38 = vrot.slane %v2602_v6, %v4917_v50  ;;  %v4660_v50 = vrot.slane %v2602_v6, %v4921_v18 }
 0x2e6   : > { %v2585_v9 = vmin.f32 %v2577_v1, 6.0  ;;  %v2545_v59 = vmul.f32 %v4527_v43, %v2530_v19 }
 0x2e7   : > { %v2566_v49 = vadd.f32 3.0, %v2558_v24  ;;  %v2567_v27 = vadd.f32 3.0, %v2559_v10 }
 0x2e8   : > { %v2593_v25 = vmul.f32 %v2585_v9, %v2561_v7  ;;  %v2560_v31 = vadd.f32 %v4538_v44, %v2545_v59  ;;  %v2645_v7 = vadd.f32 %v2637_v35, %v2617_v16  ;;  %v2773_v9 = vld [vmem:[#allocation4 + $0x130] sm:$0xff] }
 0x2e9   : > { %v2574_v20 = vmax.f32 %v2566_v49, 0.0  ;;  %v2575_v53 = vmax.f32 %v2567_v27, 0.0  ;;  %v4665_v27 = vld [vmem:[%s4849_s17 + $0x8] ss:$0 sm:$0xff] }
 0x2ea   : > { %v2601_v23 = vmul.f32 0.16666667, %v2593_v25  ;;  %v2568_v21 = vadd.f32 3.0, %v2560_v31  ;;  %v2673_v1 = vadd.f32 %v2665_v29, %v2645_v7  ;;  %v2801_v25 = vld [vmem:[#allocation4 + $0x131] sm:$0xff] }
 0x2eb   : > { %v2582_v52 = vmin.f32 %v2574_v20, 6.0  ;;  %v2583_v22 = vmin.f32 %v2575_v53, 6.0 }
 0x2ec   : > { %2982 = vst.msk [vmem:[%s4571_s0 + $0x38] sm:$0xff] %vm744_vm0, %v2601_v23  ;;  %v2576_v30 = vmax.f32 %v2568_v21, 0.0  ;;  %v4668_v23 = vrot.slane %v2602_v6, %v4920_v46  ;;  %v4680_v46 = vmul.f32 %v4660_v50, %v2801_v25 }
 0x2ed   : > { %v2590_v43 = vmul.f32 %v2582_v52, %v2558_v24  ;;  %v2591_v36 = vmul.f32 %v2583_v22, %v2559_v10  ;;  %v4656_v10 = vrot.slane %v2602_v6, %v4918_v54  ;;  %v4671_v54 = vrot.slane %v2602_v6, %v4919_v40 }
 0x2ee   : > { %v2584_v60 = vmin.f32 %v2576_v30, 6.0 }
 0x2ef   : > { %v2598_v63 = vmul.f32 0.16666667, %v2590_v43  ;;  %v2599_v28 = vmul.f32 0.16666667, %v2591_v36 }
 0x2f0   : > { %v2592_v41 = vmul.f32 %v2584_v60, %v2560_v31  ;;  %v2829_v31 = vld [vmem:[#allocation4 + $0x132] sm:$0xff] }
 0x2f1   : > { %2979 = vst.msk [vmem:[%s4571_s0 + $0x20] sm:$0xff] %vm744_vm0, %v2598_v63  ;;  %2980 = vst.msk [vmem:[%s4571_s0 + $0x28] sm:$0xff] %vm744_vm0, %v2599_v28  ;;  %v4677_v63 = vmul.f32 %v4668_v23, %v2773_v9 }
 0x2f2   : > { %v2600_v44 = vmul.f32 0.16666667, %v2592_v41  ;;  %v4683_v41 = vmul.f32 %v4665_v27, %v2829_v31 }
 0x2f4   : > { %2981 = vst.msk [vmem:[%s4571_s0 + $0x30] sm:$0xff] %vm744_vm0, %v2600_v44 }
 0x344   : > { %v3202_v58 = vpop.f32.mrf.mxu1 }
 0x345   : > { %v2132_v3 = vadd.f32 %v3202_v58, %v4621_v45 }
 0x346   : > { %v2123_v47 = vpop.f32.mrf.mxu1 }
 0x347   : > { %v2156_v51 = vmax.f32 %v2132_v3, 0.0  ;;  %v2124_v2 = vadd.f32 %v4621_v45, %v2123_v47 }
 0x348   : > { %v3203_v48 = vpop.f32.mrf.mxu1 }
 0x349   : > { %2224 = vst.msk [vmem:[#allocation4 + $0xd1] sm:$0xff] %vm744_vm0, %v2156_v51  ;;  %v2154_v14 = vmax.f32 %v2124_v2, 0.0  ;;  %v2135_v11 = vadd.f32 %v3203_v48, %v4621_v45 }
 0x34a   : > { %v2126_v42 = vpop.f32.mrf.mxu1 }
 0x34b   : > { %2222 = vst.msk [vmem:[#allocation4 + $0xb1] sm:$0xff] %vm744_vm0, %v2154_v14  ;;  %v2157_v33 = vmax.f32 %v2135_v11, 0.0  ;;  %v2127_v12 = vadd.f32 %v4621_v45, %v2126_v42 }
 0x34c   : > { %v3206_v57 = vpop.f32.mrf.mxu1 }
 0x34d   : > { %2225 = vst.msk [vmem:[#allocation4 + $0xe1] sm:$0xff] %vm744_vm0, %v2157_v33  ;;  %v2155_v13 = vmax.f32 %v2127_v12, 0.0  ;;  %v2148_v55 = vadd.f32 %v3206_v57, %v4621_v45 }
 0x34e   : > { %v2139_v53 = vpop.f32.mrf.mxu1 }
 0x34f   : > { %2223 = vst.msk [vmem:[#allocation4 + $0xc1] sm:$0xff] %vm744_vm0, %v2155_v13  ;;  %v2160_v4 = vmax.f32 %v2148_v55, 0.0  ;;  %v2140_v58 = vadd.f32 %v4621_v45, %v2139_v53 }
 0x350   : > { %v2608_v0 = vld [vmem:[#allocation4 + $0xd0] sm:$0xff]  ;;  %v3207_v33 = vpop.f32.mrf.mxu1 }
 0x351   : > { %v2628_v56 = vld [vmem:[#allocation4 + $0xd1] sm:$0xff]  ;;  %v2620_v5 = vmul.f32 %v4628_v37, %v2608_v0  ;;  %2228 = vst.msk [vmem:[#allocation4 + $0x111] sm:$0xff] %vm744_vm0, %v2160_v4  ;;  %v2695_v32 = vmul.f32 %v4651_v38, %v2608_v0 }
 0x352   : > { %v2640_v15 = vmul.f32 %v4631_v26, %v2628_v56  ;;  %v2606_v62 = vld [vmem:[#allocation4 + $0xb0] sm:$0xff]  ;;  %v2723_v48 = vmul.f32 %v4656_v10, %v2628_v56  ;;  %v2142_v31 = vpop.f32.mrf.mxu1 }
 0x353   : > { %v2626_v17 = vld [vmem:[#allocation4 + $0xb1] sm:$0xff]  ;;  %v2618_v19 = vmul.f32 %v4628_v37, %v2606_v62  ;;  %v2693_v49 = vmul.f32 %v4651_v38, %v2606_v62  ;;  %v2807_v62 = vmul.f32 %v4660_v50, %v2628_v56  ;;  %v2158_v56 = vmax.f32 %v2140_v58, 0.0 }
 0x354   : > { %v2638_v34 = vmul.f32 %v4631_v26, %v2626_v17  ;;  %v2654_v24 = vld [vmem:[#allocation4 + $0xb2] sm:$0xff]  ;;  %v2648_v20 = vadd.f32 %v2640_v15, %v2620_v5  ;;  %v2721_v18 = vmul.f32 %v4656_v10, %v2626_v17  ;;  %v2609_v22 = vld [vmem:[#allocation4 + $0xe0] sm:$0xff]  ;;  %v2779_v15 = vmul.f32 %v4668_v23, %v2608_v0 }
 0x355   : > { %v2656_v59 = vld [vmem:[#allocation4 + $0xd2] sm:$0xff]  ;;  %v2666_v52 = vmul.f32 %v4637_v8, %v2654_v24  ;;  %v2701_v30 = vadd.f32 %v2693_v49, %v2673_v1  ;;  %v2749_v44 = vmul.f32 %v4671_v54, %v2654_v24  ;;  %v2629_v47 = vld [vmem:[#allocation4 + $0xe1] sm:$0xff]  ;;  %v2696_v51 = vmul.f32 %v4651_v38, %v2609_v22  ;;  %v4709_v0 = vld [vmem:[%s4850_s18] ss:$0 sm:$0xff]  ;;  %2226 = vst.msk [vmem:[#allocation4 + $0xf1] sm:$0xff] %vm744_vm0, %v2158_v56 }
 0x356   : > { %v2646_v21 = vadd.f32 %v2638_v34, %v2618_v19  ;;  %v2607_v43 = vld [vmem:[#allocation4 + $0xc0] sm:$0xff]  ;;  %v2668_v36 = vmul.f32 %v4637_v8, %v2656_v59  ;;  %v2751_v16 = vmul.f32 %v4671_v54, %v2656_v59  ;;  %v2621_v12 = vmul.f32 %v4628_v37, %v2609_v22 }
 0x357   : > { %v2627_v60 = vld [vmem:[#allocation4 + $0xc1] sm:$0xff]  ;;  %v2729_v28 = vadd.f32 %v2721_v18, %v2701_v30  ;;  %v2619_v2 = vmul.f32 %v4628_v37, %v2607_v43  ;;  %v2694_v11 = vmul.f32 %v4651_v38, %v2607_v43  ;;  %v2778_v39 = vmul.f32 %v4668_v23, %v2607_v43  ;;  %v4752_v56 = vld [vmem:[%s4853_s21] ss:$0 sm:$0xff] }
 0x358   : > { %v2674_v40 = vadd.f32 %v2666_v52, %v2646_v21  ;;  %v2655_v6 = vld [vmem:[#allocation4 + $0xc2] sm:$0xff]  ;;  %v2676_v3 = vadd.f32 %v2668_v36, %v2648_v20  ;;  %v2639_v61 = vmul.f32 %v4631_v26, %v2627_v60  ;;  %v2641_v57 = vmul.f32 %v4631_v26, %v2629_v47  ;;  %v2612_v49 = vld [vmem:[#allocation4 + $0x110] sm:$0xff] }
 0x359   : > { %v2757_v14 = vadd.f32 %v2749_v44, %v2729_v28  ;;  %v2667_v42 = vmul.f32 %v4637_v8, %v2655_v6  ;;  %v2722_v55 = vmul.f32 %v4656_v10, %v2627_v60  ;;  %v2806_v5 = vmul.f32 %v4660_v50, %v2627_v60  ;;  %v2632_v25 = vld [vmem:[#allocation4 + $0x111] sm:$0xff]  ;;  %v2657_v52 = vld [vmem:[#allocation4 + $0xe2] sm:$0xff] }
 0x35a   : > { %v2647_v35 = vadd.f32 %v2639_v61, %v2619_v2  ;;  %v2702_v13 = vadd.f32 %v2694_v11, %v2674_v40  ;;  %v2704_v7 = vadd.f32 %v2696_v51, %v2676_v3  ;;  %v2750_v1 = vmul.f32 %v4671_v54, %v2655_v6 }
 0x35b   : > { %v2786_v4 = vadd.f32 %v2778_v39, %v2757_v14  ;;  %v2724_v19 = vmul.f32 %v4656_v10, %v2629_v47  ;;  %v2834_v9 = vmul.f32 %v4665_v27, %v2655_v6  ;;  %v2835_v20 = vmul.f32 %v4665_v27, %v2656_v59 }
 0x35c   : > { %v2675_v29 = vadd.f32 %v2667_v42, %v2647_v35  ;;  %v2730_v17 = vadd.f32 %v2722_v55, %v2702_v13  ;;  %v2649_v21 = vadd.f32 %v2641_v57, %v2621_v12  ;;  %v2151_v60 = vadd.f32 %v3207_v33, %v4621_v45 }
 0x35d   : > { %v2814_v24 = vadd.f32 %v2806_v5, %v2786_v4  ;;  %v2732_v30 = vadd.f32 %v2724_v19, %v2704_v7  ;;  %v2624_v40 = vmul.f32 %v4628_v37, %v2612_v49  ;;  %v2644_v28 = vmul.f32 %v4631_v26, %v2632_v25  ;;  %v2658_v19 = vld [vmem:[#allocation4 + $0xf2] sm:$0xff] }
 0x35e   : > { %v2703_v34 = vadd.f32 %v2695_v32, %v2675_v29  ;;  %v2758_v53 = vadd.f32 %v2750_v1, %v2730_v17  ;;  %v2143_v59 = vadd.f32 %v4621_v45, %v2142_v31  ;;  %v2780_v44 = vmul.f32 %v4668_v23, %v2609_v22  ;;  %v2660_v32 = vld [vmem:[#allocation4 + $0x112] sm:$0xff] }
 0x35f   : > { %v2842_v43 = vadd.f32 %v2834_v9, %v2814_v24  ;;  %v2161_v3 = vmax.f32 %v2151_v60, 0.0  ;;  %v2669_v51 = vmul.f32 %v4637_v8, %v2657_v52  ;;  %v2752_v2 = vmul.f32 %v4671_v54, %v2657_v52  ;;  %v2610_v17 = vld [vmem:[#allocation4 + $0xf0] sm:$0xff] }
 0x360   : > { %v2731_v18 = vadd.f32 %v2723_v48, %v2703_v34  ;;  %v2787_v36 = vadd.f32 %v2779_v15, %v2758_v53  ;;  %v2159_v48 = vmax.f32 %v2143_v59, 0.0  ;;  %v2808_v14 = vmul.f32 %v4660_v50, %v2629_v47  ;;  %v2630_v1 = vld [vmem:[#allocation4 + $0xf1] sm:$0xff] }
 0x361   : > { %v2857_v58 = vadd.f32 %v4709_v0, %v2842_v43  ;;  %v2836_v11 = vmul.f32 %v4665_v27, %v2657_v52  ;;  %2229 = vst.msk [vmem:[#allocation4 + $0x121] sm:$0xff] %vm744_vm0, %v2161_v3  ;;  %v2677_v45 = vadd.f32 %v2669_v51, %v2649_v21  ;;  %v2760_v22 = vadd.f32 %v2752_v2, %v2732_v30 }
 0x362   : > { %v2759_v6 = vadd.f32 %v2751_v16, %v2731_v18  ;;  %v2815_v61 = vadd.f32 %v2807_v62, %v2787_v36  ;;  %v2652_v39 = vadd.f32 %v2644_v28, %v2624_v40  ;;  %2227 = vst.msk [vmem:[#allocation4 + $0x101] sm:$0xff] %vm744_vm0, %v2159_v48  ;;  %v2672_v57 = vmul.f32 %v4637_v8, %v2660_v32 }
 0x363   : > { %v2865_v42 = vadd.f32 3.0, %v2857_v58  ;;  %v4726_v13 = vmul.f32 %v4651_v38, %v2612_v49  ;;  %v4730_v55 = vmul.f32 %v4656_v10, %v2632_v25  ;;  %v4733_v7 = vmul.f32 %v4671_v54, %v2660_v32 }
 0x364   : > { %v2788_v35 = vadd.f32 %v2780_v44, %v2759_v6  ;;  %v2843_v16 = vadd.f32 %v2835_v20, %v2815_v61  ;;  %v4736_v29 = vmul.f32 %v4668_v23, %v2612_v49  ;;  %v4739_v15 = vmul.f32 %v4660_v50, %v2632_v25  ;;  %v4760_v6 = vld [vmem:[%s4854_s22] ss:$0 sm:$0xff] }
 0x365   : > { %v2873_v12 = vmax.f32 %v2865_v42, 0.0  ;;  %v4742_v62 = vmul.f32 %v4665_v27, %v2660_v32  ;;  %v2680_v24 = vadd.f32 %v2672_v57, %v2652_v39  ;;  %v2622_v9 = vmul.f32 %v4628_v37, %v2610_v17 }
 0x366   : > { %v2816_v33 = vadd.f32 %v2808_v14, %v2788_v35  ;;  %v2858_v47 = vadd.f32 %v4709_v0, %v2843_v16  ;;  %v2642_v31 = vmul.f32 %v4631_v26, %v2630_v1  ;;  %v2670_v21 = vmul.f32 %v4637_v8, %v2658_v19 }
 0x367   : > { %v2881_v5 = vmin.f32 %v2873_v12, 6.0  ;;  %v2697_v25 = vmul.f32 %v4651_v38, %v2610_v17  ;;  %v2725_v30 = vmul.f32 %v4656_v10, %v2630_v1  ;;  %v2781_v18 = vmul.f32 %v4668_v23, %v2610_v17 }
 0x368   : > { %v2844_v4 = vadd.f32 %v2836_v11, %v2816_v33  ;;  %v2866_v34 = vadd.f32 3.0, %v2858_v47  ;;  %v2650_v52 = vadd.f32 %v2642_v31, %v2622_v9  ;;  %v2688_v43 = vld [vmem:[#allocation4 + $0x120] sm:$0xff]  ;;  %v2753_v28 = vmul.f32 %v4671_v54, %v2658_v19 }
 0x369   : > { %v2889_v20 = vmul.f32 %v2881_v5, %v2857_v58  ;;  %v2705_v40 = vadd.f32 %v2697_v25, %v2677_v45  ;;  %v2716_v59 = vld [vmem:[#allocation4 + $0x121] sm:$0xff]  ;;  %v2789_v3 = vadd.f32 %v2781_v18, %v2760_v22  ;;  %v2809_v51 = vmul.f32 %v4660_v50, %v2630_v1 }
 0x36a   : > { %v2859_v49 = vadd.f32 %v4709_v0, %v2844_v4  ;;  %v2874_v53 = vmax.f32 %v2866_v34, 0.0  ;;  %v2678_v58 = vadd.f32 %v2670_v21, %v2650_v52  ;;  %v4763_v2 = vld [vmem:[#allocation4 + $0x122] sm:$0xff]  ;;  %v2700_v14 = vmul.f32 %v4651_v38, %v2688_v43 }
 0x36b   : > { %v2897_v36 = vmul.f32 0.16666667, %v2889_v20  ;;  %v2733_v48 = vadd.f32 %v2725_v30, %v2705_v40  ;;  %v2817_v35 = vadd.f32 %v2809_v51, %v2789_v3  ;;  %v2837_v42 = vmul.f32 %v4665_v27, %v2658_v19  ;;  %v2611_v12 = vld [vmem:[#allocation4 + $0x100] sm:$0xff] }
 0x36c   : > { %v2867_v60 = vadd.f32 3.0, %v2859_v49  ;;  %v2882_v44 = vmin.f32 %v2874_v53, 6.0  ;;  %v2728_v45 = vmul.f32 %v4656_v10, %v2716_v59  ;;  %v2708_v22 = vadd.f32 %v2700_v14, %v2680_v24  ;;  %v2631_v57 = vld [vmem:[#allocation4 + $0x101] sm:$0xff] }
 0x36d   : > { %v2912_v32 = vmul.f32 %v4752_v56, %v2897_v36  ;;  %v2756_v33 = vmul.f32 %v4671_v54, %v4763_v2  ;;  %v2761_v5 = vadd.f32 %v2753_v28, %v2733_v48  ;;  %v2845_v17 = vadd.f32 %v2837_v42, %v2817_v35 }
 0x36e   : > { %v2875_v61 = vmax.f32 %v2867_v60, 0.0  ;;  %v2890_v11 = vmul.f32 %v2882_v44, %v2858_v47  ;;  %v2784_v1 = vmul.f32 %v4668_v23, %v2688_v43  ;;  %v2659_v47 = vld [vmem:[#allocation4 + $0x102] sm:$0xff]  ;;  %v2736_v19 = vadd.f32 %v2728_v45, %v2708_v22 }
 0x36f   : > { %v2927_v39 = vadd.f32 %v4760_v6, %v2912_v32  ;;  %v2812_v31 = vmul.f32 %v4660_v50, %v2716_v59  ;;  %v2860_v24 = vadd.f32 %v4709_v0, %v2845_v17  ;;  %v2623_v21 = vmul.f32 %v4628_v37, %v2611_v12 }
 0x370   : > { %v2883_v16 = vmin.f32 %v2875_v61, 6.0  ;;  %v2898_v4 = vmul.f32 0.16666667, %v2890_v11  ;;  %v2643_v25 = vmul.f32 %v4631_v26, %v2631_v57  ;;  %v2764_v30 = vadd.f32 %v2756_v33, %v2736_v19 }
 0x371   : > { %v2935_v9 = vadd.f32 3.0, %v2927_v39  ;;  %v2671_v18 = vmul.f32 %v4637_v8, %v2659_v47  ;;  %v2698_v36 = vmul.f32 %v4651_v38, %v2611_v12  ;;  %v2726_v37 = vmul.f32 %v4656_v10, %v2631_v57 }
 0x372   : > { %v2891_v34 = vmul.f32 %v2883_v16, %v2859_v49  ;;  %v2913_v20 = vmul.f32 %v4752_v56, %v2898_v4  ;;  %v2868_v49 = vadd.f32 3.0, %v2860_v24  ;;  %v2651_v60 = vadd.f32 %v2643_v25, %v2623_v21 }
 0x373   : > { %v2943_v52 = vmax.f32 %v2935_v9, 0.0  ;;  %v2793_v59 = vadd.f32 %v4677_v63, %v2764_v30  ;;  %v2706_v51 = vadd.f32 %v2698_v36, %v2678_v58  ;;  %v2754_v48 = vmul.f32 %v4671_v54, %v2659_v47 }
 0x374   : > { %v2899_v53 = vmul.f32 0.16666667, %v2891_v34  ;;  %v2928_v43 = vadd.f32 %v4760_v6, %v2913_v20  ;;  %v2876_v26 = vmax.f32 %v2868_v49, 0.0  ;;  %v2679_v3 = vadd.f32 %v2671_v18, %v2651_v60 }
 0x375   : > { %v2951_v28 = vmin.f32 %v2943_v52, 6.0  ;;  %v2821_v32 = vadd.f32 %v4680_v46, %v2793_v59  ;;  %v2734_v35 = vadd.f32 %v2726_v37, %v2706_v51  ;;  %v2782_v45 = vmul.f32 %v4668_v23, %v2611_v12 }
 0x376   : > { %v2914_v40 = vmul.f32 %v4752_v56, %v2899_v53  ;;  %v2936_v44 = vadd.f32 3.0, %v2928_v43  ;;  %v2884_v14 = vmin.f32 %v2876_v26, 6.0  ;;  %v2707_v11 = vadd.f32 %v4726_v13, %v2679_v3 }
 0x377   : > { %v2959_v8 = vmul.f32 %v2951_v28, %v2927_v39  ;;  %v2849_v10 = vadd.f32 %v4683_v41, %v2821_v32  ;;  %v2762_v22 = vadd.f32 %v2754_v48, %v2734_v35  ;;  %v2790_v46 = vadd.f32 %v2782_v45, %v2761_v5 }
 0x378   : > { %v2929_v61 = vadd.f32 %v4760_v6, %v2914_v40  ;;  %v2944_v38 = vmax.f32 %v2936_v44, 0.0  ;;  %v2892_v16 = vmul.f32 %v2884_v14, %v2860_v24  ;;  %v2735_v39 = vadd.f32 %v4730_v55, %v2707_v11 }
 0x379   : > { %v2967_v42 = vmul.f32 0.16666667, %v2959_v8  ;;  %v2864_v54 = vadd.f32 %v4709_v0, %v2849_v10  ;;  %v2810_v13 = vmul.f32 %v4660_v50, %v2631_v57  ;;  %v2791_v23 = vadd.f32 %v4736_v29, %v2762_v22 }
 0x37a   : > { %v2937_v63 = vadd.f32 3.0, %v2929_v61  ;;  %v2952_v58 = vmin.f32 %v2944_v38, 6.0  ;;  %v2900_v17 = vmul.f32 0.16666667, %v2892_v16  ;;  %v2763_v41 = vadd.f32 %v4733_v7, %v2735_v39 }
 0x37b   : > { %3115 = vst.msk [vmem:[%s4571_s0 + $0x40] sm:$0xff] %vm744_vm0, %v2967_v42  ;;  %v2872_v34 = vadd.f32 3.0, %v2864_v54  ;;  %v2818_v9 = vadd.f32 %v2810_v13, %v2790_v46  ;;  %v2838_v55 = vmul.f32 %v4665_v27, %v2659_v47  ;;  %v2819_v5 = vadd.f32 %v4739_v15, %v2791_v23 }
 0x37c   : > { %v2945_v33 = vmax.f32 %v2937_v63, 0.0  ;;  %v2960_v4 = vmul.f32 %v2952_v58, %v2928_v43  ;;  %v2915_v20 = vmul.f32 %v4752_v56, %v2900_v17  ;;  %v2792_v24 = vadd.f32 %v2784_v1, %v2763_v41 }
 0x37d   : > { %v2880_v57 = vmax.f32 %v2872_v34, 0.0  ;;  %v2846_v21 = vadd.f32 %v2838_v55, %v2818_v9  ;;  %v2840_v29 = vmul.f32 %v4665_v27, %v4763_v2  ;;  %v2847_v47 = vadd.f32 %v4742_v62, %v2819_v5 }
 0x37e   : > { %v2953_v12 = vmin.f32 %v2945_v33, 6.0  ;;  %v2968_v19 = vmul.f32 0.16666667, %v2960_v4  ;;  %v2930_v7 = vadd.f32 %v4760_v6, %v2915_v20  ;;  %v2820_v25 = vadd.f32 %v2812_v31, %v2792_v24 }
 0x37f   : > { %v2888_v52 = vmin.f32 %v2880_v57, 6.0  ;;  %v2861_v1 = vadd.f32 %v4709_v0, %v2846_v21  ;;  %v2862_v15 = vadd.f32 %v4709_v0, %v2847_v47 }
 0x380   : > { %v2961_v50 = vmul.f32 %v2953_v12, %v2929_v61  ;;  %3116 = vst.msk [vmem:[%s4571_s0 + $0x48] sm:$0xff] %vm744_vm0, %v2968_v19  ;;  %v2938_v30 = vadd.f32 3.0, %v2930_v7  ;;  %v2848_v18 = vadd.f32 %v2840_v29, %v2820_v25 }
 0x381   : > { %v2896_v43 = vmul.f32 %v2888_v52, %v2864_v54  ;;  %v2869_v49 = vadd.f32 3.0, %v2861_v1  ;;  %v2870_v40 = vadd.f32 3.0, %v2862_v15 }
 0x382   : > { %v2969_v53 = vmul.f32 0.16666667, %v2961_v50  ;;  %v2946_v60 = vmax.f32 %v2938_v30, 0.0  ;;  %v2863_v36 = vadd.f32 %v4709_v0, %v2848_v18 }
 0x383   : > { %v2904_v27 = vmul.f32 0.16666667, %v2896_v43  ;;  %v2877_v2 = vmax.f32 %v2869_v49, 0.0  ;;  %v2878_v28 = vmax.f32 %v2870_v40, 0.0 }
 0x384   : > { %3117 = vst.msk [vmem:[%s4571_s0 + $0x50] sm:$0xff] %vm744_vm0, %v2969_v53  ;;  %v2954_v62 = vmin.f32 %v2946_v60, 6.0  ;;  %v2871_v31 = vadd.f32 3.0, %v2863_v36 }
 0x385   : > { %v2919_v59 = vmul.f32 %v4752_v56, %v2904_v27  ;;  %v2885_v37 = vmin.f32 %v2877_v2, 6.0  ;;  %v2886_v3 = vmin.f32 %v2878_v28, 6.0 }
 0x386   : > { %v2962_v44 = vmul.f32 %v2954_v62, %v2930_v7  ;;  %v2879_v26 = vmax.f32 %v2871_v31, 0.0 }
 0x387   : > { %v2934_v51 = vadd.f32 %v4760_v6, %v2919_v59  ;;  %v2893_v61 = vmul.f32 %v2885_v37, %v2861_v1  ;;  %v2894_v48 = vmul.f32 %v2886_v3, %v2862_v15 }
 0x388   : > { %v2970_v8 = vmul.f32 0.16666667, %v2962_v44  ;;  %v2887_v32 = vmin.f32 %v2879_v26, 6.0 }
 0x389   : > { %v2942_v0 = vadd.f32 3.0, %v2934_v51  ;;  %v2901_v38 = vmul.f32 0.16666667, %v2893_v61  ;;  %v2902_v11 = vmul.f32 0.16666667, %v2894_v48 }
 0x38a   : > { %3118 = vst.msk [vmem:[%s4571_s0 + $0x58] sm:$0xff] %vm744_vm0, %v2970_v8  ;;  %v2895_v14 = vmul.f32 %v2887_v32, %v2863_v36 }
 0x38b   : > { %v2950_v35 = vmax.f32 %v2942_v0, 0.0  ;;  %v2916_v63 = vmul.f32 %v4752_v56, %v2901_v38  ;;  %v2917_v10 = vmul.f32 %v4752_v56, %v2902_v11 }
 0x38c   : > { %v2903_v42 = vmul.f32 0.16666667, %v2895_v14 }
 0x38d   : > { %v2958_v45 = vmin.f32 %v2950_v35, 6.0  ;;  %v2931_v58 = vadd.f32 %v4760_v6, %v2916_v63  ;;  %v2932_v39 = vadd.f32 %v4760_v6, %v2917_v10 }
 0x38e   : > { %v2918_v16 = vmul.f32 %v4752_v56, %v2903_v42 }
 0x38f   : > { %v2966_v22 = vmul.f32 %v2958_v45, %v2934_v51  ;;  %v2939_v33 = vadd.f32 3.0, %v2931_v58  ;;  %v2940_v46 = vadd.f32 3.0, %v2932_v39 }
 0x390   : > { %v2933_v54 = vadd.f32 %v4760_v6, %v2918_v16 }
 0x391   : > { %v2974_v13 = vmul.f32 0.16666667, %v2966_v22  ;;  %v2947_v4 = vmax.f32 %v2939_v33, 0.0  ;;  %v2948_v41 = vmax.f32 %v2940_v46, 0.0 }
 0x392   : > { %v2941_v17 = vadd.f32 3.0, %v2933_v54 }
 0x393   : > { %3122 = vst.msk [vmem:[%s4571_s0 + $0x78] sm:$0xff] %vm744_vm0, %v2974_v13  ;;  %v2955_v23 = vmin.f32 %v2947_v4, 6.0  ;;  %v2956_v34 = vmin.f32 %v2948_v41, 6.0 }
 0x394   : > { %v2949_v12 = vmax.f32 %v2941_v17, 0.0 }
 0x395   : > { %v2963_v56 = vmul.f32 %v2955_v23, %v2931_v58  ;;  %v2964_v55 = vmul.f32 %v2956_v34, %v2932_v39 }
 0x396   : > { %v2957_v9 = vmin.f32 %v2949_v12, 6.0 }
 0x397   : > { %v2971_v19 = vmul.f32 0.16666667, %v2963_v56  ;;  %v2972_v24 = vmul.f32 0.16666667, %v2964_v55 }
 0x398   : > { %v2965_v20 = vmul.f32 %v2957_v9, %v2933_v54 }
 0x399   : > { %3119 = vst.msk [vmem:[%s4571_s0 + $0x60] sm:$0xff] %vm744_vm0, %v2971_v19  ;;  %3120 = vst.msk [vmem:[%s4571_s0 + $0x68] sm:$0xff] %vm744_vm0, %v2972_v24 }
 0x39a   : > { %v2973_v6 = vmul.f32 0.16666667, %v2965_v20 }
 0x39c   : > { %3121 = vst.msk [vmem:[%s4571_s0 + $0x70] sm:$0xff] %vm744_vm0, %v2973_v6 }
 0x39d PF: > { %s33_s4 = sadd.s32 1, %s3250_s4  }
 0x39e   : > { %p30_p4 = scmp.ge.s32.totalorder %s33_s4, 4  }
 0x3a0   :  { %32 = sbr.rel (!%p30_p4) target bundleno = 9 (0x9), region = 161 }

</bundles_post_ra>
